<compile_context>
chip_gen: v7x
topology: tpu7x:2x2x1
jax: 0.10.0
libtpu: 0.0.40
codegen_flags: <defaults>
</compile_context>

<pallas_src>
import functools

import jax
import jax.numpy as jnp
from jax.experimental import pallas as pl
from jax.experimental.pallas import tpu as pltpu

EPS_BN = 1e-5
VMEM = pl.BlockSpec(memory_space=pltpu.MemorySpace.VMEM)


# ---------------------------------------------------------------------------
# Conv2d(k=3,s=2,p=1) + BatchNorm2d(train) + ReLU  --  channel-major layout
# ---------------------------------------------------------------------------
def _conv_bn_relu_kernel(p_ref, w_ref, g_ref, b_ref, o_ref):
    # p: (K, M) im2col patches^T, w: (Cout, K), g/b: (Cout, 1) -> o: (Cout, M).
    # M (= N*Ho*Wo) is a multiple of 128 -> lane-dense output, unmasked stores.
    # Conv bias omitted: training-mode BN mean-subtraction cancels it exactly.
    y = jnp.dot(w_ref[...], p_ref[...], preferred_element_type=jnp.float32)
    inv_m = 1.0 / y.shape[1]
    mu = jnp.sum(y, axis=1, keepdims=True) * inv_m                 # E[y]
    var = jnp.maximum(jnp.sum(y * y, axis=1, keepdims=True) * inv_m - mu * mu, 0.0)
    yhat = (y - mu) * jax.lax.rsqrt(var + EPS_BN)
    o_ref[...] = jnp.maximum(yhat * g_ref[...] + b_ref[...], 0.0)


def conv_bn_relu(patches_t, w_t, gamma, beta):
    cout = w_t.shape[0]
    m = patches_t.shape[1]
    return pl.pallas_call(
        _conv_bn_relu_kernel,
        out_shape=jax.ShapeDtypeStruct((cout, m), jnp.float32),
        in_specs=[VMEM] * 4,
        out_specs=VMEM,
    )(patches_t, w_t, gamma, beta)


def im2col_cmajor_s2_k3_p1(x):
    """x: (Cin, N, H, W) channel-major -> patches^T (9*Cin, N*Ho*Wo).

    Row index of patches^T = (kh*3 + kw)*Cin + ci ; column = n*Ho*Wo + ho*Wo + wo.
    """
    # TODO(synk): move this gather into the Pallas kernel (strided loads /
    # shifted accumulated dots) to avoid materializing the 9x patch array in HBM.
    cin, n, h, w = x.shape
    ho = (h + 2 - 3) // 2 + 1
    wo = (w + 2 - 3) // 2 + 1
    xp = jnp.pad(x, ((0, 0), (0, 0), (1, 1), (1, 1)))
    taps = []
    for kh in range(3):
        for kw in range(3):
            taps.append(xp[:, :, kh:kh + 2 * ho - 1:2, kw:kw + 2 * wo - 1:2])
    pt = jnp.stack(taps, axis=0)                      # (9, Cin, N, Ho, Wo)
    return pt.reshape(9 * cin, n * ho * wo), n, ho, wo


# ---------------------------------------------------------------------------
# Fused head: fc_image + fc_vector + multi-layer GRU + fc_out, one pallas_call
# ---------------------------------------------------------------------------
def _head_kernel(*refs, T, B, num_layers):
    it = iter(refs)
    feat_ref, vec_ref, h0_ref = next(it), next(it), next(it)
    w_img_ref, b_img_ref = next(it), next(it)
    w_v1_ref, b_v1_ref = next(it), next(it)
    w_v2_ref, b_v2_ref = next(it), next(it)
    gru_refs = [(next(it), next(it), next(it), next(it)) for _ in range(num_layers)]
    w_out_ref, b_out_ref = next(it), next(it)
    out_ref, hT_ref = next(it), next(it)

    dot = lambda a, b: jnp.dot(a, b, preferred_element_type=jnp.float32)

    # Feature projections (rows are time-major samples, index = t*B + b).
    img = dot(feat_ref[...], w_img_ref[...]) + b_img_ref[...]                 # (T*B, H)
    v1 = jnp.maximum(dot(vec_ref[...], w_v1_ref[...]) + b_v1_ref[...], 0.0)
    vecf = dot(v1, w_v2_ref[...]) + b_v2_ref[...]                             # (T*B, H)
    x = jnp.concatenate([img, vecf], axis=-1)                                 # (T*B, 2H)

    h = None
    for layer, (wih_ref, whh_ref, bih_ref, bhh_ref) in enumerate(gru_refs):
        last = layer == num_layers - 1
        # Hoisted input projections: one big MXU matmul per gate over all T
        # steps; b_hh for r/z folded in so they vanish from the loop.
        gxr = dot(x, wih_ref[0]) + (bih_ref[0] + bhh_ref[0])                  # (T*B, H)
        gxz = dot(x, wih_ref[1]) + (bih_ref[1] + bhh_ref[1])
        gxn = dot(x, wih_ref[2]) + bih_ref[2]
        # Hoisted recurrent weights / bias (no per-step broadcasts or slices).
        whh_r, whh_z, whh_n = whh_ref[0], whh_ref[1], whh_ref[2]
        bhh_n = bhh_ref[2]
        h = h0_ref[layer]                                                     # (B, H)
        outs = []
        # T is small & static: fully unrolled, all row slices static.
        for t in range(T):
            row = slice(t * B, (t + 1) * B)
            r = jax.nn.sigmoid(gxr[row] + dot(h, whh_r))
            z = jax.nn.sigmoid(gxz[row] + dot(h, whh_z))
            n = jnp.tanh(gxn[row] + r * (dot(h, whh_n) + bhh_n))
            h = (1.0 - z) * n + z * h
            if not last:
                outs.append(h)
        hT_ref[layer] = h
        if not last:
            x = jnp.concatenate(outs, axis=0)                                 # (T*B, H)

    # rnn_out[:, -1, :] == final hidden state of the top layer.
    out_ref[...] = dot(h, w_out_ref[...]) + b_out_ref[...]


def fused_head(feat, vec, h0, params):
    num_layers, B, Hd = h0.shape
    T = feat.shape[0] // B
    inputs = [feat, vec, h0,
              params['fc_image'][0], params['fc_image'][1],
              params['fc_vec1'][0], params['fc_vec1'][1],
              params['fc_vec2'][0], params['fc_vec2'][1]]
    for wih, whh, bih, bhh in params['gru']:
        inputs += [wih, whh, bih, bhh]
    inputs += [params['fc_out'][0], params['fc_out'][1]]

    kernel = functools.partial(_head_kernel, T=T, B=B, num_layers=num_layers)
    return pl.pallas_call(
        kernel,
        out_shape=(jax.ShapeDtypeStruct((B, 3), jnp.float32),
                   jax.ShapeDtypeStruct((num_layers, B, Hd), jnp.float32)),
        in_specs=[VMEM] * len(inputs),
        out_specs=(VMEM, VMEM),
    )(*inputs)


# ---------------------------------------------------------------------------
# Parameters & forward
# ---------------------------------------------------------------------------
def init_params(key, hidden_dim, conv_layers, gru_num_layers):
    keys = iter(jax.random.split(key, 64))
    nrm = lambda shape, s=0.1: s * jax.random.normal(next(keys), shape, jnp.float32)

    params = {}
    convs = []
    chans = [1] + list(conv_layers)
    for cin, cout in zip(chans[:-1], chans[1:]):
        # Pre-transposed conv weight: (Cout, 9*Cin), col = (kh*3 + kw)*Cin + ci.
        w_t = nrm((cout, 9 * cin))
        gamma = 1.0 + nrm((cout, 1))
        beta = nrm((cout, 1))
        convs.append((w_t, gamma, beta))
    params['conv'] = convs

    feat_in = conv_layers[-1] * 4 * 4
    params['fc_image'] = (nrm((feat_in, hidden_dim), 0.05), nrm((1, hidden_dim), 0.05))
    params['fc_vec1'] = (nrm((3, hidden_dim)), nrm((1, hidden_dim)))
    params['fc_vec2'] = (nrm((hidden_dim, hidden_dim)), nrm((1, hidden_dim)))

    gru = []
    in_sz = 2 * hidden_dim
    for _ in range(gru_num_layers):
        gru.append((nrm((3, in_sz, hidden_dim)),        # W_ih per gate [r,z,n], transposed
                    nrm((3, hidden_dim, hidden_dim)),   # W_hh per gate, transposed
                    nrm((3, 1, hidden_dim)),            # b_ih per gate
                    nrm((3, 1, hidden_dim))))           # b_hh per gate
        in_sz = hidden_dim
    params['gru'] = gru
    params['fc_out'] = (nrm((hidden_dim, 3)), nrm((1, 3)))
    return params


def rnn_agent_forward(params, image, vector, hidden=None):
    B, T, C, H, W = image.shape
    Hd = params['fc_image'][0].shape[1]
    num_layers = len(params['gru'])

    # Time-major sample order (row = t*B + b) + channel-major conv layout.
    x = jnp.transpose(image, (2, 1, 0, 3, 4)).reshape(C, T * B, H, W)   # (C, N, H, W)

    for (w_t, gamma, beta) in params['conv']:
        patches_t, n, ho, wo = im2col_cmajor_s2_k3_p1(x)
        y = conv_bn_relu(patches_t, w_t, gamma, beta)                   # (Cout, N*Ho*Wo)
        x = y.reshape(w_t.shape[0], n, ho, wo)                          # free reshape

    # AdaptiveAvgPool2d((4,4)): identity at this input resolution.
    assert x.shape[-2:] == (4, 4)
    # TODO(synk): general adaptive-avg-pool path (non-4x4 conv output) not implemented.

    # (Cout, N, 4, 4) -> (N, Cout*16): same flatten order as torch's NCHW .view.
    feat = jnp.transpose(x, (1, 0, 2, 3)).reshape(T * B, -1)
    vec = jnp.transpose(vector, (1, 0, 2)).reshape(T * B, 3)

    if hidden is None:
        hidden = jnp.zeros((num_layers, B, Hd), jnp.float32)

    output, new_hidden = fused_head(feat, vec, hidden, params)
    return output, new_hidden


if __name__ == "__main__":
    key = jax.random.PRNGKey(0)
    k_param, k_img, k_vec = jax.random.split(key, 3)

    hidden_dim = 32
    conv_layers = [8, 16, 32]          # 3 stride-2 convs: 32 -> 16 -> 8 -> 4
    gru_num_layers = 2
    params = init_params(k_param, hidden_dim, conv_layers, gru_num_layers)

    B, T, C, H, W = 2, 4, 1, 32, 32
    image = jax.random.normal(k_img, (B, T, C, H, W), jnp.float32)
    vector = jax.random.normal(k_vec, (B, T, 3), jnp.float32)

    fwd = jax.jit(rnn_agent_forward)
    out, hid = fwd(params, image, vector)
    jax.block_until_ready(out)
    jax.block_until_ready(hid)
    assert out.shape == (B, 3)
    assert hid.shape == (gru_num_layers, B, hidden_dim)
    assert bool(jnp.all(jnp.isfinite(out)))
    print("KERNEL_OK")
</pallas_src>

<mosaic_0001>
module attributes {stable_mosaic.version = 11 : i64} {
  func.func @_conv_bn_relu_kernel(%arg0: memref<9x2048xf32, #tpu.memory_space<vmem>>, %arg1: memref<8x9xf32, #tpu.memory_space<vmem>>, %arg2: memref<8x1xf32, #tpu.memory_space<vmem>>, %arg3: memref<8x1xf32, #tpu.memory_space<vmem>>, %arg4: memref<8x2048xf32, #tpu.memory_space<vmem>>) attributes {dimension_semantics = [], scalar_prefetch = 0 : i64, scratch_operands = 0 : i64, tpu.core_type = #tpu.core_type<tc>} {
    %c0 = arith.constant 0 : index
    %c0_0 = arith.constant 0 : index
    %0 = vector.load %arg1[%c0, %c0_0] : memref<8x9xf32, #tpu.memory_space<vmem>>, vector<8x9xf32>
    %c0_1 = arith.constant 0 : index
    %c0_2 = arith.constant 0 : index
    %1 = vector.load %arg0[%c0_1, %c0_2] : memref<9x2048xf32, #tpu.memory_space<vmem>>, vector<9x2048xf32>
    %cst = arith.constant dense<0.000000e+00> : vector<8x2048xf32>
    %2 = tpu.matmul %0, %1, %cst {dimension_numbers = #tpu.dot_dimension_numbers<[1], [0], [0], [1], [0, 0, 1, 1], [], []>} : vector<8x9xf32>, vector<9x2048xf32>, vector<8x2048xf32> -> vector<8x2048xf32>
    %cst_3 = arith.constant dense<0.000000e+00> : vector<8xf32>
    %3 = vector.multi_reduction <add>, %2, %cst_3 [1] : vector<8x2048xf32> to vector<8xf32>
    %4 = vector.shape_cast %3 : vector<8xf32> to vector<8x1xf32>
    %cst_4 = arith.constant 4.8828125E-4 : f32
    %5 = vector.broadcast %cst_4 : f32 to vector<8x1xf32>
    %6 = arith.mulf %4, %5 : vector<8x1xf32>
    %7 = arith.mulf %2, %2 : vector<8x2048xf32>
    %cst_5 = arith.constant dense<0.000000e+00> : vector<8xf32>
    %8 = vector.multi_reduction <add>, %7, %cst_5 [1] : vector<8x2048xf32> to vector<8xf32>
    %9 = vector.shape_cast %8 : vector<8xf32> to vector<8x1xf32>
    %cst_6 = arith.constant 4.8828125E-4 : f32
    %10 = vector.broadcast %cst_6 : f32 to vector<8x1xf32>
    %11 = arith.mulf %9, %10 : vector<8x1xf32>
    %12 = arith.mulf %6, %6 : vector<8x1xf32>
    %13 = arith.subf %11, %12 : vector<8x1xf32>
    %cst_7 = arith.constant 0.000000e+00 : f32
    %14 = vector.broadcast %cst_7 : f32 to vector<8x1xf32>
    %15 = arith.maximumf %13, %14 : vector<8x1xf32>
    %16 = vector.broadcast %6 : vector<8x1xf32> to vector<8x2048xf32>
    %17 = arith.subf %2, %16 : vector<8x2048xf32>
    %cst_8 = arith.constant 9.99999974E-6 : f32
    %18 = vector.broadcast %cst_8 : f32 to vector<8x1xf32>
    %19 = arith.addf %15, %18 : vector<8x1xf32>
    %20 = math.rsqrt %19 : vector<8x1xf32>
    %21 = vector.broadcast %20 : vector<8x1xf32> to vector<8x2048xf32>
    %22 = arith.mulf %17, %21 : vector<8x2048xf32>
    %c0_9 = arith.constant 0 : index
    %c0_10 = arith.constant 0 : index
    %23 = vector.load %arg2[%c0_9, %c0_10] : memref<8x1xf32, #tpu.memory_space<vmem>>, vector<8x1xf32>
    %24 = vector.broadcast %23 : vector<8x1xf32> to vector<8x2048xf32>
    %25 = arith.mulf %22, %24 : vector<8x2048xf32>
    %c0_11 = arith.constant 0 : index
    %c0_12 = arith.constant 0 : index
    %26 = vector.load %arg3[%c0_11, %c0_12] : memref<8x1xf32, #tpu.memory_space<vmem>>, vector<8x1xf32>
    %27 = vector.broadcast %26 : vector<8x1xf32> to vector<8x2048xf32>
    %28 = arith.addf %25, %27 : vector<8x2048xf32>
    %cst_13 = arith.constant 0.000000e+00 : f32
    %29 = vector.broadcast %cst_13 : f32 to vector<8x2048xf32>
    %30 = arith.maximumf %28, %29 : vector<8x2048xf32>
    %c0_14 = arith.constant 0 : index
    %c0_15 = arith.constant 0 : index
    %31 = vector.load %arg4[%c0_14, %c0_15] : memref<8x2048xf32, #tpu.memory_space<vmem>>, vector<8x2048xf32>
    tpu.vector_store %arg4[%c0_14, %c0_15], %30 {strides = array<i32>} : memref<8x2048xf32, #tpu.memory_space<vmem>>, vector<8x2048xf32>,
    return
  }
}

module attributes {stable_mosaic.version = 11 : i64} {
  func.func @_conv_bn_relu_kernel(%arg0: memref<72x512xf32, #tpu.memory_space<vmem>>, %arg1: memref<16x72xf32, #tpu.memory_space<vmem>>, %arg2: memref<16x1xf32, #tpu.memory_space<vmem>>, %arg3: memref<16x1xf32, #tpu.memory_space<vmem>>, %arg4: memref<16x512xf32, #tpu.memory_space<vmem>>) attributes {dimension_semantics = [], scalar_prefetch = 0 : i64, scratch_operands = 0 : i64, tpu.core_type = #tpu.core_type<tc>} {
    %c0 = arith.constant 0 : index
    %c0_0 = arith.constant 0 : index
    %0 = vector.load %arg1[%c0, %c0_0] : memref<16x72xf32, #tpu.memory_space<vmem>>, vector<16x72xf32>
    %c0_1 = arith.constant 0 : index
    %c0_2 = arith.constant 0 : index
    %1 = vector.load %arg0[%c0_1, %c0_2] : memref<72x512xf32, #tpu.memory_space<vmem>>, vector<72x512xf32>
    %cst = arith.constant dense<0.000000e+00> : vector<16x512xf32>
    %2 = tpu.matmul %0, %1, %cst {dimension_numbers = #tpu.dot_dimension_numbers<[1], [0], [0], [1], [0, 0, 1, 1], [], []>} : vector<16x72xf32>, vector<72x512xf32>, vector<16x512xf32> -> vector<16x512xf32>
    %cst_3 = arith.constant dense<0.000000e+00> : vector<16xf32>
    %3 = vector.multi_reduction <add>, %2, %cst_3 [1] : vector<16x512xf32> to vector<16xf32>
    %4 = vector.shape_cast %3 : vector<16xf32> to vector<16x1xf32>
    %cst_4 = arith.constant 0.001953125 : f32
    %5 = vector.broadcast %cst_4 : f32 to vector<16x1xf32>
    %6 = arith.mulf %4, %5 : vector<16x1xf32>
    %7 = arith.mulf %2, %2 : vector<16x512xf32>
    %cst_5 = arith.constant dense<0.000000e+00> : vector<16xf32>
    %8 = vector.multi_reduction <add>, %7, %cst_5 [1] : vector<16x512xf32> to vector<16xf32>
    %9 = vector.shape_cast %8 : vector<16xf32> to vector<16x1xf32>
    %cst_6 = arith.constant 0.001953125 : f32
    %10 = vector.broadcast %cst_6 : f32 to vector<16x1xf32>
    %11 = arith.mulf %9, %10 : vector<16x1xf32>
    %12 = arith.mulf %6, %6 : vector<16x1xf32>
    %13 = arith.subf %11, %12 : vector<16x1xf32>
    %cst_7 = arith.constant 0.000000e+00 : f32
    %14 = vector.broadcast %cst_7 : f32 to vector<16x1xf32>
    %15 = arith.maximumf %13, %14 : vector<16x1xf32>
    %16 = vector.broadcast %6 : vector<16x1xf32> to vector<16x512xf32>
    %17 = arith.subf %2, %16 : vector<16x512xf32>
    %cst_8 = arith.constant 9.99999974E-6 : f32
    %18 = vector.broadcast %cst_8 : f32 to vector<16x1xf32>
    %19 = arith.addf %15, %18 : vector<16x1xf32>
    %20 = math.rsqrt %19 : vector<16x1xf32>
    %21 = vector.broadcast %20 : vector<16x1xf32> to vector<16x512xf32>
    %22 = arith.mulf %17, %21 : vector<16x512xf32>
    %c0_9 = arith.constant 0 : index
    %c0_10 = arith.constant 0 : index
    %23 = vector.load %arg2[%c0_9, %c0_10] : memref<16x1xf32, #tpu.memory_space<vmem>>, vector<16x1xf32>
    %24 = vector.broadcast %23 : vector<16x1xf32> to vector<16x512xf32>
    %25 = arith.mulf %22, %24 : vector<16x512xf32>
    %c0_11 = arith.constant 0 : index
    %c0_12 = arith.constant 0 : index
    %26 = vector.load %arg3[%c0_11, %c0_12] : memref<16x1xf32, #tpu.memory_space<vmem>>, vector<16x1xf32>
    %27 = vector.broadcast %26 : vector<16x1xf32> to vector<16x512xf32>
    %28 = arith.addf %25, %27 : vector<16x512xf32>
    %cst_13 = arith.constant 0.000000e+00 : f32
    %29 = vector.broadcast %cst_13 : f32 to vector<16x512xf32>
    %30 = arith.maximumf %28, %29 : vector<16x512xf32>
    %c0_14 = arith.constant 0 : index
    %c0_15 = arith.constant 0 : index
    %31 = vector.load %arg4[%c0_14, %c0_15] : memref<16x512xf32, #tpu.memory_space<vmem>>, vector<16x512xf32>
    tpu.vector_store %arg4[%c0_14, %c0_15], %30 {strides = array<i32>} : memref<16x512xf32, #tpu.memory_space<vmem>>, vector<16x512xf32>,
    return
  }
}

module attributes {stable_mosaic.version = 11 : i64} {
  func.func @_conv_bn_relu_kernel(%arg0: memref<144x128xf32, #tpu.memory_space<vmem>>, %arg1: memref<32x144xf32, #tpu.memory_space<vmem>>, %arg2: memref<32x1xf32, #tpu.memory_space<vmem>>, %arg3: memref<32x1xf32, #tpu.memory_space<vmem>>, %arg4: memref<32x128xf32, #tpu.memory_space<vmem>>) attributes {dimension_semantics = [], scalar_prefetch = 0 : i64, scratch_operands = 0 : i64, tpu.core_type = #tpu.core_type<tc>} {
    %c0 = arith.constant 0 : index
    %c0_0 = arith.constant 0 : index
    %0 = vector.load %arg1[%c0, %c0_0] : memref<32x144xf32, #tpu.memory_space<vmem>>, vector<32x144xf32>
    %c0_1 = arith.constant 0 : index
    %c0_2 = arith.constant 0 : index
    %1 = vector.load %arg0[%c0_1, %c0_2] : memref<144x128xf32, #tpu.memory_space<vmem>>, vector<144x128xf32>
    %cst = arith.constant dense<0.000000e+00> : vector<32x128xf32>
    %2 = tpu.matmul %0, %1, %cst {dimension_numbers = #tpu.dot_dimension_numbers<[1], [0], [0], [1], [0, 0, 1, 1], [], []>} : vector<32x144xf32>, vector<144x128xf32>, vector<32x128xf32> -> vector<32x128xf32>
    %cst_3 = arith.constant dense<0.000000e+00> : vector<32xf32>
    %3 = vector.multi_reduction <add>, %2, %cst_3 [1] : vector<32x128xf32> to vector<32xf32>
    %4 = vector.shape_cast %3 : vector<32xf32> to vector<32x1xf32>
    %cst_4 = arith.constant 7.812500e-03 : f32
    %5 = vector.broadcast %cst_4 : f32 to vector<32x1xf32>
    %6 = arith.mulf %4, %5 : vector<32x1xf32>
    %7 = arith.mulf %2, %2 : vector<32x128xf32>
    %cst_5 = arith.constant dense<0.000000e+00> : vector<32xf32>
    %8 = vector.multi_reduction <add>, %7, %cst_5 [1] : vector<32x128xf32> to vector<32xf32>
    %9 = vector.shape_cast %8 : vector<32xf32> to vector<32x1xf32>
    %cst_6 = arith.constant 7.812500e-03 : f32
    %10 = vector.broadcast %cst_6 : f32 to vector<32x1xf32>
    %11 = arith.mulf %9, %10 : vector<32x1xf32>
    %12 = arith.mulf %6, %6 : vector<32x1xf32>
    %13 = arith.subf %11, %12 : vector<32x1xf32>
    %cst_7 = arith.constant 0.000000e+00 : f32
    %14 = vector.broadcast %cst_7 : f32 to vector<32x1xf32>
    %15 = arith.maximumf %13, %14 : vector<32x1xf32>
    %16 = vector.broadcast %6 : vector<32x1xf32> to vector<32x128xf32>
    %17 = arith.subf %2, %16 : vector<32x128xf32>
    %cst_8 = arith.constant 9.99999974E-6 : f32
    %18 = vector.broadcast %cst_8 : f32 to vector<32x1xf32>
    %19 = arith.addf %15, %18 : vector<32x1xf32>
    %20 = math.rsqrt %19 : vector<32x1xf32>
    %21 = vector.broadcast %20 : vector<32x1xf32> to vector<32x128xf32>
    %22 = arith.mulf %17, %21 : vector<32x128xf32>
    %c0_9 = arith.constant 0 : index
    %c0_10 = arith.constant 0 : index
    %23 = vector.load %arg2[%c0_9, %c0_10] : memref<32x1xf32, #tpu.memory_space<vmem>>, vector<32x1xf32>
    %24 = vector.broadcast %23 : vector<32x1xf32> to vector<32x128xf32>
    %25 = arith.mulf %22, %24 : vector<32x128xf32>
    %c0_11 = arith.constant 0 : index
    %c0_12 = arith.constant 0 : index
    %26 = vector.load %arg3[%c0_11, %c0_12] : memref<32x1xf32, #tpu.memory_space<vmem>>, vector<32x1xf32>
    %27 = vector.broadcast %26 : vector<32x1xf32> to vector<32x128xf32>
    %28 = arith.addf %25, %27 : vector<32x128xf32>
    %cst_13 = arith.constant 0.000000e+00 : f32
    %29 = vector.broadcast %cst_13 : f32 to vector<32x128xf32>
    %30 = arith.maximumf %28, %29 : vector<32x128xf32>
    %c0_14 = arith.constant 0 : index
    %c0_15 = arith.constant 0 : index
    %31 = vector.load %arg4[%c0_14, %c0_15] : memref<32x128xf32, #tpu.memory_space<vmem>>, vector<32x128xf32>
    tpu.vector_store %arg4[%c0_14, %c0_15], %30 {strides = array<i32>} : memref<32x128xf32, #tpu.memory_space<vmem>>, vector<32x128xf32>,
    return
  }
}

module attributes {stable_mosaic.version = 11 : i64} {
  func.func @_head_kernel(%arg0: memref<8x512xf32, #tpu.memory_space<vmem>>, %arg1: memref<8x3xf32, #tpu.memory_space<vmem>>, %arg2: memref<2x2x32xf32, #tpu.memory_space<vmem>>, %arg3: memref<512x32xf32, #tpu.memory_space<vmem>>, %arg4: memref<1x32xf32, #tpu.memory_space<vmem>>, %arg5: memref<3x32xf32, #tpu.memory_space<vmem>>, %arg6: memref<1x32xf32, #tpu.memory_space<vmem>>, %arg7: memref<32x32xf32, #tpu.memory_space<vmem>>, %arg8: memref<1x32xf32, #tpu.memory_space<vmem>>, %arg9: memref<3x64x32xf32, #tpu.memory_space<vmem>>, %arg10: memref<3x32x32xf32, #tpu.memory_space<vmem>>, %arg11: memref<3x1x32xf32, #tpu.memory_space<vmem>>, %arg12: memref<3x1x32xf32, #tpu.memory_space<vmem>>, %arg13: memref<3x32x32xf32, #tpu.memory_space<vmem>>, %arg14: memref<3x32x32xf32, #tpu.memory_space<vmem>>, %arg15: memref<3x1x32xf32, #tpu.memory_space<vmem>>, %arg16: memref<3x1x32xf32, #tpu.memory_space<vmem>>, %arg17: memref<32x3xf32, #tpu.memory_space<vmem>>, %arg18: memref<1x3xf32, #tpu.memory_space<vmem>>, %arg19: memref<2x3xf32, #tpu.memory_space<vmem>>, %arg20: memref<2x2x32xf32, #tpu.memory_space<vmem>>) attributes {dimension_semantics = [], scalar_prefetch = 0 : i64, scratch_operands = 0 : i64, tpu.core_type = #tpu.core_type<tc>} {
    %c0 = arith.constant 0 : index
    %c0_0 = arith.constant 0 : index
    %0 = vector.load %arg0[%c0, %c0_0] : memref<8x512xf32, #tpu.memory_space<vmem>>, vector<8x512xf32>
    %c0_1 = arith.constant 0 : index
    %c0_2 = arith.constant 0 : index
    %1 = vector.load %arg3[%c0_1, %c0_2] : memref<512x32xf32, #tpu.memory_space<vmem>>, vector<512x32xf32>
    %cst = arith.constant dense<0.000000e+00> : vector<8x32xf32>
    %2 = tpu.matmul %0, %1, %cst {dimension_numbers = #tpu.dot_dimension_numbers<[1], [0], [0], [1], [0, 0, 1, 1], [], []>} : vector<8x512xf32>, vector<512x32xf32>, vector<8x32xf32> -> vector<8x32xf32>
    %c0_3 = arith.constant 0 : index
    %c0_4 = arith.constant 0 : index
    %3 = vector.load %arg4[%c0_3, %c0_4] : memref<1x32xf32, #tpu.memory_space<vmem>>, vector<1x32xf32>
    %4 = vector.broadcast %3 : vector<1x32xf32> to vector<8x32xf32>
    %5 = arith.addf %2, %4 : vector<8x32xf32>
    %c0_5 = arith.constant 0 : index
    %c0_6 = arith.constant 0 : index
    %6 = vector.load %arg1[%c0_5, %c0_6] : memref<8x3xf32, #tpu.memory_space<vmem>>, vector<8x3xf32>
    %c0_7 = arith.constant 0 : index
    %c0_8 = arith.constant 0 : index
    %7 = vector.load %arg5[%c0_7, %c0_8] : memref<3x32xf32, #tpu.memory_space<vmem>>, vector<3x32xf32>
    %cst_9 = arith.constant dense<0.000000e+00> : vector<8x32xf32>
    %8 = tpu.matmul %6, %7, %cst_9 {dimension_numbers = #tpu.dot_dimension_numbers<[1], [0], [0], [1], [0, 0, 1, 1], [], []>} : vector<8x3xf32>, vector<3x32xf32>, vector<8x32xf32> -> vector<8x32xf32>
    %c0_10 = arith.constant 0 : index
    %c0_11 = arith.constant 0 : index
    %9 = vector.load %arg6[%c0_10, %c0_11] : memref<1x32xf32, #tpu.memory_space<vmem>>, vector<1x32xf32>
    %10 = vector.broadcast %9 : vector<1x32xf32> to vector<8x32xf32>
    %11 = arith.addf %8, %10 : vector<8x32xf32>
    %cst_12 = arith.constant 0.000000e+00 : f32
    %12 = vector.broadcast %cst_12 : f32 to vector<8x32xf32>
    %13 = arith.maximumf %11, %12 : vector<8x32xf32>
    %c0_13 = arith.constant 0 : index
    %c0_14 = arith.constant 0 : index
    %14 = vector.load %arg7[%c0_13, %c0_14] : memref<32x32xf32, #tpu.memory_space<vmem>>, vector<32x32xf32>
    %cst_15 = arith.constant dense<0.000000e+00> : vector<8x32xf32>
    %15 = tpu.matmul %13, %14, %cst_15 {dimension_numbers = #tpu.dot_dimension_numbers<[1], [0], [0], [1], [0, 0, 1, 1], [], []>} : vector<8x32xf32>, vector<32x32xf32>, vector<8x32xf32> -> vector<8x32xf32>
    %c0_16 = arith.constant 0 : index
    %c0_17 = arith.constant 0 : index
    %16 = vector.load %arg8[%c0_16, %c0_17] : memref<1x32xf32, #tpu.memory_space<vmem>>, vector<1x32xf32>
    %17 = vector.broadcast %16 : vector<1x32xf32> to vector<8x32xf32>
    %18 = arith.addf %15, %17 : vector<8x32xf32>
    %19 = tpu.concatenate %5, %18 in 1 : vector<8x32xf32>, vector<8x32xf32> -> vector<8x64xf32>
    %c0_18 = arith.constant 0 : index
    %c0_19 = arith.constant 0 : index
    %c0_20 = arith.constant 0 : index
    %20 = vector.load %arg9[%c0_18, %c0_19, %c0_20] : memref<3x64x32xf32, #tpu.memory_space<vmem>>, vector<1x64x32xf32>
    %21 = vector.shape_cast %20 : vector<1x64x32xf32> to vector<64x32xf32>
    %cst_21 = arith.constant dense<0.000000e+00> : vector<8x32xf32>
    %22 = tpu.matmul %19, %21, %cst_21 {dimension_numbers = #tpu.dot_dimension_numbers<[1], [0], [0], [1], [0, 0, 1, 1], [], []>} : vector<8x64xf32>, vector<64x32xf32>, vector<8x32xf32> -> vector<8x32xf32>
    %c0_22 = arith.constant 0 : index
    %c0_23 = arith.constant 0 : index
    %c0_24 = arith.constant 0 : index
    %23 = vector.load %arg11[%c0_22, %c0_23, %c0_24] : memref<3x1x32xf32, #tpu.memory_space<vmem>>, vector<1x1x32xf32>
    %24 = vector.shape_cast %23 : vector<1x1x32xf32> to vector<1x32xf32>
    %c0_25 = arith.constant 0 : index
    %c0_26 = arith.constant 0 : index
    %c0_27 = arith.constant 0 : index
    %25 = vector.load %arg12[%c0_25, %c0_26, %c0_27] : memref<3x1x32xf32, #tpu.memory_space<vmem>>, vector<1x1x32xf32>
    %26 = vector.shape_cast %25 : vector<1x1x32xf32> to vector<1x32xf32>
    %27 = arith.addf %24, %26 : vector<1x32xf32>
    %28 = vector.broadcast %27 : vector<1x32xf32> to vector<8x32xf32>
    %29 = arith.addf %22, %28 : vector<8x32xf32>
    %c1 = arith.constant 1 : index
    %c0_28 = arith.constant 0 : index
    %c0_29 = arith.constant 0 : index
    %30 = vector.load %arg9[%c1, %c0_28, %c0_29] : memref<3x64x32xf32, #tpu.memory_space<vmem>>, vector<1x64x32xf32>
    %31 = vector.shape_cast %30 : vector<1x64x32xf32> to vector<64x32xf32>
    %cst_30 = arith.constant dense<0.000000e+00> : vector<8x32xf32>
    %32 = tpu.matmul %19, %31, %cst_30 {dimension_numbers = #tpu.dot_dimension_numbers<[1], [0], [0], [1], [0, 0, 1, 1], [], []>} : vector<8x64xf32>, vector<64x32xf32>, vector<8x32xf32> -> vector<8x32xf32>
    %c1_31 = arith.constant 1 : index
    %c0_32 = arith.constant 0 : index
    %c0_33 = arith.constant 0 : index
    %33 = vector.load %arg11[%c1_31, %c0_32, %c0_33] : memref<3x1x32xf32, #tpu.memory_space<vmem>>, vector<1x1x32xf32>
    %34 = vector.shape_cast %33 : vector<1x1x32xf32> to vector<1x32xf32>
    %c1_34 = arith.constant 1 : index
    %c0_35 = arith.constant 0 : index
    %c0_36 = arith.constant 0 : index
    %35 = vector.load %arg12[%c1_34, %c0_35, %c0_36] : memref<3x1x32xf32, #tpu.memory_space<vmem>>, vector<1x1x32xf32>
    %36 = vector.shape_cast %35 : vector<1x1x32xf32> to vector<1x32xf32>
    %37 = arith.addf %34, %36 : vector<1x32xf32>
    %38 = vector.broadcast %37 : vector<1x32xf32> to vector<8x32xf32>
    %39 = arith.addf %32, %38 : vector<8x32xf32>
    %c2 = arith.constant 2 : index
    %c0_37 = arith.constant 0 : index
    %c0_38 = arith.constant 0 : index
    %40 = vector.load %arg9[%c2, %c0_37, %c0_38] : memref<3x64x32xf32, #tpu.memory_space<vmem>>, vector<1x64x32xf32>
    %41 = vector.shape_cast %40 : vector<1x64x32xf32> to vector<64x32xf32>
    %cst_39 = arith.constant dense<0.000000e+00> : vector<8x32xf32>
    %42 = tpu.matmul %19, %41, %cst_39 {dimension_numbers = #tpu.dot_dimension_numbers<[1], [0], [0], [1], [0, 0, 1, 1], [], []>} : vector<8x64xf32>, vector<64x32xf32>, vector<8x32xf32> -> vector<8x32xf32>
    %c2_40 = arith.constant 2 : index
    %c0_41 = arith.constant 0 : index
    %c0_42 = arith.constant 0 : index
    %43 = vector.load %arg11[%c2_40, %c0_41, %c0_42] : memref<3x1x32xf32, #tpu.memory_space<vmem>>, vector<1x1x32xf32>
    %44 = vector.shape_cast %43 : vector<1x1x32xf32> to vector<1x32xf32>
    %45 = vector.broadcast %44 : vector<1x32xf32> to vector<8x32xf32>
    %46 = arith.addf %42, %45 : vector<8x32xf32>
    %c0_43 = arith.constant 0 : index
    %c0_44 = arith.constant 0 : index
    %c0_45 = arith.constant 0 : index
    %47 = vector.load %arg10[%c0_43, %c0_44, %c0_45] : memref<3x32x32xf32, #tpu.memory_space<vmem>>, vector<1x32x32xf32>
    %48 = vector.shape_cast %47 : vector<1x32x32xf32> to vector<32x32xf32>
    %c1_46 = arith.constant 1 : index
    %c0_47 = arith.constant 0 : index
    %c0_48 = arith.constant 0 : index
    %49 = vector.load %arg10[%c1_46, %c0_47, %c0_48] : memref<3x32x32xf32, #tpu.memory_space<vmem>>, vector<1x32x32xf32>
    %50 = vector.shape_cast %49 : vector<1x32x32xf32> to vector<32x32xf32>
    %c2_49 = arith.constant 2 : index
    %c0_50 = arith.constant 0 : index
    %c0_51 = arith.constant 0 : index
    %51 = vector.load %arg10[%c2_49, %c0_50, %c0_51] : memref<3x32x32xf32, #tpu.memory_space<vmem>>, vector<1x32x32xf32>
    %52 = vector.shape_cast %51 : vector<1x32x32xf32> to vector<32x32xf32>
    %c2_52 = arith.constant 2 : index
    %c0_53 = arith.constant 0 : index
    %c0_54 = arith.constant 0 : index
    %53 = vector.load %arg12[%c2_52, %c0_53, %c0_54] : memref<3x1x32xf32, #tpu.memory_space<vmem>>, vector<1x1x32xf32>
    %54 = vector.shape_cast %53 : vector<1x1x32xf32> to vector<1x32xf32>
    %c0_55 = arith.constant 0 : index
    %c0_56 = arith.constant 0 : index
    %c0_57 = arith.constant 0 : index
    %55 = vector.load %arg2[%c0_55, %c0_56, %c0_57] : memref<2x2x32xf32, #tpu.memory_space<vmem>>, vector<1x2x32xf32>
    %56 = vector.shape_cast %55 : vector<1x2x32xf32> to vector<2x32xf32>
    %57 = vector.extract_strided_slice %29 {offsets = [0, 0], sizes = [2, 32], strides = [1, 1]} : vector<8x32xf32> to vector<2x32xf32>
    %cst_58 = arith.constant dense<0.000000e+00> : vector<2x32xf32>
    %58 = tpu.matmul %56, %48, %cst_58 {dimension_numbers = #tpu.dot_dimension_numbers<[1], [0], [0], [1], [0, 0, 1, 1], [], []>} : vector<2x32xf32>, vector<32x32xf32>, vector<2x32xf32> -> vector<2x32xf32>
    %59 = arith.addf %57, %58 : vector<2x32xf32>
    %60 = arith.negf %59 : vector<2x32xf32>
    %61 = math.exp %60 : vector<2x32xf32>
    %cst_59 = arith.constant 1.000000e+00 : f32
    %62 = vector.broadcast %cst_59 : f32 to vector<2x32xf32>
    %63 = arith.addf %62, %61 : vector<2x32xf32>
    %64 = arith.divf %62, %63 : vector<2x32xf32>
    %65 = vector.extract_strided_slice %39 {offsets = [0, 0], sizes = [2, 32], strides = [1, 1]} : vector<8x32xf32> to vector<2x32xf32>
    %cst_60 = arith.constant dense<0.000000e+00> : vector<2x32xf32>
    %66 = tpu.matmul %56, %50, %cst_60 {dimension_numbers = #tpu.dot_dimension_numbers<[1], [0], [0], [1], [0, 0, 1, 1], [], []>} : vector<2x32xf32>, vector<32x32xf32>, vector<2x32xf32> -> vector<2x32xf32>
    %67 = arith.addf %65, %66 : vector<2x32xf32>
    %68 = arith.negf %67 : vector<2x32xf32>
    %69 = math.exp %68 : vector<2x32xf32>
    %cst_61 = arith.constant 1.000000e+00 : f32
    %70 = vector.broadcast %cst_61 : f32 to vector<2x32xf32>
    %71 = arith.addf %70, %69 : vector<2x32xf32>
    %72 = arith.divf %70, %71 : vector<2x32xf32>
    %73 = vector.extract_strided_slice %46 {offsets = [0, 0], sizes = [2, 32], strides = [1, 1]} : vector<8x32xf32> to vector<2x32xf32>
    %cst_62 = arith.constant dense<0.000000e+00> : vector<2x32xf32>
    %74 = tpu.matmul %56, %52, %cst_62 {dimension_numbers = #tpu.dot_dimension_numbers<[1], [0], [0], [1], [0, 0, 1, 1], [], []>} : vector<2x32xf32>, vector<32x32xf32>, vector<2x32xf32> -> vector<2x32xf32>
    %75 = vector.broadcast %54 : vector<1x32xf32> to vector<2x32xf32>
    %76 = arith.addf %74, %75 : vector<2x32xf32>
    %77 = arith.mulf %64, %76 : vector<2x32xf32>
    %78 = arith.addf %73, %77 : vector<2x32xf32>
    %79 = math.tanh %78 : vector<2x32xf32>
    %cst_63 = arith.constant 1.000000e+00 : f32
    %80 = vector.broadcast %cst_63 : f32 to vector<2x32xf32>
    %81 = arith.subf %80, %72 : vector<2x32xf32>
    %82 = arith.mulf %81, %79 : vector<2x32xf32>
    %83 = arith.mulf %72, %56 : vector<2x32xf32>
    %84 = arith.addf %82, %83 : vector<2x32xf32>
    %85 = vector.extract_strided_slice %29 {offsets = [2, 0], sizes = [2, 32], strides = [1, 1]} : vector<8x32xf32> to vector<2x32xf32>
    %cst_64 = arith.constant dense<0.000000e+00> : vector<2x32xf32>
    %86 = tpu.matmul %84, %48, %cst_64 {dimension_numbers = #tpu.dot_dimension_numbers<[1], [0], [0], [1], [0, 0, 1, 1], [], []>} : vector<2x32xf32>, vector<32x32xf32>, vector<2x32xf32> -> vector<2x32xf32>
    %87 = arith.addf %85, %86 : vector<2x32xf32>
    %88 = arith.negf %87 : vector<2x32xf32>
    %89 = math.exp %88 : vector<2x32xf32>
    %cst_65 = arith.constant 1.000000e+00 : f32
    %90 = vector.broadcast %cst_65 : f32 to vector<2x32xf32>
    %91 = arith.addf %90, %89 : vector<2x32xf32>
    %92 = arith.divf %90, %91 : vector<2x32xf32>
    %93 = vector.extract_strided_slice %39 {offsets = [2, 0], sizes = [2, 32], strides = [1, 1]} : vector<8x32xf32> to vector<2x32xf32>
    %cst_66 = arith.constant dense<0.000000e+00> : vector<2x32xf32>
    %94 = tpu.matmul %84, %50, %cst_66 {dimension_numbers = #tpu.dot_dimension_numbers<[1], [0], [0], [1], [0, 0, 1, 1], [], []>} : vector<2x32xf32>, vector<32x32xf32>, vector<2x32xf32> -> vector<2x32xf32>
    %95 = arith.addf %93, %94 : vector<2x32xf32>
    %96 = arith.negf %95 : vector<2x32xf32>
    %97 = math.exp %96 : vector<2x32xf32>
    %cst_67 = arith.constant 1.000000e+00 : f32
    %98 = vector.broadcast %cst_67 : f32 to vector<2x32xf32>
    %99 = arith.addf %98, %97 : vector<2x32xf32>
    %100 = arith.divf %98, %99 : vector<2x32xf32>
    %101 = vector.extract_strided_slice %46 {offsets = [2, 0], sizes = [2, 32], strides = [1, 1]} : vector<8x32xf32> to vector<2x32xf32>
    %cst_68 = arith.constant dense<0.000000e+00> : vector<2x32xf32>
    %102 = tpu.matmul %84, %52, %cst_68 {dimension_numbers = #tpu.dot_dimension_numbers<[1], [0], [0], [1], [0, 0, 1, 1], [], []>} : vector<2x32xf32>, vector<32x32xf32>, vector<2x32xf32> -> vector<2x32xf32>
    %103 = vector.broadcast %54 : vector<1x32xf32> to vector<2x32xf32>
    %104 = arith.addf %102, %103 : vector<2x32xf32>
    %105 = arith.mulf %92, %104 : vector<2x32xf32>
    %106 = arith.addf %101, %105 : vector<2x32xf32>
    %107 = math.tanh %106 : vector<2x32xf32>
    %cst_69 = arith.constant 1.000000e+00 : f32
    %108 = vector.broadcast %cst_69 : f32 to vector<2x32xf32>
    %109 = arith.subf %108, %100 : vector<2x32xf32>
    %110 = arith.mulf %109, %107 : vector<2x32xf32>
    %111 = arith.mulf %100, %84 : vector<2x32xf32>
    %112 = arith.addf %110, %111 : vector<2x32xf32>
    %113 = vector.extract_strided_slice %29 {offsets = [4, 0], sizes = [2, 32], strides = [1, 1]} : vector<8x32xf32> to vector<2x32xf32>
    %cst_70 = arith.constant dense<0.000000e+00> : vector<2x32xf32>
    %114 = tpu.matmul %112, %48, %cst_70 {dimension_numbers = #tpu.dot_dimension_numbers<[1], [0], [0], [1], [0, 0, 1, 1], [], []>} : vector<2x32xf32>, vector<32x32xf32>, vector<2x32xf32> -> vector<2x32xf32>
    %115 = arith.addf %113, %114 : vector<2x32xf32>
    %116 = arith.negf %115 : vector<2x32xf32>
    %117 = math.exp %116 : vector<2x32xf32>
    %cst_71 = arith.constant 1.000000e+00 : f32
    %118 = vector.broadcast %cst_71 : f32 to vector<2x32xf32>
    %119 = arith.addf %118, %117 : vector<2x32xf32>
    %120 = arith.divf %118, %119 : vector<2x32xf32>
    %121 = vector.extract_strided_slice %39 {offsets = [4, 0], sizes = [2, 32], strides = [1, 1]} : vector<8x32xf32> to vector<2x32xf32>
    %cst_72 = arith.constant dense<0.000000e+00> : vector<2x32xf32>
    %122 = tpu.matmul %112, %50, %cst_72 {dimension_numbers = #tpu.dot_dimension_numbers<[1], [0], [0], [1], [0, 0, 1, 1], [], []>} : vector<2x32xf32>, vector<32x32xf32>, vector<2x32xf32> -> vector<2x32xf32>
    %123 = arith.addf %121, %122 : vector<2x32xf32>
    %124 = arith.negf %123 : vector<2x32xf32>
    %125 = math.exp %124 : vector<2x32xf32>
    %cst_73 = arith.constant 1.000000e+00 : f32
    %126 = vector.broadcast %cst_73 : f32 to vector<2x32xf32>
    %127 = arith.addf %126, %125 : vector<2x32xf32>
    %128 = arith.divf %126, %127 : vector<2x32xf32>
    %129 = vector.extract_strided_slice %46 {offsets = [4, 0], sizes = [2, 32], strides = [1, 1]} : vector<8x32xf32> to vector<2x32xf32>
    %cst_74 = arith.constant dense<0.000000e+00> : vector<2x32xf32>
    %130 = tpu.matmul %112, %52, %cst_74 {dimension_numbers = #tpu.dot_dimension_numbers<[1], [0], [0], [1], [0, 0, 1, 1], [], []>} : vector<2x32xf32>, vector<32x32xf32>, vector<2x32xf32> -> vector<2x32xf32>
    %131 = vector.broadcast %54 : vector<1x32xf32> to vector<2x32xf32>
    %132 = arith.addf %130, %131 : vector<2x32xf32>
    %133 = arith.mulf %120, %132 : vector<2x32xf32>
    %134 = arith.addf %129, %133 : vector<2x32xf32>
    %135 = math.tanh %134 : vector<2x32xf32>
    %cst_75 = arith.constant 1.000000e+00 : f32
    %136 = vector.broadcast %cst_75 : f32 to vector<2x32xf32>
    %137 = arith.subf %136, %128 : vector<2x32xf32>
    %138 = arith.mulf %137, %135 : vector<2x32xf32>
    %139 = arith.mulf %128, %112 : vector<2x32xf32>
    %140 = arith.addf %138, %139 : vector<2x32xf32>
    %141 = vector.extract_strided_slice %29 {offsets = [6, 0], sizes = [2, 32], strides = [1, 1]} : vector<8x32xf32> to vector<2x32xf32>
    %cst_76 = arith.constant dense<0.000000e+00> : vector<2x32xf32>
    %142 = tpu.matmul %140, %48, %cst_76 {dimension_numbers = #tpu.dot_dimension_numbers<[1], [0], [0], [1], [0, 0, 1, 1], [], []>} : vector<2x32xf32>, vector<32x32xf32>, vector<2x32xf32> -> vector<2x32xf32>
    %143 = arith.addf %141, %142 : vector<2x32xf32>
    %144 = arith.negf %143 : vector<2x32xf32>
    %145 = math.exp %144 : vector<2x32xf32>
    %cst_77 = arith.constant 1.000000e+00 : f32
    %146 = vector.broadcast %cst_77 : f32 to vector<2x32xf32>
    %147 = arith.addf %146, %145 : vector<2x32xf32>
    %148 = arith.divf %146, %147 : vector<2x32xf32>
    %149 = vector.extract_strided_slice %39 {offsets = [6, 0], sizes = [2, 32], strides = [1, 1]} : vector<8x32xf32> to vector<2x32xf32>
    %cst_78 = arith.constant dense<0.000000e+00> : vector<2x32xf32>
    %150 = tpu.matmul %140, %50, %cst_78 {dimension_numbers = #tpu.dot_dimension_numbers<[1], [0], [0], [1], [0, 0, 1, 1], [], []>} : vector<2x32xf32>, vector<32x32xf32>, vector<2x32xf32> -> vector<2x32xf32>
    %151 = arith.addf %149, %150 : vector<2x32xf32>
    %152 = arith.negf %151 : vector<2x32xf32>
    %153 = math.exp %152 : vector<2x32xf32>
    %cst_79 = arith.constant 1.000000e+00 : f32
    %154 = vector.broadcast %cst_79 : f32 to vector<2x32xf32>
    %155 = arith.addf %154, %153 : vector<2x32xf32>
    %156 = arith.divf %154, %155 : vector<2x32xf32>
    %157 = vector.extract_strided_slice %46 {offsets = [6, 0], sizes = [2, 32], strides = [1, 1]} : vector<8x32xf32> to vector<2x32xf32>
    %cst_80 = arith.constant dense<0.000000e+00> : vector<2x32xf32>
    %158 = tpu.matmul %140, %52, %cst_80 {dimension_numbers = #tpu.dot_dimension_numbers<[1], [0], [0], [1], [0, 0, 1, 1], [], []>} : vector<2x32xf32>, vector<32x32xf32>, vector<2x32xf32> -> vector<2x32xf32>
    %159 = vector.broadcast %54 : vector<1x32xf32> to vector<2x32xf32>
    %160 = arith.addf %158, %159 : vector<2x32xf32>
    %161 = arith.mulf %148, %160 : vector<2x32xf32>
    %162 = arith.addf %157, %161 : vector<2x32xf32>
    %163 = math.tanh %162 : vector<2x32xf32>
    %cst_81 = arith.constant 1.000000e+00 : f32
    %164 = vector.broadcast %cst_81 : f32 to vector<2x32xf32>
    %165 = arith.subf %164, %156 : vector<2x32xf32>
    %166 = arith.mulf %165, %163 : vector<2x32xf32>
    %167 = arith.mulf %156, %140 : vector<2x32xf32>
    %168 = arith.addf %166, %167 : vector<2x32xf32>
    %c0_82 = arith.constant 0 : index
    %c0_83 = arith.constant 0 : index
    %c0_84 = arith.constant 0 : index
    %169 = vector.load %arg20[%c0_82, %c0_83, %c0_84] : memref<2x2x32xf32, #tpu.memory_space<vmem>>, vector<1x2x32xf32>
    %170 = vector.shape_cast %169 : vector<1x2x32xf32> to vector<2x32xf32>
    %171 = vector.shape_cast %168 : vector<2x32xf32> to vector<1x2x32xf32>
    tpu.vector_store %arg20[%c0_82, %c0_83, %c0_84], %171 {strides = array<i32>} : memref<2x2x32xf32, #tpu.memory_space<vmem>>, vector<1x2x32xf32>,
    %172 = tpu.concatenate %84, %112, %140, %168 in 0 : vector<2x32xf32>, vector<2x32xf32>, vector<2x32xf32>, vector<2x32xf32> -> vector<8x32xf32>
    %c0_85 = arith.constant 0 : index
    %c0_86 = arith.constant 0 : index
    %c0_87 = arith.constant 0 : index
    %173 = vector.load %arg13[%c0_85, %c0_86, %c0_87] : memref<3x32x32xf32, #tpu.memory_space<vmem>>, vector<1x32x32xf32>
    %174 = vector.shape_cast %173 : vector<1x32x32xf32> to vector<32x32xf32>
    %cst_88 = arith.constant dense<0.000000e+00> : vector<8x32xf32>
    %175 = tpu.matmul %172, %174, %cst_88 {dimension_numbers = #tpu.dot_dimension_numbers<[1], [0], [0], [1], [0, 0, 1, 1], [], []>} : vector<8x32xf32>, vector<32x32xf32>, vector<8x32xf32> -> vector<8x32xf32>
    %c0_89 = arith.constant 0 : index
    %c0_90 = arith.constant 0 : index
    %c0_91 = arith.constant 0 : index
    %176 = vector.load %arg15[%c0_89, %c0_90, %c0_91] : memref<3x1x32xf32, #tpu.memory_space<vmem>>, vector<1x1x32xf32>
    %177 = vector.shape_cast %176 : vector<1x1x32xf32> to vector<1x32xf32>
    %c0_92 = arith.constant 0 : index
    %c0_93 = arith.constant 0 : index
    %c0_94 = arith.constant 0 : index
    %178 = vector.load %arg16[%c0_92, %c0_93, %c0_94] : memref<3x1x32xf32, #tpu.memory_space<vmem>>, vector<1x1x32xf32>
    %179 = vector.shape_cast %178 : vector<1x1x32xf32> to vector<1x32xf32>
    %180 = arith.addf %177, %179 : vector<1x32xf32>
    %181 = vector.broadcast %180 : vector<1x32xf32> to vector<8x32xf32>
    %182 = arith.addf %175, %181 : vector<8x32xf32>
    %c1_95 = arith.constant 1 : index
    %c0_96 = arith.constant 0 : index
    %c0_97 = arith.constant 0 : index
    %183 = vector.load %arg13[%c1_95, %c0_96, %c0_97] : memref<3x32x32xf32, #tpu.memory_space<vmem>>, vector<1x32x32xf32>
    %184 = vector.shape_cast %183 : vector<1x32x32xf32> to vector<32x32xf32>
    %cst_98 = arith.constant dense<0.000000e+00> : vector<8x32xf32>
    %185 = tpu.matmul %172, %184, %cst_98 {dimension_numbers = #tpu.dot_dimension_numbers<[1], [0], [0], [1], [0, 0, 1, 1], [], []>} : vector<8x32xf32>, vector<32x32xf32>, vector<8x32xf32> -> vector<8x32xf32>
    %c1_99 = arith.constant 1 : index
    %c0_100 = arith.constant 0 : index
    %c0_101 = arith.constant 0 : index
    %186 = vector.load %arg15[%c1_99, %c0_100, %c0_101] : memref<3x1x32xf32, #tpu.memory_space<vmem>>, vector<1x1x32xf32>
    %187 = vector.shape_cast %186 : vector<1x1x32xf32> to vector<1x32xf32>
    %c1_102 = arith.constant 1 : index
    %c0_103 = arith.constant 0 : index
    %c0_104 = arith.constant 0 : index
    %188 = vector.load %arg16[%c1_102, %c0_103, %c0_104] : memref<3x1x32xf32, #tpu.memory_space<vmem>>, vector<1x1x32xf32>
    %189 = vector.shape_cast %188 : vector<1x1x32xf32> to vector<1x32xf32>
    %190 = arith.addf %187, %189 : vector<1x32xf32>
    %191 = vector.broadcast %190 : vector<1x32xf32> to vector<8x32xf32>
    %192 = arith.addf %185, %191 : vector<8x32xf32>
    %c2_105 = arith.constant 2 : index
    %c0_106 = arith.constant 0 : index
    %c0_107 = arith.constant 0 : index
    %193 = vector.load %arg13[%c2_105, %c0_106, %c0_107] : memref<3x32x32xf32, #tpu.memory_space<vmem>>, vector<1x32x32xf32>
    %194 = vector.shape_cast %193 : vector<1x32x32xf32> to vector<32x32xf32>
    %cst_108 = arith.constant dense<0.000000e+00> : vector<8x32xf32>
    %195 = tpu.matmul %172, %194, %cst_108 {dimension_numbers = #tpu.dot_dimension_numbers<[1], [0], [0], [1], [0, 0, 1, 1], [], []>} : vector<8x32xf32>, vector<32x32xf32>, vector<8x32xf32> -> vector<8x32xf32>
    %c2_109 = arith.constant 2 : index
    %c0_110 = arith.constant 0 : index
    %c0_111 = arith.constant 0 : index
    %196 = vector.load %arg15[%c2_109, %c0_110, %c0_111] : memref<3x1x32xf32, #tpu.memory_space<vmem>>, vector<1x1x32xf32>
    %197 = vector.shape_cast %196 : vector<1x1x32xf32> to vector<1x32xf32>
    %198 = vector.broadcast %197 : vector<1x32xf32> to vector<8x32xf32>
    %199 = arith.addf %195, %198 : vector<8x32xf32>
    %c0_112 = arith.constant 0 : index
    %c0_113 = arith.constant 0 : index
    %c0_114 = arith.constant 0 : index
    %200 = vector.load %arg14[%c0_112, %c0_113, %c0_114] : memref<3x32x32xf32, #tpu.memory_space<vmem>>, vector<1x32x32xf32>
    %201 = vector.shape_cast %200 : vector<1x32x32xf32> to vector<32x32xf32>
    %c1_115 = arith.constant 1 : index
    %c0_116 = arith.constant 0 : index
    %c0_117 = arith.constant 0 : index
    %202 = vector.load %arg14[%c1_115, %c0_116, %c0_117] : memref<3x32x32xf32, #tpu.memory_space<vmem>>, vector<1x32x32xf32>
    %203 = vector.shape_cast %202 : vector<1x32x32xf32> to vector<32x32xf32>
    %c2_118 = arith.constant 2 : index
    %c0_119 = arith.constant 0 : index
    %c0_120 = arith.constant 0 : index
    %204 = vector.load %arg14[%c2_118, %c0_119, %c0_120] : memref<3x32x32xf32, #tpu.memory_space<vmem>>, vector<1x32x32xf32>
    %205 = vector.shape_cast %204 : vector<1x32x32xf32> to vector<32x32xf32>
    %c2_121 = arith.constant 2 : index
    %c0_122 = arith.constant 0 : index
    %c0_123 = arith.constant 0 : index
    %206 = vector.load %arg16[%c2_121, %c0_122, %c0_123] : memref<3x1x32xf32, #tpu.memory_space<vmem>>, vector<1x1x32xf32>
    %207 = vector.shape_cast %206 : vector<1x1x32xf32> to vector<1x32xf32>
    %c1_124 = arith.constant 1 : index
    %c0_125 = arith.constant 0 : index
    %c0_126 = arith.constant 0 : index
    %208 = vector.load %arg2[%c1_124, %c0_125, %c0_126] : memref<2x2x32xf32, #tpu.memory_space<vmem>>, vector<1x2x32xf32>
    %209 = vector.shape_cast %208 : vector<1x2x32xf32> to vector<2x32xf32>
    %210 = vector.extract_strided_slice %182 {offsets = [0, 0], sizes = [2, 32], strides = [1, 1]} : vector<8x32xf32> to vector<2x32xf32>
    %cst_127 = arith.constant dense<0.000000e+00> : vector<2x32xf32>
    %211 = tpu.matmul %209, %201, %cst_127 {dimension_numbers = #tpu.dot_dimension_numbers<[1], [0], [0], [1], [0, 0, 1, 1], [], []>} : vector<2x32xf32>, vector<32x32xf32>, vector<2x32xf32> -> vector<2x32xf32>
    %212 = arith.addf %210, %211 : vector<2x32xf32>
    %213 = arith.negf %212 : vector<2x32xf32>
    %214 = math.exp %213 : vector<2x32xf32>
    %cst_128 = arith.constant 1.000000e+00 : f32
    %215 = vector.broadcast %cst_128 : f32 to vector<2x32xf32>
    %216 = arith.addf %215, %214 : vector<2x32xf32>
    %217 = arith.divf %215, %216 : vector<2x32xf32>
    %218 = vector.extract_strided_slice %192 {offsets = [0, 0], sizes = [2, 32], strides = [1, 1]} : vector<8x32xf32> to vector<2x32xf32>
    %cst_129 = arith.constant dense<0.000000e+00> : vector<2x32xf32>
    %219 = tpu.matmul %209, %203, %cst_129 {dimension_numbers = #tpu.dot_dimension_numbers<[1], [0], [0], [1], [0, 0, 1, 1], [], []>} : vector<2x32xf32>, vector<32x32xf32>, vector<2x32xf32> -> vector<2x32xf32>
    %220 = arith.addf %218, %219 : vector<2x32xf32>
    %221 = arith.negf %220 : vector<2x32xf32>
    %222 = math.exp %221 : vector<2x32xf32>
    %cst_130 = arith.constant 1.000000e+00 : f32
    %223 = vector.broadcast %cst_130 : f32 to vector<2x32xf32>
    %224 = arith.addf %223, %222 : vector<2x32xf32>
    %225 = arith.divf %223, %224 : vector<2x32xf32>
    %226 = vector.extract_strided_slice %199 {offsets = [0, 0], sizes = [2, 32], strides = [1, 1]} : vector<8x32xf32> to vector<2x32xf32>
    %cst_131 = arith.constant dense<0.000000e+00> : vector<2x32xf32>
    %227 = tpu.matmul %209, %205, %cst_131 {dimension_numbers = #tpu.dot_dimension_numbers<[1], [0], [0], [1], [0, 0, 1, 1], [], []>} : vector<2x32xf32>, vector<32x32xf32>, vector<2x32xf32> -> vector<2x32xf32>
    %228 = vector.broadcast %207 : vector<1x32xf32> to vector<2x32xf32>
    %229 = arith.addf %227, %228 : vector<2x32xf32>
    %230 = arith.mulf %217, %229 : vector<2x32xf32>
    %231 = arith.addf %226, %230 : vector<2x32xf32>
    %232 = math.tanh %231 : vector<2x32xf32>
    %cst_132 = arith.constant 1.000000e+00 : f32
    %233 = vector.broadcast %cst_132 : f32 to vector<2x32xf32>
    %234 = arith.subf %233, %225 : vector<2x32xf32>
    %235 = arith.mulf %234, %232 : vector<2x32xf32>
    %236 = arith.mulf %225, %209 : vector<2x32xf32>
    %237 = arith.addf %235, %236 : vector<2x32xf32>
    %238 = vector.extract_strided_slice %182 {offsets = [2, 0], sizes = [2, 32], strides = [1, 1]} : vector<8x32xf32> to vector<2x32xf32>
    %cst_133 = arith.constant dense<0.000000e+00> : vector<2x32xf32>
    %239 = tpu.matmul %237, %201, %cst_133 {dimension_numbers = #tpu.dot_dimension_numbers<[1], [0], [0], [1], [0, 0, 1, 1], [], []>} : vector<2x32xf32>, vector<32x32xf32>, vector<2x32xf32> -> vector<2x32xf32>
    %240 = arith.addf %238, %239 : vector<2x32xf32>
    %241 = arith.negf %240 : vector<2x32xf32>
    %242 = math.exp %241 : vector<2x32xf32>
    %cst_134 = arith.constant 1.000000e+00 : f32
    %243 = vector.broadcast %cst_134 : f32 to vector<2x32xf32>
    %244 = arith.addf %243, %242 : vector<2x32xf32>
    %245 = arith.divf %243, %244 : vector<2x32xf32>
    %246 = vector.extract_strided_slice %192 {offsets = [2, 0], sizes = [2, 32], strides = [1, 1]} : vector<8x32xf32> to vector<2x32xf32>
    %cst_135 = arith.constant dense<0.000000e+00> : vector<2x32xf32>
    %247 = tpu.matmul %237, %203, %cst_135 {dimension_numbers = #tpu.dot_dimension_numbers<[1], [0], [0], [1], [0, 0, 1, 1], [], []>} : vector<2x32xf32>, vector<32x32xf32>, vector<2x32xf32> -> vector<2x32xf32>
    %248 = arith.addf %246, %247 : vector<2x32xf32>
    %249 = arith.negf %248 : vector<2x32xf32>
    %250 = math.exp %249 : vector<2x32xf32>
    %cst_136 = arith.constant 1.000000e+00 : f32
    %251 = vector.broadcast %cst_136 : f32 to vector<2x32xf32>
    %252 = arith.addf %251, %250 : vector<2x32xf32>
    %253 = arith.divf %251, %252 : vector<2x32xf32>
    %254 = vector.extract_strided_slice %199 {offsets = [2, 0], sizes = [2, 32], strides = [1, 1]} : vector<8x32xf32> to vector<2x32xf32>
    %cst_137 = arith.constant dense<0.000000e+00> : vector<2x32xf32>
    %255 = tpu.matmul %237, %205, %cst_137 {dimension_numbers = #tpu.dot_dimension_numbers<[1], [0], [0], [1], [0, 0, 1, 1], [], []>} : vector<2x32xf32>, vector<32x32xf32>, vector<2x32xf32> -> vector<2x32xf32>
    %256 = vector.broadcast %207 : vector<1x32xf32> to vector<2x32xf32>
    %257 = arith.addf %255, %256 : vector<2x32xf32>
    %258 = arith.mulf %245, %257 : vector<2x32xf32>
    %259 = arith.addf %254, %258 : vector<2x32xf32>
    %260 = math.tanh %259 : vector<2x32xf32>
    %cst_138 = arith.constant 1.000000e+00 : f32
    %261 = vector.broadcast %cst_138 : f32 to vector<2x32xf32>
    %262 = arith.subf %261, %253 : vector<2x32xf32>
    %263 = arith.mulf %262, %260 : vector<2x32xf32>
    %264 = arith.mulf %253, %237 : vector<2x32xf32>
    %265 = arith.addf %263, %264 : vector<2x32xf32>
    %266 = vector.extract_strided_slice %182 {offsets = [4, 0], sizes = [2, 32], strides = [1, 1]} : vector<8x32xf32> to vector<2x32xf32>
    %cst_139 = arith.constant dense<0.000000e+00> : vector<2x32xf32>
    %267 = tpu.matmul %265, %201, %cst_139 {dimension_numbers = #tpu.dot_dimension_numbers<[1], [0], [0], [1], [0, 0, 1, 1], [], []>} : vector<2x32xf32>, vector<32x32xf32>, vector<2x32xf32> -> vector<2x32xf32>
    %268 = arith.addf %266, %267 : vector<2x32xf32>
    %269 = arith.negf %268 : vector<2x32xf32>
    %270 = math.exp %269 : vector<2x32xf32>
    %cst_140 = arith.constant 1.000000e+00 : f32
    %271 = vector.broadcast %cst_140 : f32 to vector<2x32xf32>
    %272 = arith.addf %271, %270 : vector<2x32xf32>
    %273 = arith.divf %271, %272 : vector<2x32xf32>
    %274 = vector.extract_strided_slice %192 {offsets = [4, 0], sizes = [2, 32], strides = [1, 1]} : vector<8x32xf32> to vector<2x32xf32>
    %cst_141 = arith.constant dense<0.000000e+00> : vector<2x32xf32>
    %275 = tpu.matmul %265, %203, %cst_141 {dimension_numbers = #tpu.dot_dimension_numbers<[1], [0], [0], [1], [0, 0, 1, 1], [], []>} : vector<2x32xf32>, vector<32x32xf32>, vector<2x32xf32> -> vector<2x32xf32>
    %276 = arith.addf %274, %275 : vector<2x32xf32>
    %277 = arith.negf %276 : vector<2x32xf32>
    %278 = math.exp %277 : vector<2x32xf32>
    %cst_142 = arith.constant 1.000000e+00 : f32
    %279 = vector.broadcast %cst_142 : f32 to vector<2x32xf32>
    %280 = arith.addf %279, %278 : vector<2x32xf32>
    %281 = arith.divf %279, %280 : vector<2x32xf32>
    %282 = vector.extract_strided_slice %199 {offsets = [4, 0], sizes = [2, 32], strides = [1, 1]} : vector<8x32xf32> to vector<2x32xf32>
    %cst_143 = arith.constant dense<0.000000e+00> : vector<2x32xf32>
    %283 = tpu.matmul %265, %205, %cst_143 {dimension_numbers = #tpu.dot_dimension_numbers<[1], [0], [0], [1], [0, 0, 1, 1], [], []>} : vector<2x32xf32>, vector<32x32xf32>, vector<2x32xf32> -> vector<2x32xf32>
    %284 = vector.broadcast %207 : vector<1x32xf32> to vector<2x32xf32>
    %285 = arith.addf %283, %284 : vector<2x32xf32>
    %286 = arith.mulf %273, %285 : vector<2x32xf32>
    %287 = arith.addf %282, %286 : vector<2x32xf32>
    %288 = math.tanh %287 : vector<2x32xf32>
    %cst_144 = arith.constant 1.000000e+00 : f32
    %289 = vector.broadcast %cst_144 : f32 to vector<2x32xf32>
    %290 = arith.subf %289, %281 : vector<2x32xf32>
    %291 = arith.mulf %290, %288 : vector<2x32xf32>
    %292 = arith.mulf %281, %265 : vector<2x32xf32>
    %293 = arith.addf %291, %292 : vector<2x32xf32>
    %294 = vector.extract_strided_slice %182 {offsets = [6, 0], sizes = [2, 32], strides = [1, 1]} : vector<8x32xf32> to vector<2x32xf32>
    %cst_145 = arith.constant dense<0.000000e+00> : vector<2x32xf32>
    %295 = tpu.matmul %293, %201, %cst_145 {dimension_numbers = #tpu.dot_dimension_numbers<[1], [0], [0], [1], [0, 0, 1, 1], [], []>} : vector<2x32xf32>, vector<32x32xf32>, vector<2x32xf32> -> vector<2x32xf32>
    %296 = arith.addf %294, %295 : vector<2x32xf32>
    %297 = arith.negf %296 : vector<2x32xf32>
    %298 = math.exp %297 : vector<2x32xf32>
    %cst_146 = arith.constant 1.000000e+00 : f32
    %299 = vector.broadcast %cst_146 : f32 to vector<2x32xf32>
    %300 = arith.addf %299, %298 : vector<2x32xf32>
    %301 = arith.divf %299, %300 : vector<2x32xf32>
    %302 = vector.extract_strided_slice %192 {offsets = [6, 0], sizes = [2, 32], strides = [1, 1]} : vector<8x32xf32> to vector<2x32xf32>
    %cst_147 = arith.constant dense<0.000000e+00> : vector<2x32xf32>
    %303 = tpu.matmul %293, %203, %cst_147 {dimension_numbers = #tpu.dot_dimension_numbers<[1], [0], [0], [1], [0, 0, 1, 1], [], []>} : vector<2x32xf32>, vector<32x32xf32>, vector<2x32xf32> -> vector<2x32xf32>
    %304 = arith.addf %302, %303 : vector<2x32xf32>
    %305 = arith.negf %304 : vector<2x32xf32>
    %306 = math.exp %305 : vector<2x32xf32>
    %cst_148 = arith.constant 1.000000e+00 : f32
    %307 = vector.broadcast %cst_148 : f32 to vector<2x32xf32>
    %308 = arith.addf %307, %306 : vector<2x32xf32>
    %309 = arith.divf %307, %308 : vector<2x32xf32>
    %310 = vector.extract_strided_slice %199 {offsets = [6, 0], sizes = [2, 32], strides = [1, 1]} : vector<8x32xf32> to vector<2x32xf32>
    %cst_149 = arith.constant dense<0.000000e+00> : vector<2x32xf32>
    %311 = tpu.matmul %293, %205, %cst_149 {dimension_numbers = #tpu.dot_dimension_numbers<[1], [0], [0], [1], [0, 0, 1, 1], [], []>} : vector<2x32xf32>, vector<32x32xf32>, vector<2x32xf32> -> vector<2x32xf32>
    %312 = vector.broadcast %207 : vector<1x32xf32> to vector<2x32xf32>
    %313 = arith.addf %311, %312 : vector<2x32xf32>
    %314 = arith.mulf %301, %313 : vector<2x32xf32>
    %315 = arith.addf %310, %314 : vector<2x32xf32>
    %316 = math.tanh %315 : vector<2x32xf32>
    %cst_150 = arith.constant 1.000000e+00 : f32
    %317 = vector.broadcast %cst_150 : f32 to vector<2x32xf32>
    %318 = arith.subf %317, %309 : vector<2x32xf32>
    %319 = arith.mulf %318, %316 : vector<2x32xf32>
    %320 = arith.mulf %309, %293 : vector<2x32xf32>
    %321 = arith.addf %319, %320 : vector<2x32xf32>
    %c1_151 = arith.constant 1 : index
    %c0_152 = arith.constant 0 : index
    %c0_153 = arith.constant 0 : index
    %322 = vector.load %arg20[%c1_151, %c0_152, %c0_153] : memref<2x2x32xf32, #tpu.memory_space<vmem>>, vector<1x2x32xf32>
    %323 = vector.shape_cast %322 : vector<1x2x32xf32> to vector<2x32xf32>
    %324 = vector.shape_cast %321 : vector<2x32xf32> to vector<1x2x32xf32>
    tpu.vector_store %arg20[%c1_151, %c0_152, %c0_153], %324 {strides = array<i32>} : memref<2x2x32xf32, #tpu.memory_space<vmem>>, vector<1x2x32xf32>,
    %c0_154 = arith.constant 0 : index
    %c0_155 = arith.constant 0 : index
    %325 = vector.load %arg17[%c0_154, %c0_155] : memref<32x3xf32, #tpu.memory_space<vmem>>, vector<32x3xf32>
    %cst_156 = arith.constant dense<0.000000e+00> : vector<2x3xf32>
    %326 = tpu.matmul %321, %325, %cst_156 {dimension_numbers = #tpu.dot_dimension_numbers<[1], [0], [0], [1], [0, 0, 1, 1], [], []>} : vector<2x32xf32>, vector<32x3xf32>, vector<2x3xf32> -> vector<2x3xf32>
    %c0_157 = arith.constant 0 : index
    %c0_158 = arith.constant 0 : index
    %327 = vector.load %arg18[%c0_157, %c0_158] : memref<1x3xf32, #tpu.memory_space<vmem>>, vector<1x3xf32>
    %328 = vector.broadcast %327 : vector<1x3xf32> to vector<2x3xf32>
    %329 = arith.addf %326, %328 : vector<2x3xf32>
    %c0_159 = arith.constant 0 : index
    %c0_160 = arith.constant 0 : index
    %330 = vector.load %arg19[%c0_159, %c0_160] : memref<2x3xf32, #tpu.memory_space<vmem>>, vector<2x3xf32>
    tpu.vector_store %arg19[%c0_159, %c0_160], %329 {strides = array<i32>} : memref<2x3xf32, #tpu.memory_space<vmem>>, vector<2x3xf32>,
    return
  }
}

</mosaic_0001>

<bundles_post_ra>
// kernel: rnn_agent_forward.4
= control target key start
LH: loop header
LB: loop body
LE: loop exit
PB: predicated region body
PF: predicated region fallthrough
CT: control target
= control target key end

     0   :  { %vm54_vm0 = vcmask 1040384   ;;  %vm919_vm1 = vmmov 1   ;;  %v920_v3 = vmov 0.0   ;;  %vm50_vm3 = vcmask 72704   ;;  %s1258_s0 = inlined_call_operand.vmem [shape: f32[9,2048], index: 0, kind: input, shape index: {}]   ;;  %s1259_s1 = inlined_call_operand.vmem [shape: f32[8,9], index: 1, kind: input, shape index: {}]   ;;  %s1260_s2 = inlined_call_operand.vmem [shape: f32[8,1], index: 2, kind: input, shape index: {}]   ;;  %s1261_s3 = inlined_call_operand.vmem [shape: f32[8,1], index: 3, kind: input, shape index: {}]   ;;  %s1262_s4 = inlined_call_operand.vmem [shape: f32[8,2048], index: 4, kind: output, shape index: {}]  }
   0x1   :  { %v19_v0 = vld [vmem:[%s1258_s0 + $0x8] sm:$0xff]  ;;  %vm953_vm2 = vmpackc.low %vm54_vm0, %vm919_vm1  ;;  %167 = vmatprep.mubr.f32.mxu0 %v920_v3  ;;  %238 = vmatprep.mubr.f32.mxu1 %v920_v3  ;;  %v18_v5 = vld [vmem:[%s1258_s0] sm:$0xff]  ;;  %v921_v51 = vmov 0  }
   0x2   :  { %v35_v1 = vld [vmem:[%s1258_s0 + $0x88] sm:$0x1]  ;;  %v34_v6 = vld [vmem:[%s1258_s0 + $0x80] sm:$0x1]  ;;  %v21_v7 = vld [vmem:[%s1258_s0 + $0x18] sm:$0xff]  ;;  %915 = vset.pattern.permute.xlu1 %v921_v51  ;;  %916 = vset.pattern.permute.xlu0 %v921_v51 }
   0x3   :  { %v864_v4 = vpack.c.bf16 %v35_v1, %v19_v0  ;;  %v867_v8 = vpack.c.bf16 %v34_v6, %v18_v5  ;;  %v37_v9 = vld [vmem:[%s1258_s0 + $0x98] sm:$0x1]  ;;  %v20_v10 = vld [vmem:[%s1258_s0 + $0x10] sm:$0xff]  ;;  %v982_v14 = vld [vmem:[%s1259_s1] sm:$0xff] }
   0x4   :  { %v36_v11 = vld [vmem:[%s1258_s0 + $0x90] sm:$0x1]  ;;  %v870_v12 = vpack.c.bf16 %v37_v9, %v21_v7  ;;  %v23_v15 = vld [vmem:[%s1258_s0 + $0x28] sm:$0xff]  ;;  %v22_v18 = vld [vmem:[%s1258_s0 + $0x20] sm:$0xff] }
   0x5   :  { %866 = vmatprep.subr.msk.bf16.mxu0 %vm953_vm2, %v864_v4  ;;  %v873_v13 = vpack.c.bf16 %v36_v11, %v20_v10  ;;  %v39_v16 = vld [vmem:[%s1258_s0 + $0xa8] sm:$0x1]  ;;  %v38_v19 = vld [vmem:[%s1258_s0 + $0xa0] sm:$0x1]  ;;  %v25_v20 = vld [vmem:[%s1258_s0 + $0x38] sm:$0xff] }
   0x6   :  { %869 = vmatpush1.bf16.msk.msra.mxu0 %vm953_vm2, %v867_v8  ;;  %v876_v17 = vpack.c.bf16 %v39_v16, %v23_v15  ;;  %872 = vmatprep.subr.msk.bf16.mxu1 %vm953_vm2, %v870_v12  ;;  %v879_v21 = vpack.c.bf16 %v38_v19, %v22_v18  ;;  %v41_v22 = vld [vmem:[%s1258_s0 + $0xb8] sm:$0x1]  ;;  %v24_v23 = vld [vmem:[%s1258_s0 + $0x30] sm:$0xff]  ;;  %v27_v27 = vld [vmem:[%s1258_s0 + $0x48] sm:$0xff] }
   0x7   :  { %v40_v24 = vld [vmem:[%s1258_s0 + $0xb0] sm:$0x1]  ;;  %875 = vmatpush1.bf16.msk.msra.mxu1 %vm953_vm2, %v873_v13  ;;  %v882_v25 = vpack.c.bf16 %v41_v22, %v25_v20  ;;  %v43_v28 = vld [vmem:[%s1258_s0 + $0xc8] sm:$0x1]  ;;  %v26_v29 = vld [vmem:[%s1258_s0 + $0x40] sm:$0xff] }
   0x8   :  { %878 = vmatprep.subr.msk.bf16.mxu0 %vm953_vm2, %v876_v17  ;;  %v885_v26 = vpack.c.bf16 %v40_v24, %v24_v23  ;;  %v888_v30 = vpack.c.bf16 %v43_v28, %v27_v27  ;;  %v42_v31 = vld [vmem:[%s1258_s0 + $0xc0] sm:$0x1]  ;;  %v29_v32 = vld [vmem:[%s1258_s0 + $0x58] sm:$0xff]  ;;  %v28_v35 = vld [vmem:[%s1258_s0 + $0x50] sm:$0xff] }
   0x9   :  { %842 = vmatmul.mubr.msk.f32.vlgmr.msra.gmra.mrb[0].mxu0 %vm50_vm3, %v982_v14  ;;  %v45_v33 = vld [vmem:[%s1258_s0 + $0xd8] sm:$0x1]  ;;  %v891_v34 = vpack.c.bf16 %v42_v31, %v26_v29  ;;  %v44_v36 = vld [vmem:[%s1258_s0 + $0xd0] sm:$0x1]  ;;  %v31_v37 = vld [vmem:[%s1258_s0 + $0x68] sm:$0xff]  ;;  %884 = vmatprep.subr.msk.bf16.mxu1 %vm953_vm2, %v882_v25 }
   0xa   :  { %881 = vmatpush1.bf16.msk.msra.mxu0 %vm953_vm2, %v879_v21  ;;  %309 = vmatprep.mubr.f32.mxu0 %v920_v3  ;;  %v894_v38 = vpack.c.bf16 %v45_v33, %v29_v32  ;;  %v47_v39 = vld [vmem:[%s1258_s0 + $0xe8] sm:$0x1]  ;;  %v30_v40 = vld [vmem:[%s1258_s0 + $0x60] sm:$0xff]  ;;  %v897_v42 = vpack.c.bf16 %v44_v36, %v28_v35  ;;  %v33_v43 = vld [vmem:[%s1258_s0 + $0x78] sm:$0xff] }
   0xb   :  { %845 = vmatmul.mubr.msk.f32.vlgmr.msra.gmra.mrb[0].mxu1 %vm50_vm3, %v982_v14  ;;  %v46_v41 = vld [vmem:[%s1258_s0 + $0xe0] sm:$0x1]  ;;  %v49_v44 = vld [vmem:[%s1258_s0 + $0xf8] sm:$0x1]  ;;  %890 = vmatprep.subr.msk.bf16.mxu0 %vm953_vm2, %v888_v30  ;;  %v900_v45 = vpack.c.bf16 %v47_v39, %v31_v37  ;;  %v32_v46 = vld [vmem:[%s1258_s0 + $0x70] sm:$0xff] }
   0xc   :  { %887 = vmatpush1.bf16.msk.msra.mxu1 %vm953_vm2, %v885_v26  ;;  %380 = vmatprep.mubr.f32.mxu1 %v920_v3  ;;  %v48_v47 = vld [vmem:[%s1258_s0 + $0xf0] sm:$0x1]  ;;  %v903_v48 = vpack.c.bf16 %v46_v41, %v30_v40  ;;  %v906_v49 = vpack.c.bf16 %v49_v44, %v33_v43  ;;  %v760_v52 = vld [vmem:[%s1260_s2] sm:$0xff] }
   0xd   :  { %848 = vmatmul.mubr.msk.f32.vlgmr.msra.gmra.mrb[2].mxu0 %vm50_vm3, %v982_v14  ;;  %896 = vmatprep.subr.msk.bf16.mxu1 %vm953_vm2, %v894_v38  ;;  %v909_v50 = vpack.c.bf16 %v48_v47, %v32_v46  ;;  %v782_v53 = vld [vmem:[%s1261_s3] sm:$0xff] }
   0xe   :  { %893 = vmatpush1.bf16.msk.msra.mxu0 %vm953_vm2, %v891_v34  ;;  %451 = vmatprep.mubr.f32.mxu0 %v920_v3 }
   0xf   :  { %851 = vmatmul.mubr.msk.f32.vlgmr.msra.gmra.mrb[2].mxu1 %vm50_vm3, %v982_v14  ;;  %902 = vmatprep.subr.msk.bf16.mxu0 %vm953_vm2, %v900_v45 }
  0x10   :  { %899 = vmatpush1.bf16.msk.msra.mxu1 %vm953_vm2, %v897_v42  ;;  %522 = vmatprep.mubr.f32.mxu1 %v920_v3 }
  0x11   :  { %854 = vmatmul.mubr.msk.f32.vlgmr.msra.gmra.mrb[4].mxu0 %vm50_vm3, %v982_v14  ;;  %908 = vmatprep.subr.msk.bf16.mxu1 %vm953_vm2, %v906_v49 }
  0x12   :  { %905 = vmatpush1.bf16.msk.msra.mxu0 %vm953_vm2, %v903_v48  ;;  %593 = vmatprep.mubr.f32.mxu0 %v920_v3 }
  0x13   :  { %857 = vmatmul.mubr.msk.f32.vlgmr.msra.gmra.mrb[4].mxu1 %vm50_vm3, %v982_v14  ;;  %763 = vperm.xlu1 %915, %v760_v52  }
  0x14   :  { %911 = vmatpush1.bf16.msk.msra.mxu1 %vm953_vm2, %v909_v50  ;;  %664 = vmatprep.mubr.f32.mxu1 %v920_v3 }
  0x15   :  { %860 = vmatmul.mubr.msk.f32.vlgmr.msra.gmra.mrb[6].mxu0 %vm50_vm3, %v982_v14 }
  0x17   :  { %863 = vmatmul.mubr.msk.f32.vlgmr.msra.gmra.mrb[6].mxu1 %vm50_vm3, %v982_v14  ;;  %785 = vperm.xlu1 %915, %v782_v53  }
  0xdc   :  { %v1114_v54 = vpop.f32.mrb[0].mxu0 }
  0xdd   :  { %v689_v55 = vmul.f32 %v1114_v54, %v1114_v54  ;;  %v1118_v56 = vpop.f32.mrb[1].mxu0 }
  0xde   :  { %v671_v57 = vadd.f32 %v1118_v56, %v1114_v54  ;;  %v690_v58 = vmul.f32 %v1118_v56, %v1118_v56  ;;  %v1124_v59 = vpop.f32.mrb[0].mxu1 }
  0xdf   :  { %v691_v60 = vmul.f32 %v1124_v59, %v1124_v59  ;;  %v1128_v61 = vpop.f32.mrb[1].mxu1 }
  0xe0   :  { %v705_v62 = vadd.f32 %v690_v58, %v689_v55  ;;  %v672_v63 = vadd.f32 %v671_v57, %v1124_v59  ;;  %v1131_v0 = vpop.f32.mrb[2].mxu0  ;;  %v692_v4 = vmul.f32 %v1128_v61, %v1128_v61 }
  0xe1   :  { %v1133_v1 = vpop.f32.mrb[3].mxu0  ;;  %v693_v5 = vmul.f32 %v1131_v0, %v1131_v0 }
  0xe2   :  { %v706_v2 = vadd.f32 %v705_v62, %v691_v60  ;;  %v673_v3 = vadd.f32 %v672_v63, %v1128_v61  ;;  %v1140_v6 = vpop.f32.mrb[2].mxu1  ;;  %v694_v14 = vmul.f32 %v1133_v1, %v1133_v1 }
  0xe3   :  { %v1142_v7 = vpop.f32.mrb[3].mxu1  ;;  %v695_v15 = vmul.f32 %v1140_v6, %v1140_v6 }
  0xe4   :  { %v707_v8 = vadd.f32 %v706_v2, %v692_v4  ;;  %v674_v9 = vadd.f32 %v673_v3, %v1131_v0  ;;  %v1145_v10 = vpop.f32.mrb[4].mxu0  ;;  %v696_v24 = vmul.f32 %v1142_v7, %v1142_v7 }
  0xe5   :  { %v1147_v11 = vpop.f32.mrb[5].mxu0  ;;  %v697_v25 = vmul.f32 %v1145_v10, %v1145_v10 }
  0xe6   :  { %v708_v12 = vadd.f32 %v707_v8, %v693_v5  ;;  %v675_v13 = vadd.f32 %v674_v9, %v1133_v1  ;;  %v1154_v16 = vpop.f32.mrb[4].mxu1  ;;  %v698_v32 = vmul.f32 %v1147_v11, %v1147_v11 }
  0xe7   :  { %v1156_v17 = vpop.f32.mrb[5].mxu1  ;;  %v699_v33 = vmul.f32 %v1154_v16, %v1154_v16 }
  0xe8   :  { %v709_v18 = vadd.f32 %v708_v12, %v694_v14  ;;  %v676_v19 = vadd.f32 %v675_v13, %v1140_v6  ;;  %v1159_v20 = vpop.f32.mrb[6].mxu0  ;;  %v700_v38 = vmul.f32 %v1156_v17, %v1156_v17 }
  0xe9   :  { %v1161_v21 = vpop.f32.mrb[7].mxu0  ;;  %v701_v39 = vmul.f32 %v1159_v20, %v1159_v20 }
  0xea   :  { %v710_v22 = vadd.f32 %v709_v18, %v695_v15  ;;  %v677_v23 = vadd.f32 %v676_v19, %v1142_v7  ;;  %v1168_v26 = vpop.f32.mrb[6].mxu1  ;;  %v702_v44 = vmul.f32 %v1161_v21, %v1161_v21 }
  0xeb   :  { %v1170_v27 = vpop.f32.mrb[7].mxu1  ;;  %v703_v45 = vmul.f32 %v1168_v26, %v1168_v26 }
  0xec   :  { %v711_v28 = vadd.f32 %v710_v22, %v696_v24  ;;  %v678_v29 = vadd.f32 %v677_v23, %v1145_v10  ;;  %v704_v48 = vmul.f32 %v1170_v27, %v1170_v27 }
  0xee   :  { %v712_v30 = vadd.f32 %v711_v28, %v697_v25  ;;  %v679_v31 = vadd.f32 %v678_v29, %v1147_v11 }
  0xf0   :  { %v713_v34 = vadd.f32 %v712_v30, %v698_v32  ;;  %v680_v35 = vadd.f32 %v679_v31, %v1154_v16 }
  0xf2   :  { %v714_v36 = vadd.f32 %v713_v34, %v699_v33  ;;  %v681_v37 = vadd.f32 %v680_v35, %v1156_v17 }
  0xf4   :  { %v715_v40 = vadd.f32 %v714_v36, %v700_v38  ;;  %v682_v41 = vadd.f32 %v681_v37, %v1159_v20 }
  0xf6   :  { %v716_v42 = vadd.f32 %v715_v40, %v701_v39  ;;  %v683_v43 = vadd.f32 %v682_v41, %v1161_v21 }
  0xf8   :  { %v717_v46 = vadd.f32 %v716_v42, %v702_v44  ;;  %v684_v47 = vadd.f32 %v683_v43, %v1168_v26 }
  0xfa   :  { %v685_v49 = vadd.f32 %v684_v47, %v1170_v27  ;;  %v718_v50 = vadd.f32 %v717_v46, %v703_v45 }
  0xfc   :  { %686 = vadd.xlane.f32.xlu0 %v685_v49  ;;  %v719_v51 = vadd.f32 %v718_v50, %v704_v48 }
 0x100   :  { %720 = vadd.xlane.f32.xlu0 %v719_v51 }
 0x189   :  { %v687_v52 = vpop.xlane.xlu0 %686 }
 0x18a   :  { %v688_v53 = vmul.f32 0.00048828125, %v687_v52 }
 0x18c   :  { %v723_v57 = vmul.f32 %v688_v53, %v688_v53  ;;  %v726_v2 = vsub.f32 %v1114_v54, %v688_v53  ;;  %v727_v3 = vsub.f32 %v1118_v56, %v688_v53  ;;  %v728_v4 = vsub.f32 %v1124_v59, %v688_v53 }
 0x18d   :  { %v721_v55 = vpop.xlane.xlu0 %720  ;;  %v729_v5 = vsub.f32 %v1128_v61, %v688_v53  ;;  %v730_v8 = vsub.f32 %v1131_v0, %v688_v53  ;;  %v731_v9 = vsub.f32 %v1133_v1, %v688_v53  ;;  %v732_v12 = vsub.f32 %v1140_v6, %v688_v53 }
 0x18e   :  { %v722_v58 = vmul.f32 0.00048828125, %v721_v55  ;;  %v733_v13 = vsub.f32 %v1142_v7, %v688_v53  ;;  %v734_v14 = vsub.f32 %v1145_v10, %v688_v53  ;;  %v735_v15 = vsub.f32 %v1147_v11, %v688_v53  ;;  %v764_v10 = vpop.permute.xlu1 %763 }
 0x18f   :  { %v736_v54 = vsub.f32 %v1154_v16, %v688_v53  ;;  %v737_v56 = vsub.f32 %v1156_v17, %v688_v53  ;;  %v738_v59 = vsub.f32 %v1159_v20, %v688_v53  ;;  %v739_v61 = vsub.f32 %v1161_v21, %v688_v53 }
 0x190   :  { %v724_v60 = vsub.f32 %v722_v58, %v723_v57  ;;  %v740_v0 = vsub.f32 %v1168_v26, %v688_v53  ;;  %v741_v1 = vsub.f32 %v1170_v27, %v688_v53 }
 0x192   :  { %v725_v62 = vmax.f32 %v724_v60, 0.0  ;;  %v786_v42 = vpop.permute.xlu1 %785 }
 0x194   :  { %v742_v63 = vadd.f32 1e-05, %v725_v62 }
 0x196   :  { %917 = vrsqrt.f32 %v742_v63 }
 0x1a0   :  { %v918_v18 = vpop.eup %917 }
 0x1a1   :  { %v744_v6 = vmul.f32 %v918_v18, %v726_v2  ;;  %v745_v19 = vmul.f32 %v918_v18, %v727_v3  ;;  %v746_v7 = vmul.f32 %v918_v18, %v728_v4  ;;  %v747_v22 = vmul.f32 %v918_v18, %v729_v5 }
 0x1a2   :  { %v748_v23 = vmul.f32 %v918_v18, %v730_v8  ;;  %v749_v11 = vmul.f32 %v918_v18, %v731_v9  ;;  %v750_v24 = vmul.f32 %v918_v18, %v732_v12  ;;  %v751_v16 = vmul.f32 %v918_v18, %v733_v13 }
 0x1a3   :  { %v752_v25 = vmul.f32 %v918_v18, %v734_v14  ;;  %v753_v17 = vmul.f32 %v918_v18, %v735_v15  ;;  %v754_v28 = vmul.f32 %v918_v18, %v736_v54  ;;  %v755_v29 = vmul.f32 %v918_v18, %v737_v56 }
 0x1a4   :  { %v756_v20 = vmul.f32 %v918_v18, %v738_v59  ;;  %v757_v30 = vmul.f32 %v918_v18, %v739_v61  ;;  %v758_v21 = vmul.f32 %v918_v18, %v740_v0  ;;  %v759_v31 = vmul.f32 %v918_v18, %v741_v1 }
 0x1a5   :  { %v766_v26 = vmul.f32 %v764_v10, %v744_v6  ;;  %v767_v32 = vmul.f32 %v764_v10, %v745_v19  ;;  %v768_v27 = vmul.f32 %v764_v10, %v746_v7  ;;  %v769_v33 = vmul.f32 %v764_v10, %v747_v22 }
 0x1a6   :  { %v770_v34 = vmul.f32 %v764_v10, %v748_v23  ;;  %v771_v35 = vmul.f32 %v764_v10, %v749_v11  ;;  %v772_v36 = vmul.f32 %v764_v10, %v750_v24  ;;  %v773_v37 = vmul.f32 %v764_v10, %v751_v16 }
 0x1a7   :  { %v774_v38 = vmul.f32 %v764_v10, %v752_v25  ;;  %v775_v39 = vmul.f32 %v764_v10, %v753_v17  ;;  %v776_v40 = vmul.f32 %v764_v10, %v754_v28  ;;  %v777_v41 = vmul.f32 %v764_v10, %v755_v29 }
 0x1a8   :  { %v778_v43 = vmul.f32 %v764_v10, %v756_v20  ;;  %v779_v44 = vmul.f32 %v764_v10, %v757_v30  ;;  %v780_v45 = vmul.f32 %v764_v10, %v758_v21  ;;  %v781_v46 = vmul.f32 %v764_v10, %v759_v31 }
 0x1a9   :  { %v788_v47 = vadd.f32 %v786_v42, %v766_v26  ;;  %v789_v48 = vadd.f32 %v786_v42, %v767_v32  ;;  %v790_v49 = vadd.f32 %v786_v42, %v768_v27  ;;  %v791_v50 = vadd.f32 %v786_v42, %v769_v33 }
 0x1aa   :  { %v792_v51 = vadd.f32 %v786_v42, %v770_v34  ;;  %v793_v52 = vadd.f32 %v786_v42, %v771_v35  ;;  %v794_v53 = vadd.f32 %v786_v42, %v772_v36  ;;  %v795_v55 = vadd.f32 %v786_v42, %v773_v37 }
 0x1ab   :  { %v796_v57 = vadd.f32 %v786_v42, %v774_v38  ;;  %v797_v58 = vadd.f32 %v786_v42, %v775_v39  ;;  %v798_v60 = vadd.f32 %v786_v42, %v776_v40  ;;  %v799_v62 = vadd.f32 %v786_v42, %v777_v41 }
 0x1ac   :  { %v800_v63 = vadd.f32 %v786_v42, %v778_v43  ;;  %v801_v2 = vadd.f32 %v786_v42, %v779_v44  ;;  %v802_v3 = vadd.f32 %v786_v42, %v780_v45  ;;  %v803_v4 = vadd.f32 %v786_v42, %v781_v46 }
 0x1ad   :  { %v804_v5 = vmax.f32 %v788_v47, 0.0  ;;  %v805_v8 = vmax.f32 %v789_v48, 0.0  ;;  %v806_v9 = vmax.f32 %v790_v49, 0.0  ;;  %v807_v12 = vmax.f32 %v791_v50, 0.0 }
 0x1ae   :  { %v808_v13 = vmax.f32 %v792_v51, 0.0  ;;  %v809_v14 = vmax.f32 %v793_v52, 0.0  ;;  %v810_v15 = vmax.f32 %v794_v53, 0.0  ;;  %v811_v54 = vmax.f32 %v795_v55, 0.0 }
 0x1af   :  { %v812_v56 = vmax.f32 %v796_v57, 0.0  ;;  %v813_v18 = vmax.f32 %v797_v58, 0.0  ;;  %v814_v59 = vmax.f32 %v798_v60, 0.0  ;;  %v815_v61 = vmax.f32 %v799_v62, 0.0  ;;  %820 = vst [vmem:[%s1262_s4] sm:$0xff] %v804_v5  ;;  %821 = vst [vmem:[%s1262_s4 + $0x8] sm:$0xff] %v805_v8 }
 0x1b0   :  { %822 = vst [vmem:[%s1262_s4 + $0x10] sm:$0xff] %v806_v9  ;;  %823 = vst [vmem:[%s1262_s4 + $0x18] sm:$0xff] %v807_v12  ;;  %v816_v0 = vmax.f32 %v800_v63, 0.0  ;;  %v817_v1 = vmax.f32 %v801_v2, 0.0  ;;  %v818_v6 = vmax.f32 %v802_v3, 0.0  ;;  %v819_v19 = vmax.f32 %v803_v4, 0.0 }
 0x1b1   :  { %824 = vst [vmem:[%s1262_s4 + $0x20] sm:$0xff] %v808_v13  ;;  %825 = vst [vmem:[%s1262_s4 + $0x28] sm:$0xff] %v809_v14 }
 0x1b2   :  { %826 = vst [vmem:[%s1262_s4 + $0x30] sm:$0xff] %v810_v15  ;;  %827 = vst [vmem:[%s1262_s4 + $0x38] sm:$0xff] %v811_v54 }
 0x1b3   :  { %828 = vst [vmem:[%s1262_s4 + $0x40] sm:$0xff] %v812_v56  ;;  %829 = vst [vmem:[%s1262_s4 + $0x48] sm:$0xff] %v813_v18 }
 0x1b4   :  { %830 = vst [vmem:[%s1262_s4 + $0x50] sm:$0xff] %v814_v59  ;;  %831 = vst [vmem:[%s1262_s4 + $0x58] sm:$0xff] %v815_v61 }
 0x1b5   :  { %832 = vst [vmem:[%s1262_s4 + $0x60] sm:$0xff] %v816_v0  ;;  %833 = vst [vmem:[%s1262_s4 + $0x68] sm:$0xff] %v817_v1 }
 0x1b6   :  { %834 = vst [vmem:[%s1262_s4 + $0x70] sm:$0xff] %v818_v6  ;;  %835 = vst [vmem:[%s1262_s4 + $0x78] sm:$0xff] %v819_v19 }

// kernel: rnn_agent_forward.5
= control target key start
LH: loop header
LB: loop body
LE: loop exit
PB: predicated region body
PF: predicated region fallthrough
CT: control target
= control target key end

     0   :  { %v378_v3 = vmov 0.0   ;;  %vm55_vm0 = vcmask 588800   ;;  %v379_v55 = vmov 0   ;;  %s583_s0 = inlined_call_operand.vmem [shape: f32[72,512], index: 0, kind: input, shape index: {}]   ;;  %s584_s1 = inlined_call_operand.vmem [shape: f32[16,72], index: 1, kind: input, shape index: {}]   ;;  %s585_s2 = inlined_call_operand.vmem [shape: f32[16,1], index: 2, kind: input, shape index: {}]   ;;  %s586_s3 = inlined_call_operand.vmem [shape: f32[16,1], index: 3, kind: input, shape index: {}]   ;;  %s587_s4 = inlined_call_operand.vmem [shape: f32[16,512], index: 4, kind: output, shape index: {}]  }
   0x1   :  { %v20_v0 = vld [vmem:[%s583_s0 + $0x8] sm:$0xff]  ;;  %v19_v2 = vld [vmem:[%s583_s0] sm:$0xff]  ;;  %126 = vmatprep.mubr.f32.mxu0 %v378_v3  ;;  %203 = vmatprep.mubr.f32.mxu1 %v378_v3  ;;  %v22_v6 = vld [vmem:[%s583_s0 + $0x18] sm:$0xff] }
   0x2   :  { %v24_v1 = vld [vmem:[%s583_s0 + $0x28] sm:$0xff]  ;;  %v23_v5 = vld [vmem:[%s583_s0 + $0x20] sm:$0xff]  ;;  %v26_v7 = vld [vmem:[%s583_s0 + $0x38] sm:$0xff]  ;;  %373 = vset.pattern.permute.xlu1 %v379_v55  ;;  %372 = vset.pattern.permute.xlu0 %v379_v55 }
   0x3   :  { %v338_v4 = vpack.c.bf16 %v24_v1, %v20_v0  ;;  %v340_v8 = vpack.c.bf16 %v23_v5, %v19_v2  ;;  %v354_v9 = vpack.c.bf16 %v26_v7, %v22_v6  ;;  %v21_v10 = vld [vmem:[%s583_s0 + $0x10] sm:$0xff]  ;;  %v28_v12 = vld [vmem:[%s583_s0 + $0x48] sm:$0xff]  ;;  %v27_v15 = vld [vmem:[%s583_s0 + $0x40] sm:$0xff] }
   0x4   :  { %v25_v11 = vld [vmem:[%s583_s0 + $0x30] sm:$0xff]  ;;  %v32_v14 = vld [vmem:[%s583_s0 + $0x68] sm:$0xff]  ;;  %v31_v16 = vld [vmem:[%s583_s0 + $0x60] sm:$0xff] }
   0x5   :  { %339 = vmatprep.subr.bf16.mxu0 %v338_v4  ;;  %v356_v13 = vpack.c.bf16 %v25_v11, %v21_v10  ;;  %355 = vmatprep.subr.bf16.mxu1 %v354_v9  ;;  %v342_v17 = vpack.c.bf16 %v32_v14, %v28_v12  ;;  %v344_v18 = vpack.c.bf16 %v31_v16, %v27_v15  ;;  %v30_v19 = vld [vmem:[%s583_s0 + $0x58] sm:$0xff]  ;;  %v29_v21 = vld [vmem:[%s583_s0 + $0x50] sm:$0xff]  ;;  %v36_v24 = vld [vmem:[%s583_s0 + $0x88] sm:$0xff] }
   0x6   :  { %341 = vmatpush1.bf16.msra.mxu0 %v340_v8  ;;  %v34_v20 = vld [vmem:[%s583_s0 + $0x78] sm:$0xff]  ;;  %v33_v23 = vld [vmem:[%s583_s0 + $0x70] sm:$0xff]  ;;  %v40_v25 = vld [vmem:[%s583_s0 + $0xa8] sm:$0xff] }
   0x7   :  { %357 = vmatpush1.bf16.msra.mxu1 %v356_v13  ;;  %v358_v22 = vpack.c.bf16 %v34_v20, %v30_v19  ;;  %343 = vmatprep.subr.bf16.mxu0 %v342_v17  ;;  %v360_v26 = vpack.c.bf16 %v33_v23, %v29_v21  ;;  %v346_v27 = vpack.c.bf16 %v40_v25, %v36_v24  ;;  %v35_v28 = vld [vmem:[%s583_s0 + $0x80] sm:$0xff]  ;;  %v38_v30 = vld [vmem:[%s583_s0 + $0x98] sm:$0xff]  ;;  %v37_v32 = vld [vmem:[%s583_s0 + $0x90] sm:$0xff] }
   0x8   :  { %v39_v29 = vld [vmem:[%s583_s0 + $0xa0] sm:$0xff]  ;;  %v42_v31 = vld [vmem:[%s583_s0 + $0xb8] sm:$0xff]  ;;  %v41_v33 = vld [vmem:[%s583_s0 + $0xb0] sm:$0xff] }
   0x9   :  { %359 = vmatprep.subr.bf16.mxu1 %v358_v22  ;;  %v348_v34 = vpack.c.bf16 %v39_v29, %v35_v28  ;;  %v362_v35 = vpack.c.bf16 %v42_v31, %v38_v30  ;;  %v44_v36 = vld [vmem:[%s583_s0 + $0xc8] sm:$0xff]  ;;  %v43_v38 = vld [vmem:[%s583_s0 + $0xc0] sm:$0xff]  ;;  %v364_v39 = vpack.c.bf16 %v41_v33, %v37_v32  ;;  %v46_v42 = vld [vmem:[%s583_s0 + $0xd8] sm:$0xff] }
   0xa   :  { %345 = vmatpush1.bf16.msra.mxu0 %v344_v18  ;;  %v48_v37 = vld [vmem:[%s583_s0 + $0xe8] sm:$0xff]  ;;  %v47_v41 = vld [vmem:[%s583_s0 + $0xe0] sm:$0xff]  ;;  %v50_v43 = vld [vmem:[%s583_s0 + $0xf8] sm:$0xff] }
   0xb   :  { %361 = vmatpush1.bf16.msra.mxu1 %v360_v26  ;;  %347 = vmatprep.subr.bf16.mxu0 %v346_v27  ;;  %v350_v40 = vpack.c.bf16 %v48_v37, %v44_v36  ;;  %v366_v44 = vpack.c.bf16 %v50_v43, %v46_v42  ;;  %v45_v45 = vld [vmem:[%s583_s0 + $0xd0] sm:$0xff]  ;;  %v352_v47 = vpack.c.bf16 %v47_v41, %v43_v38  ;;  %v52_v49 = vld [vmem:[%s583_s0 + $0x108] sm:$0xff]  ;;  %v54_v50 = vld [vmem:[%s583_s0 + $0x118] sm:$0xff] }
   0xc   :  { %363 = vmatprep.subr.bf16.mxu1 %v362_v35  ;;  %v49_v46 = vld [vmem:[%s583_s0 + $0xf0] sm:$0xff]  ;;  %v51_v51 = vld [vmem:[%s583_s0 + $0x100] sm:$0xff]  ;;  %v18_v54 = vld [vmem:[%s584_s1 + $0x8] sm:$0xff] }
   0xd   :  { %v368_v48 = vpack.c.bf16 %v49_v46, %v45_v45  ;;  %v17_v52 = vld [vmem:[%s584_s1] sm:$0xff]  ;;  %v53_v53 = vld [vmem:[%s583_s0 + $0x110] sm:$0xff]  ;;  %v275_v20 = vld [vmem:[%s585_s2 + $0x8] sm:$0xff] }
   0xe   :  { %349 = vmatpush1.bf16.msra.mxu0 %v348_v34  ;;  %v294_v21 = vld [vmem:[%s586_s3] sm:$0xff]  ;;  %v295_v23 = vld [vmem:[%s586_s3 + $0x8] sm:$0xff] }
   0xf   :  { %365 = vmatpush1.bf16.msra.mxu1 %v364_v39  ;;  %351 = vmatprep.subr.bf16.mxu0 %v350_v40  ;;  %v274_v22 = vld [vmem:[%s585_s2] sm:$0xff] }
  0x10   :  { %367 = vmatprep.subr.bf16.mxu1 %v366_v44 }
  0x12   :  { %353 = vmatpush1.bf16.msra.mxu0 %v352_v47 }
  0x13   :  { %369 = vmatpush1.bf16.msra.mxu1 %v368_v48  ;;  %78 = vmatprep.subr.mxu0 %v52_v49 }
  0x14   :  { %155 = vmatprep.subr.mxu1 %v54_v50 }
  0x16   :  { %79 = vmatpush1.msra.mxu0 %v51_v51 }
  0x17   :  { %334 = vmatmul.mubr.msk.f32.vlgmr.msra.gmra.mrb[0].mxu0 %vm55_vm0, %v17_v52  ;;  %156 = vmatpush1.msra.mxu1 %v53_v53 }
  0x18   :  { %336 = vmatmul.mubr.msk.f32.vlgmr.msra.gmra.mrb[0].mxu1 %vm55_vm0, %v17_v52  ;;  %132 = vmatprep.mubr.f32.mxu0 %v378_v3 }
  0x19   :  { %209 = vmatprep.mubr.f32.mxu1 %v378_v3 }
  0x1b   :  { %335 = vmatmul.mubr.msk.f32.gmra.mrb[2].mxu0 %vm55_vm0, %v18_v54 }
  0x1c   :  { %337 = vmatmul.mubr.msk.f32.gmra.mrb[2].mxu1 %vm55_vm0, %v18_v54 }
  0xea   :  { %v128_v56 = vpop.f32.mrb[0].mxu0 }
  0xeb   :  { %v228_v57 = vmul.f32 %v128_v56, %v128_v56  ;;  %v130_v58 = vpop.f32.mrb[1].mxu0  ;;  %v205_v59 = vpop.f32.mrb[0].mxu1 }
  0xec   :  { %v216_v60 = vadd.f32 %v130_v58, %v128_v56  ;;  %v229_v61 = vmul.f32 %v130_v58, %v130_v58  ;;  %v207_v62 = vpop.f32.mrb[1].mxu1  ;;  %v230_v63 = vmul.f32 %v205_v59, %v205_v59 }
  0xed   :  { %v231_v11 = vmul.f32 %v207_v62, %v207_v62 }
  0xee   :  { %v523_v0 = vpop.f32.mrb[2].mxu0  ;;  %v217_v1 = vadd.f32 %v216_v60, %v205_v59  ;;  %v236_v2 = vadd.f32 %v229_v61, %v228_v57 }
  0xef   :  { %v232_v3 = vmul.f32 %v523_v0, %v523_v0  ;;  %v527_v4 = vpop.f32.mrb[3].mxu0  ;;  %v529_v5 = vpop.f32.mrb[2].mxu1 }
  0xf0   :  { %v221_v6 = vadd.f32 %v527_v4, %v523_v0  ;;  %v233_v7 = vmul.f32 %v527_v4, %v527_v4  ;;  %v234_v8 = vmul.f32 %v529_v5, %v529_v5  ;;  %v218_v9 = vadd.f32 %v217_v1, %v207_v62  ;;  %v537_v10 = vpop.f32.mrb[3].mxu1 }
  0xf1   :  { %v237_v12 = vadd.f32 %v236_v2, %v230_v63  ;;  %v235_v14 = vmul.f32 %v537_v10, %v537_v10 }
  0xf2   :  { %v241_v13 = vadd.f32 %v233_v7, %v232_v3  ;;  %219 = vadd.xlane.f32.xlu0 %v218_v9  ;;  %v222_v15 = vadd.f32 %v221_v6, %v529_v5 }
  0xf3   :  { %v238_v16 = vadd.f32 %v237_v12, %v231_v11 }
  0xf4   :  { %v223_v17 = vadd.f32 %v222_v15, %v537_v10  ;;  %v242_v18 = vadd.f32 %v241_v13, %v234_v8 }
  0xf5   :  { %239 = vadd.xlane.f32.xlu1 %v238_v16 }
  0xf6   :  { %224 = vadd.xlane.f32.xlu0 %v223_v17  ;;  %v243_v19 = vadd.f32 %v242_v18, %v235_v14 }
 0x106   :  { %283 = vperm.xlu1 %373, %v275_v20  }
 0x10a   :  { %298 = vperm.xlu1 %373, %v294_v21  }
 0x10c   :  { %278 = vperm.xlu0 %372, %v274_v22  }
 0x12e   :  { %244 = vadd.xlane.f32.xlu1 %v243_v19 }
 0x13f   :  { %303 = vperm.xlu1 %373, %v295_v23  }
 0x17f   :  { %v220_v24 = vpop.xlane.xlu0 %219 }
 0x180   :  { %v226_v25 = vmul.f32 0.001953125, %v220_v24 }
 0x182   :  { %v240_v26 = vpop.xlane.xlu1 %239  ;;  %v248_v27 = vmul.f32 %v226_v25, %v226_v25  ;;  %v254_v34 = vsub.f32 %v128_v56, %v226_v25  ;;  %v255_v35 = vsub.f32 %v130_v58, %v226_v25  ;;  %v256_v36 = vsub.f32 %v205_v59, %v226_v25 }
 0x183   :  { %v246_v28 = vmul.f32 0.001953125, %v240_v26  ;;  %v225_v32 = vpop.xlane.xlu0 %224  ;;  %v257_v37 = vsub.f32 %v207_v62, %v226_v25 }
 0x184   :  { %v227_v57 = vmul.f32 0.001953125, %v225_v32 }
 0x185   :  { %v250_v29 = vsub.f32 %v246_v28, %v248_v27 }
 0x186   :  { %v284_v33 = vpop.permute.xlu1 %283  ;;  %v249_v60 = vmul.f32 %v227_v57, %v227_v57  ;;  %v258_v1 = vsub.f32 %v523_v0, %v227_v57  ;;  %v259_v2 = vsub.f32 %v527_v4, %v227_v57  ;;  %v260_v3 = vsub.f32 %v529_v5, %v227_v57 }
 0x187   :  { %v252_v30 = vmax.f32 %v250_v29, 0.0  ;;  %v261_v6 = vsub.f32 %v537_v10, %v227_v57 }
 0x189   :  { %v262_v31 = vadd.f32 1e-05, %v252_v30 }
 0x18a   :  { %v299_v48 = vpop.permute.xlu1 %298 }
 0x18b   :  { %374 = vrsqrt.f32 %v262_v31  ;;  %v279_v39 = vpop.permute.xlu0 %278 }
 0x195   :  { %v375_v38 = vpop.eup %374 }
 0x196   :  { %v266_v40 = vmul.f32 %v375_v38, %v254_v34  ;;  %v267_v41 = vmul.f32 %v375_v38, %v255_v35  ;;  %v268_v42 = vmul.f32 %v375_v38, %v256_v36  ;;  %v269_v43 = vmul.f32 %v375_v38, %v257_v37 }
 0x198   :  { %v286_v44 = vmul.f32 %v279_v39, %v266_v40  ;;  %v287_v45 = vmul.f32 %v279_v39, %v267_v41  ;;  %v288_v46 = vmul.f32 %v279_v39, %v268_v42  ;;  %v289_v47 = vmul.f32 %v279_v39, %v269_v43 }
 0x19a   :  { %v306_v49 = vadd.f32 %v299_v48, %v286_v44  ;;  %v307_v50 = vadd.f32 %v299_v48, %v287_v45  ;;  %v308_v51 = vadd.f32 %v299_v48, %v288_v46  ;;  %v309_v52 = vadd.f32 %v299_v48, %v289_v47 }
 0x19c   :  { %v314_v53 = vmax.f32 %v306_v49, 0.0  ;;  %v315_v54 = vmax.f32 %v307_v50, 0.0  ;;  %v316_v55 = vmax.f32 %v308_v51, 0.0  ;;  %v317_v56 = vmax.f32 %v309_v52, 0.0 }
 0x19e   :  { %322 = vst [vmem:[%s587_s4] sm:$0xff] %v314_v53  ;;  %323 = vst [vmem:[%s587_s4 + $0x8] sm:$0xff] %v315_v54 }
 0x19f   :  { %324 = vst [vmem:[%s587_s4 + $0x10] sm:$0xff] %v316_v55  ;;  %325 = vst [vmem:[%s587_s4 + $0x18] sm:$0xff] %v317_v56 }
 0x1bb   :  { %v245_v58 = vpop.xlane.xlu1 %244 }
 0x1bc   :  { %v247_v59 = vmul.f32 0.001953125, %v245_v58 }
 0x1be   :  { %v251_v61 = vsub.f32 %v247_v59, %v249_v60 }
 0x1bf   :  { %v304_v17 = vpop.permute.xlu1 %303 }
 0x1c0   :  { %v253_v62 = vmax.f32 %v251_v61, 0.0 }
 0x1c2   :  { %v263_v63 = vadd.f32 1e-05, %v253_v62 }
 0x1c4   :  { %376 = vrsqrt.f32 %v263_v63 }
 0x1ce   :  { %v377_v7 = vpop.eup %376 }
 0x1cf   :  { %v270_v8 = vmul.f32 %v377_v7, %v258_v1  ;;  %v271_v9 = vmul.f32 %v377_v7, %v259_v2  ;;  %v272_v11 = vmul.f32 %v377_v7, %v260_v3  ;;  %v273_v12 = vmul.f32 %v377_v7, %v261_v6 }
 0x1d1   :  { %v290_v13 = vmul.f32 %v284_v33, %v270_v8  ;;  %v291_v14 = vmul.f32 %v284_v33, %v271_v9  ;;  %v292_v15 = vmul.f32 %v284_v33, %v272_v11  ;;  %v293_v16 = vmul.f32 %v284_v33, %v273_v12 }
 0x1d3   :  { %v310_v18 = vadd.f32 %v304_v17, %v290_v13  ;;  %v311_v19 = vadd.f32 %v304_v17, %v291_v14  ;;  %v312_v20 = vadd.f32 %v304_v17, %v292_v15  ;;  %v313_v0 = vadd.f32 %v304_v17, %v293_v16 }
 0x1d5   :  { %v318_v21 = vmax.f32 %v310_v18, 0.0  ;;  %v319_v4 = vmax.f32 %v311_v19, 0.0  ;;  %v320_v22 = vmax.f32 %v312_v20, 0.0  ;;  %v321_v5 = vmax.f32 %v313_v0, 0.0 }
 0x1d7   :  { %326 = vst [vmem:[%s587_s4 + $0x20] sm:$0xff] %v318_v21  ;;  %327 = vst [vmem:[%s587_s4 + $0x28] sm:$0xff] %v319_v4 }
 0x1d8   :  { %328 = vst [vmem:[%s587_s4 + $0x30] sm:$0xff] %v320_v22  ;;  %329 = vst [vmem:[%s587_s4 + $0x38] sm:$0xff] %v321_v5 }

// kernel: rnn_agent_forward.6
= control target key start
LH: loop header
LB: loop body
LE: loop exit
PB: predicated region body
PF: predicated region fallthrough
CT: control target
= control target key end

     0   :  { %v326_v0 = vmov 0.0|0.0   ;;  %vm43_vm0 = vcmask 130048   ;;  %v327_v36 = vmov 0   ;;  %s513_s0 = inlined_call_operand.vmem [shape: f32[144,128], index: 0, kind: input, shape index: {}]   ;;  %s514_s1 = inlined_call_operand.vmem [shape: f32[32,144], index: 1, kind: input, shape index: {}]   ;;  %s515_s2 = inlined_call_operand.vmem [shape: f32[32,1], index: 2, kind: input, shape index: {}]   ;;  %s516_s3 = inlined_call_operand.vmem [shape: f32[32,1], index: 3, kind: input, shape index: {}]   ;;  %s517_s4 = inlined_call_operand.vmem [shape: f32[32,128], index: 4, kind: output, shape index: {}]  }
   0x1   :  { %269 = vmatprep.subr.bf16.mxu0 %v326_v0  ;;  %296 = vmatprep.subr.bf16.mxu1 %v326_v0  ;;  %v25_v1 = vld [vmem:[%s513_s0] sm:$0xff]  ;;  %v26_v2 = vld [vmem:[%s513_s0 + $0x8] sm:$0xff]  ;;  %v27_v3 = vld [vmem:[%s513_s0 + $0x10] sm:$0xff] }
   0x2   :  { %v270_v4 = vpack.c.bf16 %v26_v2, %v25_v1  ;;  %v28_v5 = vld [vmem:[%s513_s0 + $0x18] sm:$0xff]  ;;  %v29_v7 = vld [vmem:[%s513_s0 + $0x20] sm:$0xff]  ;;  %v30_v8 = vld [vmem:[%s513_s0 + $0x28] sm:$0xff]  ;;  %317 = vset.pattern.permute.xlu1 %v327_v36  ;;  %316 = vset.pattern.permute.xlu0 %v327_v36 }
   0x3   :  { %v273_v6 = vpack.c.bf16 %v28_v5, %v27_v3  ;;  %v18_v9 = vld [vmem:[%s514_s1 + $0x8] sm:$0xff]  ;;  %v276_v11 = vpack.c.bf16 %v30_v8, %v29_v7  ;;  %v31_v12 = vld [vmem:[%s513_s0 + $0x30] sm:$0xff]  ;;  %v32_v13 = vld [vmem:[%s513_s0 + $0x38] sm:$0xff] }
   0x4   :  { %271 = vmatpush1.bf16.msra.mxu0 %v270_v4  ;;  %305 = vmatpush1.bf16.msra.mxu1 %v270_v4  ;;  %v22_v10 = vld [vmem:[%s514_s1 + $0x28] sm:$0xff]  ;;  %v279_v14 = vpack.c.bf16 %v32_v13, %v31_v12  ;;  %v33_v15 = vld [vmem:[%s513_s0 + $0x40] sm:$0xff]  ;;  %v35_v18 = vld [vmem:[%s513_s0 + $0x50] sm:$0xff] }
   0x5   :  { %272 = vmatprep.subr.bf16.mxu0 %v326_v0  ;;  %297 = vmatprep.subr.bf16.mxu1 %v326_v0  ;;  %v34_v16 = vld [vmem:[%s513_s0 + $0x48] sm:$0xff]  ;;  %v36_v19 = vld [vmem:[%s513_s0 + $0x58] sm:$0xff]  ;;  %v37_v21 = vld [vmem:[%s513_s0 + $0x60] sm:$0xff] }
   0x6   :  { %265 = vmatprep.mubr.msk.f32.mxu0 %vm43_vm0, %v18_v9  ;;  %267 = vmatprep.mubr.msk.f32.mxu1 %vm43_vm0, %v22_v10  ;;  %v282_v17 = vpack.c.bf16 %v34_v16, %v33_v15  ;;  %v285_v20 = vpack.c.bf16 %v36_v19, %v35_v18  ;;  %v38_v22 = vld [vmem:[%s513_s0 + $0x68] sm:$0xff]  ;;  %v39_v24 = vld [vmem:[%s513_s0 + $0x70] sm:$0xff]  ;;  %v40_v25 = vld [vmem:[%s513_s0 + $0x78] sm:$0xff] }
   0x7   :  { %v288_v23 = vpack.c.bf16 %v38_v22, %v37_v21  ;;  %v291_v26 = vpack.c.bf16 %v40_v25, %v39_v24  ;;  %v41_v27 = vld [vmem:[%s513_s0 + $0x80] sm:$0xff]  ;;  %v42_v28 = vld [vmem:[%s513_s0 + $0x88] sm:$0xff]  ;;  %v20_v32 = vld [vmem:[%s514_s1 + $0x18] sm:$0xff] }
   0x8   :  { %274 = vmatpush1.bf16.msra.mxu0 %v273_v6  ;;  %306 = vmatpush1.bf16.msra.mxu1 %v273_v6  ;;  %v294_v29 = vpack.c.bf16 %v42_v28, %v41_v27  ;;  %v17_v30 = vld [vmem:[%s514_s1] sm:$0xff]  ;;  %v24_v33 = vld [vmem:[%s514_s1 + $0x38] sm:$0xff]  ;;  %v19_v34 = vld [vmem:[%s514_s1 + $0x10] sm:$0xff] }
   0x9   :  { %275 = vmatprep.subr.bf16.mxu0 %v326_v0  ;;  %298 = vmatprep.subr.bf16.mxu1 %v326_v0  ;;  %v21_v31 = vld [vmem:[%s514_s1 + $0x20] sm:$0xff]  ;;  %v23_v35 = vld [vmem:[%s514_s1 + $0x30] sm:$0xff]  ;;  %v198_v47 = vld [vmem:[%s515_s2 + $0x8] sm:$0xff] }
   0xa   :  { %v199_v48 = vld [vmem:[%s515_s2 + $0x10] sm:$0xff]  ;;  %v200_v49 = vld [vmem:[%s515_s2 + $0x18] sm:$0xff]  ;;  %v225_v50 = vld [vmem:[%s516_s3] sm:$0xff] }
   0xb   :  { %v226_v51 = vld [vmem:[%s516_s3 + $0x8] sm:$0xff]  ;;  %v197_v52 = vld [vmem:[%s515_s2] sm:$0xff]  ;;  %v227_v53 = vld [vmem:[%s516_s3 + $0x10] sm:$0xff] }
   0xc   :  { %277 = vmatpush1.bf16.msra.mxu0 %v276_v11  ;;  %307 = vmatpush1.bf16.msra.mxu1 %v276_v11  ;;  %v228_v56 = vld [vmem:[%s516_s3 + $0x18] sm:$0xff] }
   0xd   :  { %278 = vmatprep.subr.bf16.mxu0 %v326_v0  ;;  %299 = vmatprep.subr.bf16.mxu1 %v326_v0 }
  0x10   :  { %280 = vmatpush1.bf16.msra.mxu0 %v279_v14  ;;  %308 = vmatpush1.bf16.msra.mxu1 %v279_v14 }
  0x11   :  { %281 = vmatprep.subr.bf16.mxu0 %v326_v0  ;;  %300 = vmatprep.subr.bf16.mxu1 %v326_v0 }
  0x14   :  { %283 = vmatpush1.bf16.msra.mxu0 %v282_v17  ;;  %309 = vmatpush1.bf16.msra.mxu1 %v282_v17 }
  0x15   :  { %284 = vmatprep.subr.bf16.mxu0 %v326_v0  ;;  %301 = vmatprep.subr.bf16.mxu1 %v326_v0 }
  0x18   :  { %286 = vmatpush1.bf16.msra.mxu0 %v285_v20  ;;  %310 = vmatpush1.bf16.msra.mxu1 %v285_v20 }
  0x19   :  { %287 = vmatprep.subr.bf16.mxu0 %v326_v0  ;;  %302 = vmatprep.subr.bf16.mxu1 %v326_v0 }
  0x1c   :  { %289 = vmatpush1.bf16.msra.mxu0 %v288_v23  ;;  %311 = vmatpush1.bf16.msra.mxu1 %v288_v23 }
  0x1d   :  { %290 = vmatprep.subr.bf16.mxu0 %v326_v0  ;;  %303 = vmatprep.subr.bf16.mxu1 %v326_v0 }
  0x20   :  { %292 = vmatpush1.bf16.msra.mxu0 %v291_v26  ;;  %312 = vmatpush1.bf16.msra.mxu1 %v291_v26 }
  0x21   :  { %293 = vmatprep.subr.bf16.mxu0 %v326_v0  ;;  %304 = vmatprep.subr.bf16.mxu1 %v326_v0 }
  0x24   :  { %295 = vmatpush1.bf16.msra.mxu0 %v294_v29  ;;  %313 = vmatpush1.bf16.msra.mxu1 %v294_v29 }
  0x27   :  { %121 = vmatmul.mubr.f32.vlgmr.msra.gmra.mrb[0].mxu0 %v17_v30  ;;  %131 = vmatmul.mubr.f32.vlgmr.msra.gmra.mrb[0].mxu1 %v21_v31 }
  0x28   :  { %266 = vmatprep.mubr.msk.f32.mxu0 %vm43_vm0, %v20_v32  ;;  %268 = vmatprep.mubr.msk.f32.mxu1 %vm43_vm0, %v24_v33 }
  0x2b   :  { %126 = vmatmul.mubr.f32.gmra.mrb[2].mxu0 %v19_v34  ;;  %136 = vmatmul.mubr.f32.gmra.mrb[2].mxu1 %v23_v35 }
  0xfa   :  { %v453_v37 = vpop.f32.mrb[0].mxu0  ;;  %v455_v38 = vpop.f32.mrb[0].mxu1 }
  0xfb   :  { %145 = vadd.xlane.f32.xlu1 %v455_v38  ;;  %v134_v39 = vpop.f32.mrb[1].mxu1  ;;  %141 = vadd.xlane.f32.xlu0 %v453_v37  ;;  %v153_v40 = vmul.f32 %v453_v37, %v453_v37  ;;  %v124_v41 = vpop.f32.mrb[1].mxu0  ;;  %v155_v46 = vmul.f32 %v455_v38, %v455_v38 }
  0xfe   :  { %v461_v42 = vpop.f32.mrb[2].mxu0  ;;  %v463_v43 = vpop.f32.mrb[2].mxu1 }
  0xff   :  { %157 = vadd.xlane.f32.xlu0 %v153_v40  ;;  %v139_v44 = vpop.f32.mrb[3].mxu1  ;;  %v129_v45 = vpop.f32.mrb[3].mxu0  ;;  %v154_v54 = vmul.f32 %v461_v42, %v461_v42  ;;  %v156_v55 = vmul.f32 %v463_v43, %v463_v43 }
 0x103   :  { %161 = vadd.xlane.f32.xlu0 %v155_v46 }
 0x107   :  { %143 = vadd.xlane.f32.xlu0 %v461_v42 }
 0x10c   :  { %208 = vperm.xlu1 %317, %v198_v47  }
 0x110   :  { %213 = vperm.xlu1 %317, %v199_v48  }
 0x114   :  { %218 = vperm.xlu1 %317, %v200_v49  }
 0x118   :  { %231 = vperm.xlu1 %317, %v225_v50  }
 0x11c   :  { %236 = vperm.xlu1 %317, %v226_v51  }
 0x11d   :  { %203 = vperm.xlu0 %316, %v197_v52  }
 0x120   :  { %241 = vperm.xlu1 %317, %v227_v53  }
 0x144   :  { %147 = vadd.xlane.f32.xlu1 %v463_v43 }
 0x148   :  { %159 = vadd.xlane.f32.xlu1 %v154_v54 }
 0x14c   :  { %163 = vadd.xlane.f32.xlu1 %v156_v55 }
 0x15d   :  { %246 = vperm.xlu1 %317, %v228_v56  }
 0x188   :  { %v146_v57 = vpop.xlane.xlu1 %145  ;;  %v142_v58 = vpop.xlane.xlu0 %141 }
 0x189   :  { %v149_v59 = vmul.f32 0.0078125, %v142_v58  ;;  %v151_v63 = vmul.f32 0.0078125, %v146_v57 }
 0x18b   :  { %v169_v60 = vmul.f32 %v149_v59, %v149_v59  ;;  %v171_v4 = vmul.f32 %v151_v63, %v151_v63  ;;  %v181_v14 = vsub.f32 %v453_v37, %v149_v59  ;;  %v183_v19 = vsub.f32 %v455_v38, %v151_v63 }
 0x18c   :  { %v209_v61 = vpop.permute.xlu1 %208  ;;  %v158_v62 = vpop.xlane.xlu0 %157 }
 0x18d   :  { %v165_v0 = vmul.f32 0.0078125, %v158_v62 }
 0x18f   :  { %v173_v1 = vsub.f32 %v165_v0, %v169_v60 }
 0x190   :  { %v214_v2 = vpop.permute.xlu1 %213  ;;  %v162_v3 = vpop.xlane.xlu0 %161 }
 0x191   :  { %v177_v5 = vmax.f32 %v173_v1, 0.0  ;;  %v167_v6 = vmul.f32 0.0078125, %v162_v3 }
 0x193   :  { %v185_v7 = vadd.f32 1e-05, %v177_v5  ;;  %v175_v8 = vsub.f32 %v167_v6, %v171_v4 }
 0x194   :  { %v219_v10 = vpop.permute.xlu1 %218  ;;  %v144_v12 = vpop.xlane.xlu0 %143 }
 0x195   :  { %318 = vrsqrt.f32 %v185_v7  ;;  %v179_v9 = vmax.f32 %v175_v8, 0.0  ;;  %v150_v30 = vmul.f32 0.0078125, %v144_v12 }
 0x197   :  { %v187_v11 = vadd.f32 1e-05, %v179_v9  ;;  %v170_v31 = vmul.f32 %v150_v30, %v150_v30  ;;  %v182_v46 = vsub.f32 %v461_v42, %v150_v30 }
 0x198   :  { %v232_v13 = vpop.permute.xlu1 %231 }
 0x199   :  { %320 = vrsqrt.f32 %v187_v11 }
 0x19c   :  { %v204_v16 = vpop.permute.xlu0 %203  ;;  %v237_v18 = vpop.permute.xlu1 %236 }
 0x19f   :  { %v319_v15 = vpop.eup %318 }
 0x1a0   :  { %v193_v17 = vmul.f32 %v319_v15, %v181_v14  ;;  %v242_v26 = vpop.permute.xlu1 %241 }
 0x1a2   :  { %v221_v20 = vmul.f32 %v204_v16, %v193_v17 }
 0x1a3   :  { %v321_v21 = vpop.eup %320 }
 0x1a4   :  { %v195_v22 = vmul.f32 %v321_v21, %v183_v19  ;;  %v249_v23 = vadd.f32 %v232_v13, %v221_v20 }
 0x1a6   :  { %v223_v24 = vmul.f32 %v214_v2, %v195_v22  ;;  %v253_v25 = vmax.f32 %v249_v23, 0.0 }
 0x1a8   :  { %v251_v27 = vadd.f32 %v242_v26, %v223_v24  ;;  %257 = vst [vmem:[%s517_s4] sm:$0xff] %v253_v25 }
 0x1aa   :  { %v255_v28 = vmax.f32 %v251_v27, 0.0 }
 0x1ac   :  { %259 = vst [vmem:[%s517_s4 + $0x10] sm:$0xff] %v255_v28 }
 0x1d1   :  { %v148_v29 = vpop.xlane.xlu1 %147 }
 0x1d2   :  { %v152_v33 = vmul.f32 0.0078125, %v148_v29 }
 0x1d4   :  { %v172_v37 = vmul.f32 %v152_v33, %v152_v33  ;;  %v184_v49 = vsub.f32 %v463_v43, %v152_v33 }
 0x1d5   :  { %v160_v32 = vpop.xlane.xlu1 %159 }
 0x1d6   :  { %v166_v34 = vmul.f32 0.0078125, %v160_v32 }
 0x1d8   :  { %v174_v35 = vsub.f32 %v166_v34, %v170_v31 }
 0x1d9   :  { %v164_v36 = vpop.xlane.xlu1 %163 }
 0x1da   :  { %v178_v38 = vmax.f32 %v174_v35, 0.0  ;;  %v168_v39 = vmul.f32 0.0078125, %v164_v36 }
 0x1dc   :  { %v186_v40 = vadd.f32 1e-05, %v178_v38  ;;  %v176_v41 = vsub.f32 %v168_v39, %v172_v37 }
 0x1dd   :  { %v247_v56 = vpop.permute.xlu1 %246 }
 0x1de   :  { %322 = vrsqrt.f32 %v186_v40  ;;  %v180_v44 = vmax.f32 %v176_v41, 0.0 }
 0x1e0   :  { %v188_v45 = vadd.f32 1e-05, %v180_v44 }
 0x1e2   :  { %324 = vrsqrt.f32 %v188_v45 }
 0x1e8   :  { %v323_v47 = vpop.eup %322 }
 0x1e9   :  { %v194_v48 = vmul.f32 %v323_v47, %v182_v46 }
 0x1eb   :  { %v222_v50 = vmul.f32 %v209_v61, %v194_v48 }
 0x1ec   :  { %v325_v51 = vpop.eup %324 }
 0x1ed   :  { %v250_v52 = vadd.f32 %v237_v18, %v222_v50  ;;  %v196_v53 = vmul.f32 %v325_v51, %v184_v49 }
 0x1ef   :  { %v254_v54 = vmax.f32 %v250_v52, 0.0  ;;  %v224_v55 = vmul.f32 %v219_v10, %v196_v53 }
 0x1f1   :  { %258 = vst [vmem:[%s517_s4 + $0x8] sm:$0xff] %v254_v54  ;;  %v252_v57 = vadd.f32 %v247_v56, %v224_v55 }
 0x1f3   :  { %v256_v58 = vmax.f32 %v252_v57, 0.0 }
 0x1f5   :  { %260 = vst [vmem:[%s517_s4 + $0x18] sm:$0xff] %v256_v58 }

// kernel: rnn_agent_forward.7
= control target key start
LH: loop header
LB: loop body
LE: loop exit
PB: predicated region body
PF: predicated region fallthrough
CT: control target
= control target key end

     0   :  { %s5169_s0 = inlined_call_operand.vmem [shape: f32[8,512], index: 0, kind: input, shape index: {}]   ;;  %s5170_s1 = inlined_call_operand.vmem [shape: f32[8,3], index: 1, kind: input, shape index: {}]   ;;  %s5171_s2 = inlined_call_operand.vmem [shape: f32[2,2,32], index: 2, kind: input, shape index: {}]   ;;  %s5172_s3 = inlined_call_operand.vmem [shape: f32[512,32], index: 3, kind: input, shape index: {}]   ;;  %s5173_s4 = inlined_call_operand.vmem [shape: f32[1,32], index: 4, kind: input, shape index: {}]   ;;  %s5174_s5 = inlined_call_operand.vmem [shape: f32[3,32], index: 5, kind: input, shape index: {}]   ;;  %s5175_s6 = inlined_call_operand.vmem [shape: f32[1,32], index: 6, kind: input, shape index: {}]   ;;  %s5176_s7 = inlined_call_operand.vmem [shape: f32[32,32], index: 7, kind: input, shape index: {}]   ;;  %s5177_s8 = inlined_call_operand.vmem [shape: f32[1,32], index: 8, kind: input, shape index: {}]   ;;  %s5178_s9 = inlined_call_operand.vmem [shape: f32[3,64,32], index: 9, kind: input, shape index: {}]   ;;  %s5179_s10 = inlined_call_operand.vmem [shape: f32[3,32,32], index: 10, kind: input, shape index: {}]   ;;  %s5180_s11 = inlined_call_operand.vmem [shape: f32[3,1,32], index: 11, kind: input, shape index: {}]   ;;  %s5181_s12 = inlined_call_operand.vmem [shape: f32[3,1,32], index: 12, kind: input, shape index: {}]   ;;  %s5182_s13 = inlined_call_operand.vmem [shape: f32[3,32,32], index: 13, kind: input, shape index: {}]   ;;  %s5183_s14 = inlined_call_operand.vmem [shape: f32[3,32,32], index: 14, kind: input, shape index: {}]   ;;  %s5184_s15 = inlined_call_operand.vmem [shape: f32[3,1,32], index: 15, kind: input, shape index: {}]   ;;  %s5185_s16 = inlined_call_operand.vmem [shape: f32[3,1,32], index: 16, kind: input, shape index: {}]   ;;  %s5186_s17 = inlined_call_operand.vmem [shape: f32[32,3], index: 17, kind: input, shape index: {}]   ;;  %s5187_s18 = inlined_call_operand.vmem [shape: f32[1,3], index: 18, kind: input, shape index: {}]   ;;  %s5188_s19 = inlined_call_operand.hbm [shape: f32[2,3], index: 19, kind: output, shape index: {0}]   ;;  %s5189_s20 = inlined_call_operand.hbm [shape: f32[2,2,32], index: 20, kind: output, shape index: {1}]  }
   0x1   :  { %5193 = sst [smem:[#allocation8_spill]] %s5169_s0 }
   0x2   :  { %5194 = sst [smem:[#allocation9_spill]] %s5170_s1 }
   0x3   :  { %5195 = sst [smem:[#allocation10_spill]] %s5171_s2 }
   0x4   :  { %5196 = sst [smem:[#allocation11_spill]] %s5172_s3 }
   0x5   :  { %5197 = sst [smem:[#allocation12_spill]] %s5173_s4 }
   0x6   :  { %26 = vsyncpa [#allocation3], 0  ;;  %s5198_s23 = sld [smem:[#allocation11_spill]]  ;;  %s5199_s29 = sld [smem:[#allocation8_spill]] }
   0xc   :  { %v86_v0 = vld [vmem:[%s5198_s23 + $0x80] sm:$0xff]  ;;  %v87_v1 = vld [vmem:[%s5198_s23 + $0x88] sm:$0xff]  ;;  %v88_v11 = vld [vmem:[%s5198_s23 + $0x90] sm:$0xff] }
   0xd   :  { %v70_v2 = vld [vmem:[%s5198_s23] sm:$0xff]  ;;  %v3830_v3 = vpack.c.bf16 %v87_v1, %v86_v0  ;;  %v71_v4 = vld [vmem:[%s5198_s23 + $0x8] sm:$0xff]  ;;  %v89_v13 = vld [vmem:[%s5198_s23 + $0x98] sm:$0xff] }
   0xe   :  { %v118_v5 = vld [vmem:[%s5198_s23 + $0x180] sm:$0xff]  ;;  %v119_v6 = vld [vmem:[%s5198_s23 + $0x188] sm:$0xff]  ;;  %v3832_v7 = vpack.c.bf16 %v71_v4, %v70_v2  ;;  %v72_v14 = vld [vmem:[%s5198_s23 + $0x10] sm:$0xff]  ;;  %v3834_v16 = vpack.c.bf16 %v89_v13, %v88_v11 }
   0xf   :  { %v3862_v8 = vpack.c.bf16 %v119_v6, %v118_v5  ;;  %v102_v9 = vld [vmem:[%s5198_s23 + $0x100] sm:$0xff]  ;;  %v103_v10 = vld [vmem:[%s5198_s23 + $0x108] sm:$0xff]  ;;  %3831 = vmatprep.subr.bf16.mxu0 %v3830_v3  ;;  %v73_v15 = vld [vmem:[%s5198_s23 + $0x18] sm:$0xff] }
  0x10   :  { %v3864_v12 = vpack.c.bf16 %v103_v10, %v102_v9  ;;  %3833 = vmatpush3.bf16.msra.mxu0 %v3832_v7  ;;  %v3836_v17 = vpack.c.bf16 %v73_v15, %v72_v14  ;;  %v120_v18 = vld [vmem:[%s5198_s23 + $0x190] sm:$0xff]  ;;  %v121_v19 = vld [vmem:[%s5198_s23 + $0x198] sm:$0xff]  ;;  %v90_v23 = vld [vmem:[%s5198_s23 + $0xa0] sm:$0xff] }
  0x11   :  { %3863 = vmatprep.subr.bf16.mxu1 %v3862_v8  ;;  %v104_v20 = vld [vmem:[%s5198_s23 + $0x110] sm:$0xff]  ;;  %v3866_v21 = vpack.c.bf16 %v121_v19, %v120_v18  ;;  %v105_v22 = vld [vmem:[%s5198_s23 + $0x118] sm:$0xff]  ;;  %v91_v24 = vld [vmem:[%s5198_s23 + $0xa8] sm:$0xff]  ;;  %3835 = vmatprep.subr.bf16.mxu0 %v3834_v16 }
  0x12   :  { %3865 = vmatpush3.bf16.msra.mxu1 %v3864_v12  ;;  %v3868_v25 = vpack.c.bf16 %v105_v22, %v104_v20  ;;  %v3838_v26 = vpack.c.bf16 %v91_v24, %v90_v23  ;;  %v74_v27 = vld [vmem:[%s5198_s23 + $0x20] sm:$0xff]  ;;  %v75_v28 = vld [vmem:[%s5198_s23 + $0x28] sm:$0xff]  ;;  %v92_v35 = vld [vmem:[%s5198_s23 + $0xb0] sm:$0xff] }
  0x13   :  { %v122_v29 = vld [vmem:[%s5198_s23 + $0x1a0] sm:$0xff]  ;;  %3867 = vmatprep.subr.bf16.mxu1 %v3866_v21  ;;  %v123_v30 = vld [vmem:[%s5198_s23 + $0x1a8] sm:$0xff]  ;;  %v3840_v33 = vpack.c.bf16 %v75_v28, %v74_v27  ;;  %v93_v36 = vld [vmem:[%s5198_s23 + $0xb8] sm:$0xff] }
  0x14   :  { %v106_v31 = vld [vmem:[%s5198_s23 + $0x120] sm:$0xff]  ;;  %v107_v32 = vld [vmem:[%s5198_s23 + $0x128] sm:$0xff]  ;;  %3837 = vmatpush3.bf16.msra.mxu0 %v3836_v17  ;;  %v3870_v34 = vpack.c.bf16 %v123_v30, %v122_v29  ;;  %v76_v37 = vld [vmem:[%s5198_s23 + $0x30] sm:$0xff]  ;;  %v3842_v39 = vpack.c.bf16 %v93_v36, %v92_v35 }
  0x15   :  { %3839 = vmatprep.subr.bf16.mxu0 %v3838_v26  ;;  %v3872_v38 = vpack.c.bf16 %v107_v32, %v106_v31  ;;  %v77_v40 = vld [vmem:[%s5198_s23 + $0x38] sm:$0xff]  ;;  %v124_v41 = vld [vmem:[%s5198_s23 + $0x1b0] sm:$0xff]  ;;  %v94_v46 = vld [vmem:[%s5198_s23 + $0xc0] sm:$0xff] }
  0x16   :  { %3869 = vmatpush3.bf16.msra.mxu1 %v3868_v25  ;;  %v125_v42 = vld [vmem:[%s5198_s23 + $0x1b8] sm:$0xff]  ;;  %v108_v44 = vld [vmem:[%s5198_s23 + $0x130] sm:$0xff]  ;;  %v95_v47 = vld [vmem:[%s5198_s23 + $0xc8] sm:$0xff]  ;;  %v3844_v48 = vpack.c.bf16 %v77_v40, %v76_v37 }
  0x17   :  { %3871 = vmatprep.subr.bf16.mxu1 %v3870_v34  ;;  %v3874_v43 = vpack.c.bf16 %v125_v42, %v124_v41  ;;  %v109_v45 = vld [vmem:[%s5198_s23 + $0x138] sm:$0xff]  ;;  %v126_v49 = vld [vmem:[%s5198_s23 + $0x1c0] sm:$0xff]  ;;  %v127_v50 = vld [vmem:[%s5198_s23 + $0x1c8] sm:$0xff]  ;;  %v3846_v52 = vpack.c.bf16 %v95_v47, %v94_v46 }
  0x18   :  { %3841 = vmatpush3.bf16.msra.mxu0 %v3840_v33  ;;  %v3876_v51 = vpack.c.bf16 %v109_v45, %v108_v44  ;;  %v78_v53 = vld [vmem:[%s5198_s23 + $0x40] sm:$0xff]  ;;  %v79_v54 = vld [vmem:[%s5198_s23 + $0x48] sm:$0xff]  ;;  %v3878_v56 = vpack.c.bf16 %v127_v50, %v126_v49  ;;  %v96_v58 = vld [vmem:[%s5198_s23 + $0xd0] sm:$0xff] }
  0x19   :  { %3843 = vmatprep.subr.bf16.mxu0 %v3842_v39  ;;  %v110_v55 = vld [vmem:[%s5198_s23 + $0x140] sm:$0xff]  ;;  %v111_v57 = vld [vmem:[%s5198_s23 + $0x148] sm:$0xff]  ;;  %v97_v59 = vld [vmem:[%s5198_s23 + $0xd8] sm:$0xff]  ;;  %v3848_v62 = vpack.c.bf16 %v79_v54, %v78_v53 }
  0x1a   :  { %3873 = vmatpush3.bf16.msra.mxu1 %v3872_v38  ;;  %v128_v60 = vld [vmem:[%s5198_s23 + $0x1d0] sm:$0xff]  ;;  %v129_v61 = vld [vmem:[%s5198_s23 + $0x1d8] sm:$0xff]  ;;  %v3880_v63 = vpack.c.bf16 %v111_v57, %v110_v55  ;;  %v3850_v0 = vpack.c.bf16 %v97_v59, %v96_v58  ;;  %v98_v6 = vld [vmem:[%s5198_s23 + $0xe0] sm:$0xff] }
  0x1b   :  { %3875 = vmatprep.subr.bf16.mxu1 %v3874_v43  ;;  %v80_v1 = vld [vmem:[%s5198_s23 + $0x50] sm:$0xff]  ;;  %v81_v2 = vld [vmem:[%s5198_s23 + $0x58] sm:$0xff]  ;;  %v3882_v4 = vpack.c.bf16 %v129_v61, %v128_v60  ;;  %v99_v7 = vld [vmem:[%s5198_s23 + $0xe8] sm:$0xff] }
  0x1c   :  { %3845 = vmatpush3.bf16.msra.mxu0 %v3844_v48  ;;  %v112_v3 = vld [vmem:[%s5198_s23 + $0x150] sm:$0xff]  ;;  %v113_v5 = vld [vmem:[%s5198_s23 + $0x158] sm:$0xff]  ;;  %v130_v8 = vld [vmem:[%s5198_s23 + $0x1e0] sm:$0xff]  ;;  %v3852_v10 = vpack.c.bf16 %v81_v2, %v80_v1  ;;  %v3854_v14 = vpack.c.bf16 %v99_v7, %v98_v6 }
  0x1d   :  { %3847 = vmatprep.subr.bf16.mxu0 %v3846_v52  ;;  %v131_v9 = vld [vmem:[%s5198_s23 + $0x1e8] sm:$0xff]  ;;  %v82_v11 = vld [vmem:[%s5198_s23 + $0x60] sm:$0xff]  ;;  %v3884_v13 = vpack.c.bf16 %v113_v5, %v112_v3  ;;  %v100_v19 = vld [vmem:[%s5198_s23 + $0xf0] sm:$0xff] }
  0x1e   :  { %3877 = vmatpush3.bf16.msra.mxu1 %v3876_v51  ;;  %v67_v12 = vld [vmem:[%s5199_s29 + $0x8] sm:$0xff]  ;;  %v114_v16 = vld [vmem:[%s5198_s23 + $0x160] sm:$0xff]  ;;  %v3886_v18 = vpack.c.bf16 %v131_v9, %v130_v8  ;;  %v101_v20 = vld [vmem:[%s5198_s23 + $0xf8] sm:$0xff] }
  0x1f   :  { %3879 = vmatprep.subr.bf16.mxu1 %v3878_v56  ;;  %v83_v15 = vld [vmem:[%s5198_s23 + $0x68] sm:$0xff]  ;;  %205 = vmatprep.mubr.f32.mxu0 %v67_v12  ;;  %v69_v21 = vld [vmem:[%s5199_s29 + $0x18] sm:$0xff]  ;;  %v132_v22 = vld [vmem:[%s5198_s23 + $0x1f0] sm:$0xff] }
  0x20   :  { %3849 = vmatpush3.bf16.msra.mxu0 %v3848_v62  ;;  %v115_v17 = vld [vmem:[%s5198_s23 + $0x168] sm:$0xff]  ;;  %v133_v23 = vld [vmem:[%s5198_s23 + $0x1f8] sm:$0xff]  ;;  %275 = vmatprep.mubr.f32.mxu1 %v69_v21 }
  0x21   :  { %3851 = vmatprep.subr.bf16.mxu0 %v3850_v0 }
  0x22   :  { %3881 = vmatpush3.bf16.msra.mxu1 %v3880_v63 }
  0x23   :  { %3883 = vmatprep.subr.bf16.mxu1 %v3882_v4 }
  0x24   :  { %27 = vsyncpa [#allocation5], 0  ;;  %3853 = vmatpush3.bf16.msra.mxu0 %v3852_v10  ;;  %v3856_v24 = vpack.c.bf16 %v83_v15, %v82_v11  ;;  %v3888_v25 = vpack.c.bf16 %v115_v17, %v114_v16  ;;  %v3858_v26 = vpack.c.bf16 %v101_v20, %v100_v19  ;;  %v84_v27 = vld [vmem:[%s5198_s23 + $0x70] sm:$0xff]  ;;  %v85_v28 = vld [vmem:[%s5198_s23 + $0x78] sm:$0xff]  ;;  %v3890_v29 = vpack.c.bf16 %v133_v23, %v132_v22  ;;  %s5200_s24 = sld [smem:[#allocation9_spill]]  ;;  %s5201_s0 = sld [smem:[#allocation12_spill]] }
  0x25   :  { %3855 = vmatprep.subr.bf16.mxu0 %v3854_v14  ;;  %v116_v30 = vld [vmem:[%s5198_s23 + $0x170] sm:$0xff]  ;;  %v117_v31 = vld [vmem:[%s5198_s23 + $0x178] sm:$0xff]  ;;  %v3860_v32 = vpack.c.bf16 %v85_v28, %v84_v27  ;;  %v66_v34 = vld [vmem:[%s5199_s29] sm:$0xff]  ;;  %v4239_v35 = vmov 0.0   ;;  %vm294_vm0 = vcmask 1042432   ;;  %vm290_vm1 = vcmask 23552  }
  0x26   :  { %3885 = vmatpush3.bf16.msra.mxu1 %v3884_v13  ;;  %v3892_v33 = vpack.c.bf16 %v117_v31, %v116_v30  ;;  %v282_v36 = vld [vmem:[%s5174_s5] sm:$0x7]  ;;  %v68_v37 = vld [vmem:[%s5199_s29 + $0x10] sm:$0xff]  ;;  %vm4240_vm2 = vmmov 0   ;;  %v370_v40 = vld [vmem:[%s5176_s7 + $0x8] sm:$0xff]  ;;  %v4241_v42 = vmov 0.0|0.0  }
  0x27   :  { %3887 = vmatprep.subr.bf16.mxu1 %v3886_v18  ;;  %v369_v39 = vld [vmem:[%s5176_s7] sm:$0xff]  ;;  %v371_v43 = vld [vmem:[%s5176_s7 + $0x10] sm:$0xff]  ;;  %v372_v44 = vld [vmem:[%s5176_s7 + $0x18] sm:$0xff]  ;;  %vm380_vm3 = vcmask 261120   ;;  %s4242_s23 = smov 32   ;;  %vm476_vm4 = vcmask 523264  }
  0x28   :  { %3857 = vmatpush3.bf16.msra.mxu0 %v3856_v24  ;;  %v3895_v41 = vpack.c.bf16 %v370_v40, %v369_v39  ;;  %v3898_v45 = vpack.c.bf16 %v372_v44, %v371_v43  ;;  %v3099_v52 = vld [vmem:[%s5175_s6] ss:$0 sm:$0xff]  ;;  %v460_v61 = vld [vmem:[%s5178_s9 + $0x8] sm:$0xff]  ;;  %v461_v1 = vld [vmem:[%s5178_s9 + $0x10] sm:$0xff]  ;;  %s5202_s29 = sld [smem:[#allocation10_spill]]  ;;  %vm1723_vm5 = vcmask 1041408  }
  0x29   :  { %3859 = vmatprep.subr.bf16.mxu0 %v3858_v26  ;;  %v459_v60 = vld [vmem:[%s5178_s9] sm:$0xff]  ;;  %v3106_v0 = vld [vmem:[%s5178_s9 + $0x48] sm:$0xff]  ;;  %v462_v2 = vld [vmem:[%s5178_s9 + $0x18] sm:$0xff]  ;;  %vm1725_vm6 = vcmask 1043456   ;;  %vm1727_vm7 = vcmask 1045504   ;;  %vm1721_vm8 = vcmask 261126  }
  0x2a   :  { %3889 = vmatpush3.bf16.msra.mxu1 %v3888_v25  ;;  %v281_v38 = vld [vmem:[%s5200_s24] sm:$0xff]  ;;  %v3901_v63 = vpack.c.bf16 %v460_v61, %v459_v60  ;;  %v3107_v4 = vld [vmem:[%s5178_s9 + $0x50] sm:$0xff]  ;;  %v3108_v5 = vld [vmem:[%s5178_s9 + $0x58] sm:$0xff]  ;;  %v3904_v6 = vpack.c.bf16 %v462_v2, %v461_v1 }
  0x2b   :  { %3891 = vmatprep.subr.bf16.mxu1 %v3890_v29  ;;  %v3098_v47 = vld [vmem:[%s5201_s0] ss:$0 sm:$0xff]  ;;  %v3916_v7 = vpack.c.bf16 %v3108_v5, %v3107_v4  ;;  %v464_v9 = vld [vmem:[%s5178_s9 + $0x28] sm:$0xff]  ;;  %v465_v14 = vld [vmem:[%s5178_s9 + $0x30] sm:$0xff] }
  0x2c   :  { %3861 = vmatpush3.bf16.msra.mxu0 %v3860_v32  ;;  %v3105_v62 = vld [vmem:[%s5178_s9 + $0x40] sm:$0xff]  ;;  %v3110_v11 = vld [vmem:[%s5178_s9 + $0x68] sm:$0xff]  ;;  %v466_v15 = vld [vmem:[%s5178_s9 + $0x38] sm:$0xff] }
  0x2d   :  { %3449 = vmatprep.subr.mxu0 %v4239_v35  ;;  %v3913_v3 = vpack.c.bf16 %v3106_v0, %v3105_v62  ;;  %v463_v8 = vld [vmem:[%s5178_s9 + $0x20] sm:$0xff]  ;;  %v3111_v16 = vld [vmem:[%s5178_s9 + $0x70] sm:$0xff]  ;;  %v3112_v17 = vld [vmem:[%s5178_s9 + $0x78] sm:$0xff]  ;;  %v3910_v18 = vpack.c.bf16 %v466_v15, %v465_v14 }
  0x2e   :  { %3893 = vmatpush3.bf16.msra.mxu1 %v3892_v33  ;;  %v3109_v10 = vld [vmem:[%s5178_s9 + $0x60] sm:$0xff]  ;;  %v3907_v12 = vpack.c.bf16 %v464_v9, %v463_v8  ;;  %v3922_v19 = vpack.c.bf16 %v3112_v17, %v3111_v16  ;;  %v3117_v25 = vld [vmem:[%s5178_s9 + $0x88] sm:$0xff]  ;;  %v3118_v30 = vld [vmem:[%s5178_s9 + $0x90] sm:$0xff] }
  0x2f   :  { %206 = vmatmul.mubr.f32.vlgmr.msra.gmra.mrb[0].mxu0 %v66_v34  ;;  %3894 = vmatprep.subr.bf16.mxu1 %v4241_v42  ;;  %v3919_v13 = vpack.c.bf16 %v3110_v11, %v3109_v10  ;;  %v3102_v20 = vld [vmem:[%s5177_s8] ss:$0 sm:$0xff]  ;;  %v728_v27 = vld [vmem:[%s5179_s10 + $0x8] sm:$0xff]  ;;  %v3119_v32 = vld [vmem:[%s5178_s9 + $0x98] sm:$0xff] }
  0x30   :  { %3450 = vmatpush3.msk.msra.mxu0 %vm294_vm0, %v282_v36  ;;  %3451 = vmatprep.mubr.msk.f32.mxu0 %vm4240_vm2, %v4239_v35  ;;  %v3116_v24 = vld [vmem:[%s5178_s9 + $0x80] sm:$0xff]  ;;  %v729_v33 = vld [vmem:[%s5179_s10 + $0x10] sm:$0xff]  ;;  %v730_v34 = vld [vmem:[%s5179_s10 + $0x18] sm:$0xff] }
  0x31   :  { %276 = vmatmul.mubr.f32.vlgmr.msra.gmra.mrb[0].mxu1 %v68_v37  ;;  %3900 = vmatprep.subr.bf16.mxu0 %v4241_v42  ;;  %v727_v26 = vld [vmem:[%s5179_s10] sm:$0xff]  ;;  %v3925_v28 = vpack.c.bf16 %v3117_v25, %v3116_v24  ;;  %v3928_v37 = vpack.c.bf16 %v3119_v32, %v3118_v30  ;;  %v3121_v40 = vld [vmem:[%s5178_s9 + $0xa8] sm:$0xff] }
  0x32   :  { %3462 = vmatprep.mubr.msk.f32.mxu1 %vm4240_vm2, %v4239_v35  ;;  %3896 = vmatpush3.bf16.msra.mxu1 %v3895_v41  ;;  %v4667_v29 = vpack.c.bf16 %v728_v27, %v727_v26  ;;  %v3120_v39 = vld [vmem:[%s5178_s9 + $0xa0] sm:$0xff]  ;;  %v3128_v43 = vld [vmem:[%s5179_s10 + $0x28] sm:$0xff] }
  0x33   :  { %3452 = vmatmul.mubr.msk.f32.vlgmr.msra.gmra.mrb[2].mxu0 %vm290_vm1, %v281_v38  ;;  %3897 = vmatprep.subr.bf16.mxu1 %v4241_v42  ;;  %v4686_v38 = vpack.c.bf16 %v730_v34, %v729_v33  ;;  %v3127_v41 = vld [vmem:[%s5179_s10 + $0x20] sm:$0xff] }
  0x34   :  { %3481 = vmatprep.mubr.msk.f32.mxu0 %vm4240_vm2, %v4239_v35  ;;  %3902 = vmatpush3.bf16.msra.mxu0 %v3901_v63  ;;  %v4710_v44 = vld [vmem:[%s5202_s29] sm:$0x3]  ;;  %v4804_v26 = vld [vmem:[%s5181_s12 + $0x2] ss:$0 sm:$0xff] }
  0x35   :  { %3903 = vmatprep.subr.bf16.mxu0 %v4241_v42  ;;  %v467_v61 = vld [vmem:[%s5180_s11] sm:$0x1] }
  0x36   :  { %3899 = vmatpush3.bf16.msra.mxu1 %v3898_v45  ;;  %v3931_v45 = vpack.c.bf16 %v3121_v40, %v3120_v39  ;;  %v468_v62 = vld [vmem:[%s5181_s12] sm:$0x1] }
  0x37   :  { %3912 = vmatprep.subr.bf16.mxu1 %v4241_v42  ;;  %v469_v63 = vadd.f32 %v468_v62, %v467_v61 }
  0x38   :  { %3905 = vmatpush3.bf16.msra.mxu0 %v3904_v6  ;;  %v3113_v6 = vld [vmem:[%s5180_s11 + $0x1] sm:$0x1] }
  0x39   :  { %3906 = vmatprep.subr.bf16.mxu0 %v4241_v42 }
  0x3c   :  { %3908 = vmatpush3.bf16.msra.mxu0 %v3907_v12 }
  0x3d   :  { %3909 = vmatprep.subr.bf16.mxu0 %v4241_v42 }
  0x40   :  { %3911 = vmatpush3.bf16.msra.mxu0 %v3910_v18 }
  0x41   :  { %3924 = vmatprep.subr.bf16.mxu0 %v4241_v42 }
 0x102   :  { %v3237_v46 = vpop.f32.mrb[0].mxu0 }
 0x103   :  { %v3238_v48 = vpop.f32.mrb[1].mxu0 }
 0x104   :  { %v3272_v49 = vpop.f32.mrb[0].mxu1  ;;  %v3239_v50 = vadd.f32 %v3238_v48, %v3237_v46  ;;  %v4712_v46 = vpack.c.bf16 %v3128_v43, %v3127_v41  ;;  %v3123_v48 = vld [vmem:[%s5178_s9 + $0xb8] sm:$0xff] }
 0x105   :  { %v3273_v51 = vpop.f32.mrb[1].mxu1 }
 0x106   :  { %v3274_v53 = vadd.f32 %v3273_v51, %v3272_v49  ;;  %v208_v54 = vadd.f32 %v3239_v50, %v3098_v47  ;;  %v364_v55 = vpop.f32.mrb[2].mxu0  ;;  %v3122_v47 = vld [vmem:[%s5178_s9 + $0xb0] sm:$0xff]  ;;  %v3130_v50 = vld [vmem:[%s5179_s10 + $0x38] sm:$0xff] }
 0x107   :  { %v365_v56 = vadd.f32 %v3099_v52, %v364_v55  ;;  %v3453_v57 = vpop.f32.mrb[3].mxu0  ;;  %v3129_v49 = vld [vmem:[%s5179_s10 + $0x30] sm:$0xff]  ;;  %v3934_v51 = vpack.c.bf16 %v3123_v48, %v3122_v47 }
 0x108   :  { %v4590_v58 = vadd.f32 %v3274_v53, %v208_v54  ;;  %v4731_v52 = vpack.c.bf16 %v3130_v50, %v3129_v49  ;;  %v3131_v53 = vld [vmem:[%s5179_s10 + $0x40] sm:$0xff]  ;;  %v3132_v54 = vld [vmem:[%s5179_s10 + $0x48] sm:$0xff]  ;;  %v3134_v57 = vld [vmem:[%s5179_s10 + $0x58] sm:$0xff] }
 0x109   :  { %v368_v59 = vmax.f32 %v365_v56, 0.0  ;;  %v4744_v55 = vpack.c.bf16 %v3132_v54, %v3131_v53  ;;  %v3133_v56 = vld [vmem:[%s5179_s10 + $0x50] sm:$0xff] }
 0x10b   :  { %3463 = vmatmul.mubr.msk.f32.vlgmr.msra.gmra.mrb[2].mxu1 %vm380_vm3, %v368_v59  ;;  %v471_v59 = vlaneseq }
 0x10c   :  { %3500 = vmatprep.mubr.msk.f32.mxu1 %vm4240_vm2, %v4239_v35  ;;  %3914 = vmatpush3.bf16.msra.mxu1 %v3913_v3 }
 0x10d   :  { %3915 = vmatprep.subr.bf16.mxu1 %v4241_v42  ;;  %v472_v60 = vshrl.u32 %v471_v59, 7 }
 0x10f   :  { %v4785_v0 = vsub.s32 0, %v472_v60 }
 0x110   :  { %3917 = vmatpush3.bf16.msra.mxu1 %v3916_v7  ;;  %v3114_v7 = vld [vmem:[%s5181_s12 + $0x1] sm:$0x1] }
 0x111   :  { %3918 = vmatprep.subr.bf16.mxu1 %v4241_v42  ;;  %v474_v5 = vrot.slane %v469_v63, %v4785_v0  ;;  %v563_v9 = vadd.f32 %v3114_v7, %v3113_v6 }
 0x114   :  { %3920 = vmatpush3.bf16.msra.mxu1 %v3919_v13  ;;  %v568_v13 = vrot.slane %v563_v9, %v4785_v0 }
 0x115   :  { %3921 = vmatprep.subr.bf16.mxu1 %v4241_v42 }
 0x118   :  { %3923 = vmatpush3.bf16.msra.mxu1 %v3922_v19 }
 0x119   :  { %3936 = vmatprep.subr.bf16.mxu1 %v4241_v42 }
 0x1de   :  { %v450_v21 = vpop.f32.mrb[2].mxu1 }
 0x1df   :  { %v451_v22 = vadd.f32 %v3102_v20, %v450_v21  ;;  %v3464_v23 = vpop.f32.mrb[3].mxu1 }
 0x1e1   :  { %455 = vrot.lane.b32.xlu0 %v451_v22, %s4242_s23 }
 0x253   :  { %v456_v31 = vpop.permute.xlu0 %455 }
 0x254   :  { %v458_v36 = vsel %vm380_vm3, %v4590_v58, %v456_v31  ;;  %v4758_v58 = vpack.c.bf16 %v3134_v57, %v3133_v56  ;;  %v3125_v31 = vld [vmem:[%s5180_s11 + $0x2] ss:$0 sm:$0xff] }
 0x255   :  { %3482 = vmatmul.mubr.msk.f32.vlgmr.msra.gmra.mrb[4].mxu0 %vm476_vm4, %v458_v36  ;;  %3501 = vmatmul.mubr.msk.f32.vlgmr.msra.gmra.mrb[4].mxu1 %vm476_vm4, %v458_v36 }
 0x256   :  { %3926 = vmatpush3.bf16.msra.mxu0 %v3925_v28  ;;  %3938 = vmatpush3.bf16.msra.mxu1 %v4667_v29 }
 0x257   :  { %3927 = vmatprep.subr.bf16.mxu0 %v4241_v42  ;;  %3939 = vmatprep.subr.bf16.mxu1 %v4241_v42 }
 0x258   :  { %3530 = vmatprep.mubr.msk.f32.mxu1 %vm4240_vm2, %v4239_v35  ;;  %3519 = vmatprep.mubr.msk.f32.mxu0 %vm4240_vm2, %v4239_v35 }
 0x25a   :  { %3929 = vmatpush3.bf16.msra.mxu0 %v3928_v37  ;;  %3941 = vmatpush3.bf16.msra.mxu1 %v4686_v38 }
 0x25b   :  { %3930 = vmatprep.subr.bf16.mxu0 %v4241_v42  ;;  %3942 = vmatprep.subr.bf16.mxu1 %v4241_v42 }
 0x25d   :  { %3531 = vmatmul.mubr.msk.f32.vlgmr.msra.gmra.mrb[6].mxu1 %vm380_vm3, %v4710_v44 }
 0x25e   :  { %3932 = vmatpush3.bf16.msra.mxu0 %v3931_v45  ;;  %3944 = vmatpush3.bf16.msra.mxu1 %v4712_v46 }
 0x25f   :  { %3933 = vmatprep.subr.bf16.mxu0 %v4241_v42  ;;  %3945 = vmatprep.subr.bf16.mxu1 %v4241_v42 }
 0x260   :  { %3541 = vmatprep.mubr.msk.f32.mxu1 %vm4240_vm2, %v4239_v35 }
 0x262   :  { %3935 = vmatpush3.bf16.msra.mxu0 %v3934_v51  ;;  %3947 = vmatpush3.bf16.msra.mxu1 %v4731_v52 }
 0x263   :  { %3948 = vmatprep.subr.bf16.mxu0 %v4241_v42  ;;  %3954 = vmatprep.subr.bf16.mxu1 %v4241_v42 }
 0x265   :  { %3520 = vmatmul.mubr.msk.f32.vlgmr.msra.gmra.mrb[6].mxu0 %vm476_vm4, %v458_v36  ;;  %3542 = vmatmul.mubr.msk.f32.vlgmr.msra.gmra.mrb[8].mxu1 %vm380_vm3, %v4710_v44 }
 0x266   :  { %3950 = vmatpush3.bf16.msra.mxu0 %v4744_v55  ;;  %3552 = vmatprep.mubr.msk.f32.mxu0 %vm4240_vm2, %v4239_v35 }
 0x267   :  { %3951 = vmatprep.subr.bf16.mxu0 %v4241_v42  ;;  %3956 = vmatpush3.bf16.msra.mxu1 %v4667_v29 }
 0x268   :  { %3957 = vmatprep.subr.bf16.mxu1 %v4241_v42  ;;  %3563 = vmatprep.mubr.msk.f32.mxu1 %vm4240_vm2, %v4239_v35 }
 0x26a   :  { %3953 = vmatpush3.bf16.msra.mxu0 %v4758_v58 }
 0x26b   :  { %3960 = vmatprep.subr.bf16.mxu0 %v4241_v42  ;;  %3959 = vmatpush3.bf16.msra.mxu1 %v4686_v38 }
 0x26c   :  { %3966 = vmatprep.subr.bf16.mxu1 %v4241_v42 }
 0x26d   :  { %3553 = vmatmul.mubr.msk.f32.vlgmr.msra.gmra.mrb[8].mxu0 %vm380_vm3, %v4710_v44 }
 0x26e   :  { %3962 = vmatpush3.bf16.msra.mxu0 %v4712_v46  ;;  %3574 = vmatprep.mubr.msk.f32.mxu0 %vm4240_vm2, %v4239_v35 }
 0x26f   :  { %3963 = vmatprep.subr.bf16.mxu0 %v4241_v42 }
 0x272   :  { %3965 = vmatpush3.bf16.msra.mxu0 %v4731_v52 }
 0x273   :  { %3972 = vmatprep.subr.bf16.mxu0 %v4241_v42 }
 0x328   :  { %v546_v1 = vpop.f32.mrb[4].mxu0  ;;  %v636_v2 = vpop.f32.mrb[4].mxu1 }
 0x329   :  { %v3483_v3 = vpop.f32.mrb[5].mxu0  ;;  %v3502_v4 = vpop.f32.mrb[5].mxu1  ;;  %v4794_v8 = vadd.f32 %v546_v1, %v474_v5  ;;  %v4798_v15 = vadd.f32 %v636_v2, %v568_v13 }
 0x330   :  { %v813_v10 = vpop.f32.mrb[6].mxu1 }
 0x331   :  { %v817_v11 = vadd.f32 %v813_v10, %v4794_v8  ;;  %v3532_v12 = vpop.f32.mrb[7].mxu1 }
 0x333   :  { %v3137_v14 = vmul.f32 -1.442695, %v817_v11 }
 0x335   :  { %4111 = vpow2.f32 %v3137_v14 }
 0x338   :  { %v723_v16 = vpop.f32.mrb[6].mxu0  ;;  %v890_v17 = vpop.f32.mrb[8].mxu1 }
 0x339   :  { %v894_v18 = vadd.f32 %v890_v17, %v4798_v15  ;;  %v3521_v19 = vpop.f32.mrb[7].mxu0  ;;  %v3543_v20 = vpop.f32.mrb[9].mxu1  ;;  %v4810_v33 = vadd.f32 %v3125_v31, %v723_v16 }
 0x33b   :  { %v3139_v21 = vmul.f32 -1.442695, %v894_v18 }
 0x33d   :  { %4113 = vpow2.f32 %v3139_v21 }
 0x33f   :  { %v4112_v22 = vpop.eup %4111 }
 0x340   :  { %v821_v23 = vadd.f32 1.0, %v4112_v22  ;;  %v973_v24 = vpop.f32.mrb[8].mxu0 }
 0x341   :  { %v3554_v25 = vpop.f32.mrb[9].mxu0  ;;  %v974_v30 = vadd.f32 %v4804_v26, %v973_v24 }
 0x342   :  { %4115 = vrcp.f32 %v821_v23 }
 0x347   :  { %v4114_v27 = vpop.eup %4113 }
 0x348   :  { %v898_v28 = vadd.f32 1.0, %v4114_v27 }
 0x34a   :  { %4117 = vrcp.f32 %v898_v28 }
 0x34c   :  { %v4116_v32 = vpop.eup %4115 }
 0x34d   :  { %v977_v34 = vmul.f32 %v4116_v32, %v974_v30 }
 0x34f   :  { %v978_v36 = vadd.f32 %v977_v34, %v4810_v33 }
 0x351   :  { %4119 = vtanh.f32 %v978_v36 }
 0x354   :  { %v4118_v37 = vpop.eup %4117 }
 0x355   :  { %v980_v39 = vsub.f32 1.0, %v4118_v37  ;;  %v982_v43 = vmul.f32 %v4118_v37, %v4710_v44 }
 0x35b   :  { %v4120_v40 = vpop.eup %4119 }
 0x35c   :  { %v981_v41 = vmul.f32 %v4120_v40, %v980_v39 }
 0x35e   :  { %v4814_v45 = vadd.f32 %v982_v43, %v981_v41 }
 0x360   :  { %3564 = vmatmul.mubr.msk.f32.vlgmr.msra.gmra.mrb[10].mxu1 %vm380_vm3, %v4814_v45  ;;  %3575 = vmatmul.mubr.msk.f32.vlgmr.msra.gmra.mrb[10].mxu0 %vm380_vm3, %v4814_v45  ;;  %v1225_v10 = vrot.slane %v4814_v45, 6 }
 0x361   :  { %3968 = vmatpush3.bf16.msra.mxu1 %v4744_v55  ;;  %3585 = vmatprep.mubr.msk.f32.mxu1 %vm4240_vm2, %v4239_v35 }
 0x362   :  { %3969 = vmatprep.subr.bf16.mxu1 %v4241_v42  ;;  %3974 = vmatpush3.bf16.msra.mxu0 %v4667_v29 }
 0x363   :  { %3975 = vmatprep.subr.bf16.mxu0 %v4241_v42  ;;  %3596 = vmatprep.mubr.msk.f32.mxu0 %vm4240_vm2, %v4239_v35 }
 0x365   :  { %3971 = vmatpush3.bf16.msra.mxu1 %v4758_v58 }
 0x366   :  { %3978 = vmatprep.subr.bf16.mxu1 %v4241_v42  ;;  %3977 = vmatpush3.bf16.msra.mxu0 %v4686_v38 }
 0x367   :  { %3984 = vmatprep.subr.bf16.mxu0 %v4241_v42 }
 0x368   :  { %3586 = vmatmul.mubr.msk.f32.vlgmr.msra.gmra.mrb[12].mxu1 %vm380_vm3, %v4814_v45 }
 0x369   :  { %3980 = vmatpush3.bf16.msra.mxu1 %v4712_v46  ;;  %3607 = vmatprep.mubr.msk.f32.mxu1 %vm4240_vm2, %v4239_v35 }
 0x36a   :  { %3981 = vmatprep.subr.bf16.mxu1 %v4241_v42 }
 0x36d   :  { %3983 = vmatpush3.bf16.msra.mxu1 %v4731_v52 }
 0x36e   :  { %3990 = vmatprep.subr.bf16.mxu1 %v4241_v42 }
 0x433   :  { %v1053_v44 = vpop.f32.mrb[10].mxu1  ;;  %v1133_v47 = vpop.f32.mrb[10].mxu0 }
 0x434   :  { %v1058_v48 = vrot.slane %v1053_v44, 6  ;;  %v3565_v49 = vpop.f32.mrb[11].mxu1  ;;  %v3576_v50 = vpop.f32.mrb[11].mxu0  ;;  %v1138_v51 = vrot.slane %v1133_v47, 6 }
 0x436   :  { %v1060_v53 = vadd.f32 %v1058_v48, %v4794_v8  ;;  %v1140_v56 = vadd.f32 %v1138_v51, %v4798_v15 }
 0x438   :  { %v3143_v54 = vmul.f32 -1.442695, %v1060_v53  ;;  %v3145_v60 = vmul.f32 -1.442695, %v1140_v56  ;;  %v3158_v53 = vld [vmem:[%s5182_s13 + $0x20] sm:$0xff]  ;;  %v1731_v56 = vld [vmem:[%s5182_s13 + $0x10] sm:$0xff] }
 0x43a   :  { %4121 = vpow2.f32 %v3143_v54  ;;  %v3159_v54 = vld [vmem:[%s5182_s13 + $0x28] sm:$0xff] }
 0x43b   :  { %v1213_v57 = vpop.f32.mrb[12].mxu1  ;;  %4123 = vpow2.f32 %v3145_v60  ;;  %v3160_v60 = vld [vmem:[%s5182_s13 + $0x30] sm:$0xff] }
 0x43c   :  { %v3587_v59 = vpop.f32.mrb[13].mxu1  ;;  %v1214_v1 = vadd.f32 %v4804_v26, %v1213_v57  ;;  %v1732_v57 = vld [vmem:[%s5182_s13 + $0x18] sm:$0xff] }
 0x43d   :  { %v4015_v59 = vpack.c.bf16 %v3159_v54, %v3158_v53  ;;  %v3179_v53 = vld [vmem:[%s5183_s14 + $0x58] sm:$0xff] }
 0x43e   :  { %v1218_v3 = vrot.slane %v1214_v1, 6 }
 0x444   :  { %v4122_v61 = vpop.eup %4121 }
 0x445   :  { %v1064_v62 = vadd.f32 1.0, %v4122_v61  ;;  %v4124_v63 = vpop.eup %4123  ;;  %v3161_v61 = vld [vmem:[%s5182_s13 + $0x38] sm:$0xff] }
 0x446   :  { %v1144_v2 = vadd.f32 1.0, %v4124_v63  ;;  %v4018_v63 = vpack.c.bf16 %v3161_v61, %v3160_v60 }
 0x447   :  { %4125 = vrcp.f32 %v1064_v62  ;;  %v4012_v62 = vpack.c.bf16 %v1732_v57, %v1731_v56  ;;  %v1733_v56 = vld [vmem:[%s5184_s15] sm:$0x1] }
 0x448   :  { %4127 = vrcp.f32 %v1144_v2  ;;  %v1734_v57 = vld [vmem:[%s5185_s16] sm:$0x1] }
 0x451   :  { %v4126_v4 = vpop.eup %4125 }
 0x452   :  { %v1220_v5 = vmul.f32 %v4126_v4, %v1218_v3  ;;  %v4128_v7 = vpop.eup %4127 }
 0x453   :  { %v1223_v9 = vsub.f32 1.0, %v4128_v7  ;;  %v1227_v12 = vmul.f32 %v4128_v7, %v1225_v10 }
 0x454   :  { %v1221_v6 = vadd.f32 %v1220_v5, %v4810_v33 }
 0x456   :  { %4129 = vtanh.f32 %v1221_v6 }
 0x460   :  { %v4130_v11 = vpop.eup %4129 }
 0x461   :  { %v1224_v13 = vmul.f32 %v4130_v11, %v1223_v9 }
 0x463   :  { %v1228_v14 = vadd.f32 %v1227_v12, %v1224_v13 }
 0x465   :  { %v1230_v16 = vrot.slane %v1228_v14, 2  ;;  %v1471_v36 = vrot.slane %v1228_v14, 6  ;;  %v1724_v49 = vsel %vm1723_vm5, %v4814_v45, %v1228_v14  ;;  %v1730_v45 = vld [vmem:[%s5182_s13 + $0x8] sm:$0xff] }
 0x467   :  { %3597 = vmatmul.mubr.msk.f32.vlgmr.msra.gmra.mrb[12].mxu0 %vm380_vm3, %v1230_v16  ;;  %3608 = vmatmul.mubr.msk.f32.vlgmr.msra.gmra.mrb[14].mxu1 %vm380_vm3, %v1230_v16 }
 0x468   :  { %3986 = vmatpush3.bf16.msra.mxu0 %v4744_v55  ;;  %3618 = vmatprep.mubr.msk.f32.mxu0 %vm4240_vm2, %v4239_v35 }
 0x469   :  { %3987 = vmatprep.subr.bf16.mxu0 %v4241_v42  ;;  %3992 = vmatpush3.bf16.msra.mxu1 %v4667_v29 }
 0x46a   :  { %3993 = vmatprep.subr.bf16.mxu1 %v4241_v42  ;;  %3629 = vmatprep.mubr.msk.f32.mxu1 %vm4240_vm2, %v4239_v35 }
 0x46c   :  { %3989 = vmatpush3.bf16.msra.mxu0 %v4758_v58 }
 0x46d   :  { %3996 = vmatprep.subr.bf16.mxu0 %v4241_v42  ;;  %3995 = vmatpush3.bf16.msra.mxu1 %v4686_v38 }
 0x46e   :  { %4002 = vmatprep.subr.bf16.mxu1 %v4241_v42 }
 0x46f   :  { %3619 = vmatmul.mubr.msk.f32.vlgmr.msra.gmra.mrb[14].mxu0 %vm380_vm3, %v1230_v16 }
 0x470   :  { %3998 = vmatpush3.bf16.msra.mxu0 %v4712_v46  ;;  %3640 = vmatprep.mubr.msk.f32.mxu0 %vm4240_vm2, %v4239_v35 }
 0x471   :  { %3999 = vmatprep.subr.bf16.mxu0 %v4241_v42 }
 0x474   :  { %4001 = vmatpush3.bf16.msra.mxu0 %v4731_v52 }
 0x475   :  { %4008 = vmatprep.subr.bf16.mxu0 %v4241_v42 }
 0x53a   :  { %v1299_v29 = vpop.f32.mrb[12].mxu0  ;;  %v1379_v17 = vpop.f32.mrb[14].mxu1 }
 0x53b   :  { %v1304_v18 = vrot.slane %v1299_v29, 4  ;;  %v1384_v19 = vrot.slane %v1379_v17, 4  ;;  %v3598_v38 = vpop.f32.mrb[13].mxu0  ;;  %v3609_v20 = vpop.f32.mrb[15].mxu1 }
 0x53d   :  { %v1306_v21 = vadd.f32 %v1304_v18, %v4794_v8  ;;  %v1386_v22 = vadd.f32 %v1384_v19, %v4798_v15 }
 0x53f   :  { %v3148_v46 = vmul.f32 -1.442695, %v1306_v21  ;;  %v3150_v23 = vmul.f32 -1.442695, %v1386_v22 }
 0x541   :  { %4131 = vpow2.f32 %v3148_v46 }
 0x542   :  { %4133 = vpow2.f32 %v3150_v23  ;;  %v1459_v24 = vpop.f32.mrb[14].mxu0  ;;  %v3165_v23 = vld [vmem:[%s5182_s13 + $0x40] sm:$0xff] }
 0x543   :  { %v3620_v25 = vpop.f32.mrb[15].mxu0  ;;  %v1460_v31 = vadd.f32 %v4804_v26, %v1459_v24 }
 0x544   :  { %v3166_v25 = vld [vmem:[%s5182_s13 + $0x48] sm:$0xff] }
 0x545   :  { %v1464_v32 = vrot.slane %v1460_v31, 4  ;;  %v3167_v31 = vld [vmem:[%s5182_s13 + $0x50] sm:$0xff] }
 0x54b   :  { %v4132_v27 = vpop.eup %4131 }
 0x54c   :  { %v4134_v52 = vpop.eup %4133  ;;  %v1310_v28 = vadd.f32 1.0, %v4132_v27  ;;  %v1985_v27 = vld [vmem:[%s5183_s14 + $0x8] sm:$0xff] }
 0x54d   :  { %v1390_v30 = vadd.f32 1.0, %v4134_v52 }
 0x54e   :  { %4135 = vrcp.f32 %v1310_v28  ;;  %v4021_v28 = vpack.c.bf16 %v3166_v25, %v3165_v23 }
 0x54f   :  { %4137 = vrcp.f32 %v1390_v30 }
 0x558   :  { %v4136_v34 = vpop.eup %4135 }
 0x559   :  { %v4138_v37 = vpop.eup %4137  ;;  %v1466_v39 = vmul.f32 %v4136_v34, %v1464_v32  ;;  %v3168_v32 = vld [vmem:[%s5182_s13 + $0x58] sm:$0xff]  ;;  %v1986_v34 = vld [vmem:[%s5183_s14 + $0x10] sm:$0xff] }
 0x55a   :  { %v1473_v40 = vmul.f32 %v4138_v37, %v1471_v36  ;;  %v1469_v43 = vsub.f32 1.0, %v4138_v37  ;;  %v1987_v36 = vld [vmem:[%s5183_s14 + $0x18] sm:$0xff] }
 0x55b   :  { %v1467_v41 = vadd.f32 %v1466_v39, %v4810_v33  ;;  %v4024_v39 = vpack.c.bf16 %v3168_v32, %v3167_v31 }
 0x55d   :  { %4139 = vtanh.f32 %v1467_v41  ;;  %v3172_v41 = vld [vmem:[%s5183_s14 + $0x20] sm:$0xff] }
 0x567   :  { %v4140_v44 = vpop.eup %4139 }
 0x568   :  { %v1470_v47 = vmul.f32 %v4140_v44, %v1469_v43  ;;  %v3173_v43 = vld [vmem:[%s5183_s14 + $0x28] sm:$0xff]  ;;  %v3176_v44 = vld [vmem:[%s5183_s14 + $0x40] sm:$0xff] }
 0x56a   :  { %v1474_v48 = vadd.f32 %v1473_v40, %v1470_v47  ;;  %v4949_v40 = vpack.c.bf16 %v1987_v36, %v1986_v34  ;;  %v3177_v47 = vld [vmem:[%s5183_s14 + $0x48] sm:$0xff] }
 0x56c   :  { %v1476_v50 = vrot.slane %v1474_v48, 4  ;;  %v4871_v51 = vsel %vm1725_vm6, %v1724_v49, %v1474_v48  ;;  %v1717_v20 = vrot.slane %v1474_v48, 6  ;;  %v4973_v48 = vld [vmem:[%s5202_s29 + $0x2] sm:$0x3]  ;;  %v4975_v49 = vpack.c.bf16 %v3173_v43, %v3172_v41 }
 0x56e   :  { %3630 = vmatmul.mubr.msk.f32.vlgmr.msra.gmra.mrb[16].mxu1 %vm380_vm3, %v1476_v50  ;;  %3641 = vmatmul.mubr.msk.f32.vlgmr.msra.gmra.mrb[16].mxu0 %vm380_vm3, %v1476_v50 }
 0x56f   :  { %4004 = vmatpush3.bf16.msra.mxu1 %v4744_v55  ;;  %3651 = vmatprep.mubr.msk.f32.mxu1 %vm4240_vm2, %v4239_v35  ;;  %v1729_v55 = vld [vmem:[%s5182_s13] sm:$0xff] }
 0x570   :  { %4005 = vmatprep.subr.bf16.mxu1 %v4241_v42  ;;  %3662 = vmatprep.mubr.msk.f32.mxu0 %vm4240_vm2, %v4239_v35 }
 0x573   :  { %4007 = vmatpush3.bf16.msra.mxu1 %v4758_v58  ;;  %v4009_v58 = vpack.c.bf16 %v1730_v45, %v1729_v55  ;;  %v4985_v55 = vpack.c.bf16 %v3177_v47, %v3176_v44  ;;  %v3178_v45 = vld [vmem:[%s5183_s14 + $0x50] sm:$0xff] }
 0x574   :  { %4014 = vmatprep.subr.bf16.mxu1 %v4241_v42  ;;  %v5003_v54 = vpack.c.bf16 %v3179_v53, %v3178_v45 }
 0x575   :  { %4010 = vmatpush3.bf16.msra.mxu0 %v4009_v58 }
 0x576   :  { %3652 = vmatmul.mubr.msk.f32.vlgmr.msra.gmra.mrb[18].mxu1 %vm380_vm3, %v1476_v50  ;;  %4011 = vmatprep.subr.bf16.mxu0 %v4241_v42  ;;  %v3174_v50 = vld [vmem:[%s5183_s14 + $0x30] sm:$0xff] }
 0x577   :  { %3673 = vmatprep.mubr.msk.f32.mxu1 %vm4240_vm2, %v4239_v35  ;;  %4016 = vmatpush3.bf16.msra.mxu1 %v4015_v59  ;;  %v1735_v59 = vadd.f32 %v1734_v57, %v1733_v56 }
 0x578   :  { %4017 = vmatprep.subr.bf16.mxu1 %v4241_v42 }
 0x579   :  { %4013 = vmatpush3.bf16.msra.mxu0 %v4012_v62 }
 0x57a   :  { %4020 = vmatprep.subr.bf16.mxu0 %v4241_v42 }
 0x57b   :  { %4019 = vmatpush3.bf16.msra.mxu1 %v4018_v63 }
 0x57c   :  { %4026 = vmatprep.subr.bf16.mxu1 %v4241_v42 }
 0x641   :  { %v1545_v1 = vpop.f32.mrb[16].mxu1  ;;  %v1625_v2 = vpop.f32.mrb[16].mxu0 }
 0x642   :  { %v1550_v3 = vrot.slane %v1545_v1, 2  ;;  %v1630_v4 = vrot.slane %v1625_v2, 2  ;;  %v3631_v5 = vpop.f32.mrb[17].mxu1  ;;  %v3642_v6 = vpop.f32.mrb[17].mxu0  ;;  %v1740_v1 = vrot.slane %v1735_v59, %v4785_v0  ;;  %v3162_v2 = vld [vmem:[%s5184_s15 + $0x1] sm:$0x1] }
 0x644   :  { %v1552_v7 = vadd.f32 %v1550_v3, %v4794_v8  ;;  %v1632_v9 = vadd.f32 %v1630_v4, %v4798_v15  ;;  %v3163_v3 = vld [vmem:[%s5185_s16 + $0x1] sm:$0x1] }
 0x645   :  { %v1824_v5 = vadd.f32 %v3163_v3, %v3162_v2 }
 0x646   :  { %v3153_v10 = vmul.f32 -1.442695, %v1552_v7  ;;  %v3155_v11 = vmul.f32 -1.442695, %v1632_v9 }
 0x648   :  { %4141 = vpow2.f32 %v3153_v10 }
 0x649   :  { %4143 = vpow2.f32 %v3155_v11  ;;  %v1705_v12 = vpop.f32.mrb[18].mxu1 }
 0x64a   :  { %v3653_v13 = vpop.f32.mrb[19].mxu1  ;;  %v1706_v18 = vadd.f32 %v4804_v26, %v1705_v12  ;;  %v1984_v26 = vld [vmem:[%s5183_s14] sm:$0xff]  ;;  %v1829_v12 = vrot.slane %v1824_v5, %v4785_v0 }
 0x64b   :  { %v4930_v30 = vpack.c.bf16 %v1985_v27, %v1984_v26 }
 0x64c   :  { %v1710_v19 = vrot.slane %v1706_v18, 2 }
 0x652   :  { %v4142_v14 = vpop.eup %4141 }
 0x653   :  { %v4144_v16 = vpop.eup %4143  ;;  %v1556_v29 = vadd.f32 1.0, %v4142_v14 }
 0x654   :  { %v1636_v17 = vadd.f32 1.0, %v4144_v16 }
 0x655   :  { %4145 = vrcp.f32 %v1556_v29 }
 0x656   :  { %4147 = vrcp.f32 %v1636_v17 }
 0x65f   :  { %v4146_v38 = vpop.eup %4145 }
 0x660   :  { %v4148_v8 = vpop.eup %4147  ;;  %v1712_v21 = vmul.f32 %v4146_v38, %v1710_v19 }
 0x661   :  { %v1719_v15 = vmul.f32 %v4148_v8, %v1717_v20  ;;  %v1715_v46 = vsub.f32 1.0, %v4148_v8 }
 0x662   :  { %v1713_v22 = vadd.f32 %v1712_v21, %v4810_v33  ;;  %v5051_v21 = vld [vmem:[%s5185_s16 + $0x2] ss:$0 sm:$0xff] }
 0x664   :  { %4149 = vtanh.f32 %v1713_v22 }
 0x66e   :  { %v4150_v24 = vpop.eup %4149 }
 0x66f   :  { %v1716_v33 = vmul.f32 %v4150_v24, %v1715_v46  ;;  %v3170_v46 = vld [vmem:[%s5184_s15 + $0x2] ss:$0 sm:$0xff] }
 0x671   :  { %v1720_v52 = vadd.f32 %v1719_v15, %v1716_v33 }
 0x673   :  { %v1728_v37 = vsel %vm1727_vm7, %v4871_v51, %v1720_v52  ;;  %1722 = vst.msk [vmem:[#allocation4 - $0x6] sm:$0xc0] %vm1721_vm8, %v1720_v52  ;;  %v3175_v51 = vld [vmem:[%s5183_s14 + $0x38] sm:$0xff] }
 0x674   :  { %3663 = vmatmul.mubr.msk.f32.vlgmr.msra.gmra.mrb[18].mxu0 %vm380_vm3, %v1728_v37  ;;  %3674 = vmatmul.mubr.msk.f32.vlgmr.msra.gmra.mrb[20].mxu1 %vm380_vm3, %v1728_v37  ;;  %v4997_v58 = vpack.c.bf16 %v3175_v51, %v3174_v50 }
 0x675   :  { %4022 = vmatpush3.bf16.msra.mxu0 %v4021_v28  ;;  %4028 = vmatpush3.bf16.msra.mxu1 %v4930_v30 }
 0x676   :  { %4023 = vmatprep.subr.bf16.mxu0 %v4241_v42  ;;  %4029 = vmatprep.subr.bf16.mxu1 %v4241_v42 }
 0x677   :  { %3684 = vmatprep.mubr.msk.f32.mxu0 %vm4240_vm2, %v4239_v35  ;;  %3695 = vmatprep.mubr.msk.f32.mxu1 %vm4240_vm2, %v4239_v35 }
 0x679   :  { %4025 = vmatpush3.bf16.msra.mxu0 %v4024_v39  ;;  %4031 = vmatpush3.bf16.msra.mxu1 %v4949_v40 }
 0x67a   :  { %4032 = vmatprep.subr.bf16.mxu0 %v4241_v42  ;;  %4038 = vmatprep.subr.bf16.mxu1 %v4241_v42 }
 0x67c   :  { %3685 = vmatmul.mubr.msk.f32.vlgmr.msra.gmra.mrb[20].mxu0 %vm380_vm3, %v1728_v37  ;;  %3696 = vmatmul.mubr.msk.f32.vlgmr.msra.gmra.mrb[22].mxu1 %vm380_vm3, %v4973_v48 }
 0x67d   :  { %4034 = vmatpush3.bf16.msra.mxu0 %v4975_v49  ;;  %3706 = vmatprep.mubr.msk.f32.mxu0 %vm4240_vm2, %v4239_v35 }
 0x67e   :  { %4035 = vmatprep.subr.bf16.mxu0 %v4241_v42  ;;  %4040 = vmatpush3.bf16.msra.mxu1 %v4985_v55 }
 0x67f   :  { %4041 = vmatprep.subr.bf16.mxu1 %v4241_v42  ;;  %3717 = vmatprep.mubr.msk.f32.mxu1 %vm4240_vm2, %v4239_v35 }
 0x681   :  { %4037 = vmatpush3.bf16.msra.mxu0 %v4997_v58 }
 0x682   :  { %4043 = vmatpush3.bf16.msra.mxu1 %v5003_v54  ;;  %4044 = vmatprep.subr.bf16.mxu0 %v4241_v42 }
 0x683   :  { %4050 = vmatprep.subr.bf16.mxu1 %v4241_v42 }
 0x684   :  { %3707 = vmatmul.mubr.msk.f32.vlgmr.msra.gmra.mrb[22].mxu0 %vm380_vm3, %v4973_v48 }
 0x685   :  { %3718 = vmatmul.mubr.msk.f32.vlgmr.msra.gmra.mrb[24].mxu1 %vm380_vm3, %v4973_v48  ;;  %4046 = vmatpush3.bf16.msra.mxu0 %v4930_v30 }
 0x686   :  { %4052 = vmatpush3.bf16.msra.mxu1 %v4975_v49  ;;  %4047 = vmatprep.subr.bf16.mxu0 %v4241_v42 }
 0x687   :  { %4053 = vmatprep.subr.bf16.mxu1 %v4241_v42  ;;  %3728 = vmatprep.mubr.msk.f32.mxu0 %vm4240_vm2, %v4239_v35 }
 0x688   :  { %3739 = vmatprep.mubr.msk.f32.mxu1 %vm4240_vm2, %v4239_v35 }
 0x689   :  { %4049 = vmatpush3.bf16.msra.mxu0 %v4949_v40 }
 0x68a   :  { %4055 = vmatpush3.bf16.msra.mxu1 %v4997_v58  ;;  %4056 = vmatprep.subr.bf16.mxu0 %v4241_v42 }
 0x68b   :  { %4062 = vmatprep.subr.bf16.mxu1 %v4241_v42 }
 0x747   :  { %v1811_v60 = vpop.f32.mrb[18].mxu0  ;;  %v1897_v61 = vpop.f32.mrb[20].mxu1 }
 0x748   :  { %v3664_v62 = vpop.f32.mrb[19].mxu0  ;;  %v3675_v63 = vpop.f32.mrb[21].mxu1  ;;  %v5041_v4 = vadd.f32 %v1811_v60, %v1740_v1  ;;  %v5045_v14 = vadd.f32 %v1897_v61, %v1829_v12 }
 0x74f   :  { %v1980_v6 = vpop.f32.mrb[20].mxu0  ;;  %v2071_v7 = vpop.f32.mrb[22].mxu1 }
 0x750   :  { %v2075_v9 = vadd.f32 %v2071_v7, %v5041_v4  ;;  %v3686_v10 = vpop.f32.mrb[21].mxu0  ;;  %v3697_v11 = vpop.f32.mrb[23].mxu1  ;;  %v5057_v24 = vadd.f32 %v3170_v46, %v1980_v6 }
 0x752   :  { %v3183_v13 = vmul.f32 -1.442695, %v2075_v9 }
 0x754   :  { %4151 = vpow2.f32 %v3183_v13 }
 0x757   :  { %v2148_v16 = vpop.f32.mrb[22].mxu0 }
 0x758   :  { %v2152_v29 = vadd.f32 %v2148_v16, %v5045_v14  ;;  %v3708_v17 = vpop.f32.mrb[23].mxu0  ;;  %v2231_v18 = vpop.f32.mrb[24].mxu1 }
 0x759   :  { %v3719_v19 = vpop.f32.mrb[25].mxu1  ;;  %v2232_v22 = vadd.f32 %v5051_v21, %v2231_v18 }
 0x75a   :  { %v3185_v38 = vmul.f32 -1.442695, %v2152_v29 }
 0x75c   :  { %4153 = vpow2.f32 %v3185_v38 }
 0x75e   :  { %v4152_v20 = vpop.eup %4151 }
 0x75f   :  { %v2079_v8 = vadd.f32 1.0, %v4152_v20 }
 0x761   :  { %4155 = vrcp.f32 %v2079_v8 }
 0x766   :  { %v4154_v0 = vpop.eup %4153 }
 0x767   :  { %v2156_v15 = vadd.f32 1.0, %v4154_v0 }
 0x769   :  { %4157 = vrcp.f32 %v2156_v15 }
 0x76b   :  { %v4156_v23 = vpop.eup %4155 }
 0x76c   :  { %v2235_v25 = vmul.f32 %v4156_v23, %v2232_v22 }
 0x76e   :  { %v2236_v26 = vadd.f32 %v2235_v25, %v5057_v24 }
 0x770   :  { %4159 = vtanh.f32 %v2236_v26 }
 0x773   :  { %v4158_v27 = vpop.eup %4157 }
 0x774   :  { %v2238_v33 = vsub.f32 1.0, %v4158_v27  ;;  %v2240_v31 = vmul.f32 %v4158_v27, %v4973_v48 }
 0x77a   :  { %v4160_v52 = vpop.eup %4159 }
 0x77b   :  { %v2239_v28 = vmul.f32 %v4160_v52, %v2238_v33 }
 0x77d   :  { %v2241_v32 = vadd.f32 %v2240_v31, %v2239_v28 }
 0x77f   :  { %3729 = vmatmul.mubr.msk.f32.vlgmr.msra.gmra.mrb[24].mxu0 %vm380_vm3, %v2241_v32  ;;  %3740 = vmatmul.mubr.msk.f32.vlgmr.msra.gmra.mrb[26].mxu1 %vm380_vm3, %v2241_v32  ;;  %v2483_v63 = vrot.slane %v2241_v32, 6 }
 0x780   :  { %4058 = vmatpush3.bf16.msra.mxu0 %v4985_v55  ;;  %3750 = vmatprep.mubr.msk.f32.mxu0 %vm4240_vm2, %v4239_v35 }
 0x781   :  { %4059 = vmatprep.subr.bf16.mxu0 %v4241_v42  ;;  %4064 = vmatpush3.bf16.msra.mxu1 %v4930_v30 }
 0x782   :  { %4065 = vmatprep.subr.bf16.mxu1 %v4241_v42  ;;  %3761 = vmatprep.mubr.msk.f32.mxu1 %vm4240_vm2, %v4239_v35 }
 0x784   :  { %4061 = vmatpush3.bf16.msra.mxu0 %v5003_v54 }
 0x785   :  { %4068 = vmatprep.subr.bf16.mxu0 %v4241_v42  ;;  %4067 = vmatpush3.bf16.msra.mxu1 %v4949_v40 }
 0x786   :  { %4074 = vmatprep.subr.bf16.mxu1 %v4241_v42 }
 0x787   :  { %3751 = vmatmul.mubr.msk.f32.vlgmr.msra.gmra.mrb[26].mxu0 %vm380_vm3, %v2241_v32 }
 0x788   :  { %4070 = vmatpush3.bf16.msra.mxu0 %v4975_v49  ;;  %3772 = vmatprep.mubr.msk.f32.mxu0 %vm4240_vm2, %v4239_v35 }
 0x789   :  { %4071 = vmatprep.subr.bf16.mxu0 %v4241_v42 }
 0x78c   :  { %4073 = vmatpush3.bf16.msra.mxu0 %v4997_v58 }
 0x78d   :  { %4080 = vmatprep.subr.bf16.mxu0 %v4241_v42 }
 0x852   :  { %v2311_v34 = vpop.f32.mrb[24].mxu0  ;;  %v2391_v36 = vpop.f32.mrb[26].mxu1 }
 0x853   :  { %v2316_v37 = vrot.slane %v2311_v34, 6  ;;  %v2396_v39 = vrot.slane %v2391_v36, 6  ;;  %v3730_v41 = vpop.f32.mrb[25].mxu0  ;;  %v3741_v43 = vpop.f32.mrb[27].mxu1 }
 0x855   :  { %v2318_v44 = vadd.f32 %v2316_v37, %v5041_v4  ;;  %v2398_v47 = vadd.f32 %v2396_v39, %v5045_v14  ;;  %v2981_v37 = vld [vmem:[%s5186_s17] sm:$0xff]  ;;  %v2983_v39 = vld [vmem:[%s5186_s17 + $0x10] sm:$0xff] }
 0x857   :  { %v3189_v48 = vmul.f32 -1.442695, %v2318_v44  ;;  %v3191_v50 = vmul.f32 -1.442695, %v2398_v47 }
 0x859   :  { %4161 = vpow2.f32 %v3189_v48 }
 0x85a   :  { %4163 = vpow2.f32 %v3191_v50  ;;  %v2471_v51 = vpop.f32.mrb[26].mxu0 }
 0x85b   :  { %v3752_v45 = vpop.f32.mrb[27].mxu0  ;;  %v2472_v60 = vadd.f32 %v5051_v21, %v2471_v51 }
 0x85d   :  { %v2476_v61 = vrot.slane %v2472_v60, 6 }
 0x863   :  { %v4162_v53 = vpop.eup %4161 }
 0x864   :  { %v4164_v56 = vpop.eup %4163  ;;  %v2322_v57 = vadd.f32 1.0, %v4162_v53 }
 0x865   :  { %v2402_v59 = vadd.f32 1.0, %v4164_v56 }
 0x866   :  { %4165 = vrcp.f32 %v2322_v57 }
 0x867   :  { %4167 = vrcp.f32 %v2402_v59 }
 0x870   :  { %v4166_v62 = vpop.eup %4165 }
 0x871   :  { %v4168_v1 = vpop.eup %4167  ;;  %v2478_v2 = vmul.f32 %v4166_v62, %v2476_v61 }
 0x872   :  { %v2485_v3 = vmul.f32 %v4168_v1, %v2483_v63  ;;  %v2481_v6 = vsub.f32 1.0, %v4168_v1 }
 0x873   :  { %v2479_v5 = vadd.f32 %v2478_v2, %v5057_v24 }
 0x875   :  { %4169 = vtanh.f32 %v2479_v5 }
 0x87f   :  { %v4170_v7 = vpop.eup %4169 }
 0x880   :  { %v2482_v9 = vmul.f32 %v4170_v7, %v2481_v6 }
 0x882   :  { %v2486_v10 = vadd.f32 %v2485_v3, %v2482_v9 }
 0x884   :  { %v2488_v11 = vrot.slane %v2486_v10, 2  ;;  %v2729_v25 = vrot.slane %v2486_v10, 6 }
 0x886   :  { %3762 = vmatmul.mubr.msk.f32.vlgmr.msra.gmra.mrb[28].mxu1 %vm380_vm3, %v2488_v11  ;;  %3773 = vmatmul.mubr.msk.f32.vlgmr.msra.gmra.mrb[28].mxu0 %vm380_vm3, %v2488_v11 }
 0x887   :  { %4076 = vmatpush3.bf16.msra.mxu1 %v4985_v55  ;;  %3783 = vmatprep.mubr.msk.f32.mxu1 %vm4240_vm2, %v4239_v35 }
 0x888   :  { %4077 = vmatprep.subr.bf16.mxu1 %v4241_v42  ;;  %4082 = vmatpush3.bf16.msra.mxu0 %v4930_v30 }
 0x889   :  { %4083 = vmatprep.subr.bf16.mxu0 %v4241_v42  ;;  %3794 = vmatprep.mubr.msk.f32.mxu0 %vm4240_vm2, %v4239_v35 }
 0x88b   :  { %4079 = vmatpush3.bf16.msra.mxu1 %v5003_v54 }
 0x88c   :  { %4086 = vmatprep.subr.bf16.mxu1 %v4241_v42  ;;  %4085 = vmatpush3.bf16.msra.mxu0 %v4949_v40 }
 0x88d   :  { %4092 = vmatprep.subr.bf16.mxu0 %v4241_v42 }
 0x88e   :  { %3784 = vmatmul.mubr.msk.f32.vlgmr.msra.gmra.mrb[30].mxu1 %vm380_vm3, %v2488_v11 }
 0x88f   :  { %4088 = vmatpush3.bf16.msra.mxu1 %v4975_v49  ;;  %3805 = vmatprep.mubr.msk.f32.mxu1 %vm4240_vm2, %v4239_v35 }
 0x890   :  { %4089 = vmatprep.subr.bf16.mxu1 %v4241_v42 }
 0x893   :  { %4091 = vmatpush3.bf16.msra.mxu1 %v4997_v58 }
 0x894   :  { %4098 = vmatprep.subr.bf16.mxu1 %v4241_v42 }
 0x959   :  { %v2557_v30 = vpop.f32.mrb[28].mxu1  ;;  %v2637_v12 = vpop.f32.mrb[28].mxu0 }
 0x95a   :  { %v2562_v13 = vrot.slane %v2557_v30, 4  ;;  %v2642_v16 = vrot.slane %v2637_v12, 4  ;;  %v3763_v40 = vpop.f32.mrb[29].mxu1  ;;  %v3774_v29 = vpop.f32.mrb[29].mxu0 }
 0x95c   :  { %v2564_v17 = vadd.f32 %v2562_v13, %v5041_v4  ;;  %v2644_v18 = vadd.f32 %v2642_v16, %v5045_v14 }
 0x95e   :  { %v3194_v49 = vmul.f32 -1.442695, %v2564_v17  ;;  %v3196_v19 = vmul.f32 -1.442695, %v2644_v18 }
 0x960   :  { %4171 = vpow2.f32 %v3194_v49 }
 0x961   :  { %4173 = vpow2.f32 %v3196_v19  ;;  %v2717_v38 = vpop.f32.mrb[30].mxu1 }
 0x962   :  { %v3785_v20 = vpop.f32.mrb[31].mxu1  ;;  %v2718_v22 = vadd.f32 %v5051_v21, %v2717_v38 }
 0x964   :  { %v2722_v46 = vrot.slane %v2718_v22, 4 }
 0x96a   :  { %v4172_v8 = vpop.eup %4171 }
 0x96b   :  { %v4174_v58 = vpop.eup %4173  ;;  %v2568_v0 = vadd.f32 1.0, %v4172_v8 }
 0x96c   :  { %v2648_v15 = vadd.f32 1.0, %v4174_v58 }
 0x96d   :  { %4175 = vrcp.f32 %v2568_v0 }
 0x96e   :  { %4177 = vrcp.f32 %v2648_v15 }
 0x977   :  { %v4176_v23 = vpop.eup %4175 }
 0x978   :  { %v4178_v26 = vpop.eup %4177  ;;  %v2724_v27 = vmul.f32 %v4176_v23, %v2722_v46 }
 0x979   :  { %v2731_v33 = vmul.f32 %v4178_v26, %v2729_v25  ;;  %v2727_v28 = vsub.f32 1.0, %v4178_v26 }
 0x97a   :  { %v2725_v52 = vadd.f32 %v2724_v27, %v5057_v24 }
 0x97c   :  { %4179 = vtanh.f32 %v2725_v52 }
 0x986   :  { %v4180_v31 = vpop.eup %4179 }
 0x987   :  { %v2728_v32 = vmul.f32 %v4180_v31, %v2727_v28 }
 0x989   :  { %v2732_v34 = vadd.f32 %v2731_v33, %v2728_v32 }
 0x98b   :  { %v2734_v36 = vrot.slane %v2732_v34, 4  ;;  %v2975_v5 = vrot.slane %v2732_v34, 6 }
 0x98d   :  { %3795 = vmatmul.mubr.msk.f32.vlgmr.msra.gmra.mrb[30].mxu0 %vm380_vm3, %v2734_v36  ;;  %3806 = vmatmul.mubr.msk.f32.vlgmr.msra.gmra.mrb[32].mxu1 %vm380_vm3, %v2734_v36 }
 0x98e   :  { %4094 = vmatpush3.bf16.msra.mxu0 %v4985_v55  ;;  %3816 = vmatprep.mubr.msk.f32.mxu0 %vm4240_vm2, %v4239_v35  ;;  %v2982_v55 = vld [vmem:[%s5186_s17 + $0x8] sm:$0xff] }
 0x98f   :  { %4095 = vmatprep.subr.bf16.mxu0 %v4241_v42  ;;  %3827 = vmatprep.mubr.msk.f32.mxu1 %vm4240_vm2, %v4239_v35  ;;  %v4099_v41 = vpack.c.bf16 %v2982_v55, %v2981_v37  ;;  %v2984_v35 = vld [vmem:[%s5186_s17 + $0x18] sm:$0xff]  ;;  %s4243_s17 = smov [#allocation4]  }
 0x990   :  { %s3083_s12 = sshll.u32 %s4243_s17, 4  ;;  %s3084_s12 = int_to_ptr.vmem [resolvable:$true] %s3083_s12 }
 0x991   :  { %4100 = vmatpush3.bf16.msra.mxu1 %v4099_v41  ;;  %s4191_s0 = scalar_lea.vmem %s3084_s12, 64  ;;  %p4196_p1 = scmp.lt.s32.totalorder %s3084_s12, %s3084_s12 }
 0x992   :  { %4097 = vmatpush3.bf16.msra.mxu0 %v5003_v54  ;;  %v4102_v54 = vpack.c.bf16 %v2984_v35, %v2983_v39  ;;  %4101 = vmatprep.subr.bf16.mxu1 %v4241_v42  ;;  %p4192_p0 = scmp.ne.s32.totalorder %s3084_s12, %s4191_s0  ;;  %p4197_p2 = scmp.lt.s32.totalorder %s4191_s0, %s4191_s0 }
 0x994   :  { %p4198_p3 = por %p4197_p2, %p4196_p1 }
 0x995   :  { %3817 = vmatmul.mubr.msk.f32.vlgmr.msra.gmra.mrb[32].mxu0 %vm380_vm3, %v2734_v36  ;;  %4103 = vmatpush3.bf16.msra.mxu1 %v4102_v54 }
 0x996   :  { %p4199_p4 = pnand %p4198_p3, %p4192_p0 }
 0xa60   :  { %v2803_v43 = vpop.f32.mrb[30].mxu0  ;;  %v2883_v44 = vpop.f32.mrb[32].mxu1 }
 0xa61   :  { %v2808_v47 = vrot.slane %v2803_v43, 2  ;;  %v2888_v48 = vrot.slane %v2883_v44, 2  ;;  %v3796_v50 = vpop.f32.mrb[31].mxu0  ;;  %v3807_v51 = vpop.f32.mrb[33].mxu1 }
 0xa63   :  { %v2810_v45 = vadd.f32 %v2808_v47, %v5041_v4  ;;  %v2890_v53 = vadd.f32 %v2888_v48, %v5045_v14 }
 0xa65   :  { %v3199_v56 = vmul.f32 -1.442695, %v2810_v45  ;;  %v3201_v57 = vmul.f32 -1.442695, %v2890_v53 }
 0xa67   :  { %4181 = vpow2.f32 %v3199_v56 }
 0xa68   :  { %4183 = vpow2.f32 %v3201_v57  ;;  %v2963_v59 = vpop.f32.mrb[32].mxu0 }
 0xa69   :  { %v3818_v60 = vpop.f32.mrb[33].mxu0  ;;  %v2964_v1 = vadd.f32 %v5051_v21, %v2963_v59 }
 0xa6b   :  { %v2968_v2 = vrot.slane %v2964_v1, 2 }
 0xa71   :  { %v4182_v61 = vpop.eup %4181 }
 0xa72   :  { %v4184_v62 = vpop.eup %4183  ;;  %v2814_v42 = vadd.f32 1.0, %v4182_v61 }
 0xa73   :  { %v2894_v63 = vadd.f32 1.0, %v4184_v62 }
 0xa74   :  { %4185 = vrcp.f32 %v2814_v42 }
 0xa75   :  { %4187 = vrcp.f32 %v2894_v63 }
 0xa7e   :  { %v4186_v3 = vpop.eup %4185 }
 0xa7f   :  { %v4188_v4 = vpop.eup %4187  ;;  %v2970_v6 = vmul.f32 %v4186_v3, %v2968_v2 }
 0xa80   :  { %v2977_v14 = vmul.f32 %v4188_v4, %v2975_v5  ;;  %v2973_v9 = vsub.f32 1.0, %v4188_v4 }
 0xa81   :  { %v2971_v7 = vadd.f32 %v2970_v6, %v5057_v24 }
 0xa83   :  { %4189 = vtanh.f32 %v2971_v7 }
 0xa8d   :  { %v4190_v10 = vpop.eup %4189 }
 0xa8e   :  { %v2974_v11 = vmul.f32 %v4190_v10, %v2973_v9 }
 0xa90   :  { %v2978_v30 = vadd.f32 %v2977_v14, %v2974_v11 }
 0xa92   :  { %v2993_v12 = vrot.slane %v2978_v30, 6  ;;  %2980 = vst.msk [vmem:[#allocation4 - $0x4] sm:$0xc0] %vm1721_vm8, %v2978_v30 }
 0xa94   :  { %3828 = vmatmul.mubr.msk.f32.vlgmr.msra.gmra.mrb[34].mxu1 %vm380_vm3, %v2993_v12 }
 0xa95   :  { %4202 = shalt.err (!%p4199_p4)
}
 0xa96   :  { %s4203_s29 = scalar_lea.hbm %s5189_s20, 64 }
 0xa97   :  { %p4204_p5 = scmp.ne.s32.totalorder %s5189_s20, %s4203_s29  ;;  %p4207_p6 = scmp.lt.u32.totalorder %s4203_s29, %s5189_s20 }
 0xa99   :  { %p4209_p7 = pnand %p4207_p6, %p4204_p5 }
 0xa9b   :  { %4212 = shalt.err (!%p4209_p7)
}
 0xa9c   :  { %s4244_s24 = smov 2   ;;  %v3203_v21 = vld [vmem:[%s5187_s18] ss:$0 sm:$0xff]  ;;  %s4245_s2 = smov [#allocation2]   ;;  %vm3066_vm9 = vcmask 17408  }
 0xa9d   :  { %3089 = dma.vmem_to_hbm [thread:$0]  %s3084_s12, 64, %s5189_s20, [#allocation5], %s4242_s23, %s4242_s23, %s4244_s24  }
 0xa9e   :  { %s3074_s25 = sshll.u32 %s4245_s2, 4  ;;  %s3075_s25 = int_to_ptr.vmem [resolvable:$true] %s3074_s25 }
 0xa9f   :  { %s4213_s3 = scalar_lea.vmem %s3075_s25, 32  ;;  %p4218_p9 = scmp.lt.s32.totalorder %s3075_s25, %s3075_s25 }
 0xaa0   :  { %p4214_p8 = scmp.ne.s32.totalorder %s3075_s25, %s4213_s3  ;;  %p4219_p10 = scmp.lt.s32.totalorder %s4213_s3, %s4213_s3 }
 0xaa2   :  { %p4220_p11 = por %p4219_p10, %p4218_p9 }
 0xaa4   :  { %p4221_p12 = pnand %p4220_p11, %p4214_p8 }
 0xb67   :  { %v3062_v24 = vpop.f32.mrb[34].mxu1 }
 0xb68   :  { %v3063_v13 = vadd.f32 %v3203_v21, %v3062_v24  ;;  %v3829_v16 = vpop.f32.mrb[35].mxu1 }
 0xb6a   :  { %3067 = vst.msk [vmem:[#allocation2] sm:$0x3] %vm3066_vm9, %v3063_v13 }
 0xb6b   :  { %4224 = shalt.err (!%p4221_p12)
}
 0xb6c   :  { %s4225_s26 = scalar_lea.hbm %s5188_s19, 32 }
 0xb6d   :  { %p4226_p13 = scmp.ne.s32.totalorder %s5188_s19, %s4225_s26  ;;  %p4229_p0 = scmp.lt.u32.totalorder %s4225_s26, %s5188_s19 }
 0xb6f   :  { %p4231_p1 = pnand %p4229_p0, %p4226_p13 }
 0xb71   :  { %4234 = shalt.err (!%p4231_p1)
}
 0xb72   :  { %3077 = dma.vmem_to_hbm [thread:$0]  %s3075_s25, 32, %s5188_s19, [#allocation3]  }
 0xb73   :  { %4235 = dma.done.wait [#allocation3], 32  }
 0xb74   :  { %4236 = vsyncadd [#allocation3], 4294967264 }
 0xb75   :  { %4237 = dma.done.wait [#allocation5], 64  }
 0xb76   :  { %4238 = vsyncadd [#allocation5], 4294967232 }
 0xb77   :  { %3096 = vsyncpa [#allocation3], 1 }
 0xb78   :  { %3097 = vsyncpa [#allocation5], 1 }

</bundles_post_ra>
